<compile_context>
chip_gen: v7x
topology: tpu7x:2x2x1
jax: 0.10.0
libtpu: 0.0.40
codegen_flags: <defaults>
</compile_context>

<pallas_src>
import math

import jax
import jax.numpy as jnp
from jax import lax
from jax.experimental import pallas as pl
from jax.experimental.pallas import tpu as pltpu

# ----------------------------- configuration -----------------------------
B = 2              # batch
IM_SIZE = 32       # image-embedding size (l1 input)
MP_HIDDEN = 48     # mp_hidden_size: encoder states fed to Q-Former cross-attn
QF_HIDDEN = 32     # Q-Former hidden size
QF_HEADS = 4
QF_LAYERS = 2
QF_INTERMEDIATE = 64
CROSS_FREQ = 2     # cross-attention every other layer (layer 0 has it)
NUM_QUERY = 8      # number of learned query tokens
TD_HIDDEN = 64     # td_hidden_size (l2 output)
LN_EPS = 1e-12

_VMEM = pl.BlockSpec(memory_space=pltpu.MemorySpace.VMEM)


# --------------------------- in-kernel helpers ---------------------------
def _gelu_exact(x):
    # PyTorch nn.GELU() default = exact erf-based GELU.
    return 0.5 * x * (1.0 + lax.erf(x * (1.0 / math.sqrt(2.0))))


def _layernorm(h, g, b, eps):
    """Affine LayerNorm over the last dim (f32)."""
    mu = jnp.mean(h, axis=-1, keepdims=True)
    var = jnp.mean((h - mu) ** 2, axis=-1, keepdims=True)
    return (h - mu) * lax.rsqrt(var + eps) * g + b


def _mha(q_src2, kv_src2, bsz, sq, sk, w, num_heads):
    """BERT-style MHA on 2-D activations; batches & heads unrolled in-kernel.

    q_src2: [B*Sq, Hq], kv_src2: [B*Sk, Hkv].  Weights are pre-transposed
    [in, out].  Encoder mask is all-ones -> no masking.  Returns [B*Sq, H].
    """
    wqt, bq, wkt, bk, wvt, bv, wot, bo = w
    hdim = wqt.shape[1]
    d = hdim // num_heads
    scale = 1.0 / math.sqrt(d)
    q2 = jnp.dot(q_src2, wqt, preferred_element_type=jnp.float32) + bq   # [B*Sq, H]
    k2 = jnp.dot(kv_src2, wkt, preferred_element_type=jnp.float32) + bk  # [B*Sk, H]
    v2 = jnp.dot(kv_src2, wvt, preferred_element_type=jnp.float32) + bv  # [B*Sk, H]
    outs = []
    for b in range(bsz):
        qb = q2[b * sq:(b + 1) * sq, :]
        kb = k2[b * sk:(b + 1) * sk, :]
        vb = v2[b * sk:(b + 1) * sk, :]
        proj = jnp.zeros((sq, hdim), jnp.float32)
        for h in range(num_heads):
            sl = slice(h * d, (h + 1) * d)
            s = lax.dot_general(qb[:, sl], kb[:, sl],
                                (((1,), (1,)), ((), ())),
                                preferred_element_type=jnp.float32) * scale
            s = s - jnp.max(s, axis=-1, keepdims=True)
            p = jnp.exp(s)
            p = p / jnp.sum(p, axis=-1, keepdims=True)
            ctx = jnp.dot(p, vb[:, sl], preferred_element_type=jnp.float32)   # [Sq, d]
            # concat(ctx_heads) @ Wo^T  ==  sum_h ctx_h @ Wo^T[h*d:(h+1)*d, :]
            proj = proj + jnp.dot(ctx, wot[sl, :],
                                  preferred_element_type=jnp.float32)
        outs.append(proj)
    att = outs[0] if bsz == 1 else jnp.concatenate(outs, axis=0)
    return att + bo


# ------------------------------ fused kernel ------------------------------
def _make_mapping_kernel(has_cross, num_heads, num_query, eps):
    """Build the single fused kernel for the static layer structure."""

    def kernel(*refs):
        out_ref = refs[-1]
        it = iter(refs[:-1])

        def nxt():
            return next(it)[...].astype(jnp.float32)

        x = nxt()                                     # [B, IM_SIZE]
        bsz = x.shape[0]
        l1_wt, l1_b = nxt(), nxt()
        qt, emb_g, emb_b = nxt(), nxt(), nxt()

        # l1: image embedding -> encoder hidden states (seq length 1; the
        # all-ones encoder attention mask means no masking anywhere below).
        enc2 = jnp.dot(x, l1_wt, preferred_element_type=jnp.float32) + l1_b   # [B, MP_HIDDEN]

        # Q-Former embeddings LayerNorm on the query tokens.  Query tokens are
        # batch-identical, so normalize once and replicate (no zero residual).
        qt_ln = _layernorm(qt, emb_g, emb_b, eps)                             # [NQ, H]
        h2 = qt_ln if bsz == 1 else jnp.concatenate([qt_ln] * bsz, axis=0)    # [B*NQ, H]

        for layer_has_cross in has_cross:
            # --- self-attention + LN ---
            sa_w = tuple(nxt() for _ in range(8))
            g, b = nxt(), nxt()
            sa = _mha(h2, h2, bsz, num_query, num_query, sa_w, num_heads)
            h2 = _layernorm(sa + h2, g, b, eps)
            # --- cross-attention to encoder states + LN ---
            if layer_has_cross:
                ca_w = tuple(nxt() for _ in range(8))
                g, b = nxt(), nxt()
                ca = _mha(h2, enc2, bsz, num_query, 1, ca_w, num_heads)
                h2 = _layernorm(ca + h2, g, b, eps)
            # --- GELU FFN + LN ---
            wit, bi, wot_f, bo_f = nxt(), nxt(), nxt(), nxt()
            g, b = nxt(), nxt()
            inter = _gelu_exact(
                jnp.dot(h2, wit, preferred_element_type=jnp.float32) + bi)
            ffn = jnp.dot(inter, wot_f, preferred_element_type=jnp.float32) + bo_f
            h2 = _layernorm(ffn + h2, g, b, eps)

        # lm_inputs = gelu(l2(qformer_last_hidden_state))
        l2_wt, l2_b = nxt(), nxt()
        y = _gelu_exact(jnp.dot(h2, l2_wt, preferred_element_type=jnp.float32) + l2_b)
        out_ref[...] = y.astype(out_ref.dtype)        # [B*NQ, TD_HIDDEN]

    return kernel


# ------------------------------ parameter init ------------------------------
def _kaiming_normal_t(key, out_f, in_f):
    # nn.init.kaiming_normal_(mode='fan_in', nonlinearity='relu'), stored [in, out].
    std = math.sqrt(2.0 / in_f)
    return (std * jax.random.normal(key, (out_f, in_f), jnp.float32)).T


def _normal02_t(key, out_f, in_f):
    return (0.02 * jax.random.normal(key, (out_f, in_f), jnp.float32)).T


def _row(dim, value=0.0):
    return jnp.full((1, dim), value, jnp.float32)


def init_params(key):
    keys = iter(jax.random.split(key, 64))
    p = {
        "l1_wt": _kaiming_normal_t(next(keys), MP_HIDDEN, IM_SIZE),    # [IM, MP]
        "l1_b": _row(MP_HIDDEN),
        "l2_wt": _kaiming_normal_t(next(keys), TD_HIDDEN, QF_HIDDEN),  # [QF, TD]
        "l2_b": _row(TD_HIDDEN),
        "query_tokens": 0.02 * jax.random.normal(
            next(keys), (NUM_QUERY, QF_HIDDEN), jnp.float32),
        "emb_ln_g": _row(QF_HIDDEN, 1.0),
        "emb_ln_b": _row(QF_HIDDEN),
        "layers": [],
    }

    def attn_params(kv_dim):
        return {
            "wqt": _normal02_t(next(keys), QF_HIDDEN, QF_HIDDEN),
            "bq": _row(QF_HIDDEN),
            "wkt": _normal02_t(next(keys), QF_HIDDEN, kv_dim),
            "bk": _row(QF_HIDDEN),
            "wvt": _normal02_t(next(keys), QF_HIDDEN, kv_dim),
            "bv": _row(QF_HIDDEN),
            "wot": _normal02_t(next(keys), QF_HIDDEN, QF_HIDDEN),
            "bo": _row(QF_HIDDEN),
        }

    for li in range(QF_LAYERS):
        layer = {
            "self": attn_params(QF_HIDDEN),
            "ln_self_g": _row(QF_HIDDEN, 1.0),
            "ln_self_b": _row(QF_HIDDEN),
            "has_cross": (li % CROSS_FREQ == 0),
            "wit": _normal02_t(next(keys), QF_INTERMEDIATE, QF_HIDDEN),
            "bi": _row(QF_INTERMEDIATE),
            "wo_ffnt": _normal02_t(next(keys), QF_HIDDEN, QF_INTERMEDIATE),
            "bo_ffn": _row(QF_HIDDEN),
            "ln_ffn_g": _row(QF_HIDDEN, 1.0),
            "ln_ffn_b": _row(QF_HIDDEN),
        }
        if layer["has_cross"]:
            layer["cross"] = attn_params(MP_HIDDEN)
            layer["ln_cross_g"] = _row(QF_HIDDEN, 1.0)
            layer["ln_cross_b"] = _row(QF_HIDDEN)
        p["layers"].append(layer)
    return p


def _flatten_params(p):
    """Flatten params in the exact order the fused kernel consumes them."""
    attn_keys = ("wqt", "bq", "wkt", "bk", "wvt", "bv", "wot", "bo")
    flat = [p["l1_wt"], p["l1_b"], p["query_tokens"], p["emb_ln_g"], p["emb_ln_b"]]
    has_cross = []
    for lp in p["layers"]:
        has_cross.append(lp["has_cross"])
        flat += [lp["self"][k] for k in attn_keys]
        flat += [lp["ln_self_g"], lp["ln_self_b"]]
        if lp["has_cross"]:
            flat += [lp["cross"][k] for k in attn_keys]
            flat += [lp["ln_cross_g"], lp["ln_cross_b"]]
        flat += [lp["wit"], lp["bi"], lp["wo_ffnt"], lp["bo_ffn"]]
        flat += [lp["ln_ffn_g"], lp["ln_ffn_b"]]
    flat += [p["l2_wt"], p["l2_b"]]
    return flat, tuple(has_cross)


# -------------------------------- forward --------------------------------
def mapping_forward(params, x):
    """x: [B, IM_SIZE] -> lm_inputs: [B, NUM_QUERY, TD_HIDDEN] (one pallas_call)."""
    flat, has_cross = _flatten_params(params)
    bsz = x.shape[0]
    nq = params["query_tokens"].shape[0]
    td = params["l2_wt"].shape[1]

    kernel = _make_mapping_kernel(has_cross, QF_HEADS, nq, LN_EPS)
    out2 = pl.pallas_call(
        kernel,
        out_shape=jax.ShapeDtypeStruct((bsz * nq, td), x.dtype),
        in_specs=[_VMEM] * (1 + len(flat)),
        out_specs=_VMEM,
    )(x, *flat)
    return out2.reshape(bsz, nq, td)


# ---------------------------------- main ----------------------------------
if __name__ == "__main__":
    key = jax.random.PRNGKey(0)
    pkey, xkey = jax.random.split(key)
    params = init_params(pkey)
    x = jax.random.normal(xkey, (B, IM_SIZE), jnp.float32)

    out = mapping_forward(params, x)
    out = jax.block_until_ready(out)

    assert out.shape == (B, NUM_QUERY, TD_HIDDEN), out.shape
    assert bool(jnp.all(jnp.isfinite(out)))
    print("KERNEL_OK")
</pallas_src>

<mosaic_0001>
module attributes {stable_mosaic.version = 11 : i64} {
  func.func @kernel(%arg0: memref<2x32xf32, #tpu.memory_space<vmem>>, %arg1: memref<32x48xf32, #tpu.memory_space<vmem>>, %arg2: memref<1x48xf32, #tpu.memory_space<vmem>>, %arg3: memref<8x32xf32, #tpu.memory_space<vmem>>, %arg4: memref<1x32xf32, #tpu.memory_space<vmem>>, %arg5: memref<1x32xf32, #tpu.memory_space<vmem>>, %arg6: memref<32x32xf32, #tpu.memory_space<vmem>>, %arg7: memref<1x32xf32, #tpu.memory_space<vmem>>, %arg8: memref<32x32xf32, #tpu.memory_space<vmem>>, %arg9: memref<1x32xf32, #tpu.memory_space<vmem>>, %arg10: memref<32x32xf32, #tpu.memory_space<vmem>>, %arg11: memref<1x32xf32, #tpu.memory_space<vmem>>, %arg12: memref<32x32xf32, #tpu.memory_space<vmem>>, %arg13: memref<1x32xf32, #tpu.memory_space<vmem>>, %arg14: memref<1x32xf32, #tpu.memory_space<vmem>>, %arg15: memref<1x32xf32, #tpu.memory_space<vmem>>, %arg16: memref<32x32xf32, #tpu.memory_space<vmem>>, %arg17: memref<1x32xf32, #tpu.memory_space<vmem>>, %arg18: memref<48x32xf32, #tpu.memory_space<vmem>>, %arg19: memref<1x32xf32, #tpu.memory_space<vmem>>, %arg20: memref<48x32xf32, #tpu.memory_space<vmem>>, %arg21: memref<1x32xf32, #tpu.memory_space<vmem>>, %arg22: memref<32x32xf32, #tpu.memory_space<vmem>>, %arg23: memref<1x32xf32, #tpu.memory_space<vmem>>, %arg24: memref<1x32xf32, #tpu.memory_space<vmem>>, %arg25: memref<1x32xf32, #tpu.memory_space<vmem>>, %arg26: memref<32x64xf32, #tpu.memory_space<vmem>>, %arg27: memref<1x64xf32, #tpu.memory_space<vmem>>, %arg28: memref<64x32xf32, #tpu.memory_space<vmem>>, %arg29: memref<1x32xf32, #tpu.memory_space<vmem>>, %arg30: memref<1x32xf32, #tpu.memory_space<vmem>>, %arg31: memref<1x32xf32, #tpu.memory_space<vmem>>, %arg32: memref<32x32xf32, #tpu.memory_space<vmem>>, %arg33: memref<1x32xf32, #tpu.memory_space<vmem>>, %arg34: memref<32x32xf32, #tpu.memory_space<vmem>>, %arg35: memref<1x32xf32, #tpu.memory_space<vmem>>, %arg36: memref<32x32xf32, #tpu.memory_space<vmem>>, %arg37: memref<1x32xf32, #tpu.memory_space<vmem>>, %arg38: memref<32x32xf32, #tpu.memory_space<vmem>>, %arg39: memref<1x32xf32, #tpu.memory_space<vmem>>, %arg40: memref<1x32xf32, #tpu.memory_space<vmem>>, %arg41: memref<1x32xf32, #tpu.memory_space<vmem>>, %arg42: memref<32x64xf32, #tpu.memory_space<vmem>>, %arg43: memref<1x64xf32, #tpu.memory_space<vmem>>, %arg44: memref<64x32xf32, #tpu.memory_space<vmem>>, %arg45: memref<1x32xf32, #tpu.memory_space<vmem>>, %arg46: memref<1x32xf32, #tpu.memory_space<vmem>>, %arg47: memref<1x32xf32, #tpu.memory_space<vmem>>, %arg48: memref<32x64xf32, #tpu.memory_space<vmem>>, %arg49: memref<1x64xf32, #tpu.memory_space<vmem>>, %arg50: memref<16x64xf32, #tpu.memory_space<vmem>>) attributes {dimension_semantics = [], scalar_prefetch = 0 : i64, scratch_operands = 0 : i64, tpu.core_type = #tpu.core_type<tc>} {
    %c0 = arith.constant 0 : index
    %c0_0 = arith.constant 0 : index
    %0 = vector.load %arg0[%c0, %c0_0] : memref<2x32xf32, #tpu.memory_space<vmem>>, vector<2x32xf32>
    %c0_1 = arith.constant 0 : index
    %c0_2 = arith.constant 0 : index
    %1 = vector.load %arg1[%c0_1, %c0_2] : memref<32x48xf32, #tpu.memory_space<vmem>>, vector<32x48xf32>
    %c0_3 = arith.constant 0 : index
    %c0_4 = arith.constant 0 : index
    %2 = vector.load %arg2[%c0_3, %c0_4] : memref<1x48xf32, #tpu.memory_space<vmem>>, vector<1x48xf32>
    %c0_5 = arith.constant 0 : index
    %c0_6 = arith.constant 0 : index
    %3 = vector.load %arg3[%c0_5, %c0_6] : memref<8x32xf32, #tpu.memory_space<vmem>>, vector<8x32xf32>
    %c0_7 = arith.constant 0 : index
    %c0_8 = arith.constant 0 : index
    %4 = vector.load %arg4[%c0_7, %c0_8] : memref<1x32xf32, #tpu.memory_space<vmem>>, vector<1x32xf32>
    %c0_9 = arith.constant 0 : index
    %c0_10 = arith.constant 0 : index
    %5 = vector.load %arg5[%c0_9, %c0_10] : memref<1x32xf32, #tpu.memory_space<vmem>>, vector<1x32xf32>
    %cst = arith.constant dense<0.000000e+00> : vector<2x48xf32>
    %6 = tpu.matmul %0, %1, %cst {dimension_numbers = #tpu.dot_dimension_numbers<[1], [0], [0], [1], [0, 0, 1, 1], [], []>} : vector<2x32xf32>, vector<32x48xf32>, vector<2x48xf32> -> vector<2x48xf32>
    %7 = vector.broadcast %2 : vector<1x48xf32> to vector<2x48xf32>
    %8 = arith.addf %6, %7 : vector<2x48xf32>
    %cst_11 = arith.constant dense<0.000000e+00> : vector<8xf32>
    %9 = vector.multi_reduction <add>, %3, %cst_11 [1] : vector<8x32xf32> to vector<8xf32>
    %10 = vector.shape_cast %9 : vector<8xf32> to vector<8x1xf32>
    %cst_12 = arith.constant 3.200000e+01 : f32
    %11 = vector.broadcast %cst_12 : f32 to vector<8x1xf32>
    %12 = arith.divf %10, %11 : vector<8x1xf32>
    %13 = vector.broadcast %12 : vector<8x1xf32> to vector<8x32xf32>
    %14 = arith.subf %3, %13 : vector<8x32xf32>
    %15 = arith.mulf %14, %14 : vector<8x32xf32>
    %cst_13 = arith.constant dense<0.000000e+00> : vector<8xf32>
    %16 = vector.multi_reduction <add>, %15, %cst_13 [1] : vector<8x32xf32> to vector<8xf32>
    %17 = vector.shape_cast %16 : vector<8xf32> to vector<8x1xf32>
    %cst_14 = arith.constant 3.200000e+01 : f32
    %18 = vector.broadcast %cst_14 : f32 to vector<8x1xf32>
    %19 = arith.divf %17, %18 : vector<8x1xf32>
    %20 = vector.broadcast %12 : vector<8x1xf32> to vector<8x32xf32>
    %21 = arith.subf %3, %20 : vector<8x32xf32>
    %cst_15 = arith.constant 9.99999996E-13 : f32
    %22 = vector.broadcast %cst_15 : f32 to vector<8x1xf32>
    %23 = arith.addf %19, %22 : vector<8x1xf32>
    %24 = math.rsqrt %23 : vector<8x1xf32>
    %25 = vector.broadcast %24 : vector<8x1xf32> to vector<8x32xf32>
    %26 = arith.mulf %21, %25 : vector<8x32xf32>
    %27 = vector.broadcast %4 : vector<1x32xf32> to vector<8x32xf32>
    %28 = arith.mulf %26, %27 : vector<8x32xf32>
    %29 = vector.broadcast %5 : vector<1x32xf32> to vector<8x32xf32>
    %30 = arith.addf %28, %29 : vector<8x32xf32>
    %31 = tpu.concatenate %30, %30 in 0 : vector<8x32xf32>, vector<8x32xf32> -> vector<16x32xf32>
    %c0_16 = arith.constant 0 : index
    %c0_17 = arith.constant 0 : index
    %32 = vector.load %arg6[%c0_16, %c0_17] : memref<32x32xf32, #tpu.memory_space<vmem>>, vector<32x32xf32>
    %c0_18 = arith.constant 0 : index
    %c0_19 = arith.constant 0 : index
    %33 = vector.load %arg7[%c0_18, %c0_19] : memref<1x32xf32, #tpu.memory_space<vmem>>, vector<1x32xf32>
    %c0_20 = arith.constant 0 : index
    %c0_21 = arith.constant 0 : index
    %34 = vector.load %arg8[%c0_20, %c0_21] : memref<32x32xf32, #tpu.memory_space<vmem>>, vector<32x32xf32>
    %c0_22 = arith.constant 0 : index
    %c0_23 = arith.constant 0 : index
    %35 = vector.load %arg9[%c0_22, %c0_23] : memref<1x32xf32, #tpu.memory_space<vmem>>, vector<1x32xf32>
    %c0_24 = arith.constant 0 : index
    %c0_25 = arith.constant 0 : index
    %36 = vector.load %arg10[%c0_24, %c0_25] : memref<32x32xf32, #tpu.memory_space<vmem>>, vector<32x32xf32>
    %c0_26 = arith.constant 0 : index
    %c0_27 = arith.constant 0 : index
    %37 = vector.load %arg11[%c0_26, %c0_27] : memref<1x32xf32, #tpu.memory_space<vmem>>, vector<1x32xf32>
    %c0_28 = arith.constant 0 : index
    %c0_29 = arith.constant 0 : index
    %38 = vector.load %arg12[%c0_28, %c0_29] : memref<32x32xf32, #tpu.memory_space<vmem>>, vector<32x32xf32>
    %c0_30 = arith.constant 0 : index
    %c0_31 = arith.constant 0 : index
    %39 = vector.load %arg13[%c0_30, %c0_31] : memref<1x32xf32, #tpu.memory_space<vmem>>, vector<1x32xf32>
    %c0_32 = arith.constant 0 : index
    %c0_33 = arith.constant 0 : index
    %40 = vector.load %arg14[%c0_32, %c0_33] : memref<1x32xf32, #tpu.memory_space<vmem>>, vector<1x32xf32>
    %c0_34 = arith.constant 0 : index
    %c0_35 = arith.constant 0 : index
    %41 = vector.load %arg15[%c0_34, %c0_35] : memref<1x32xf32, #tpu.memory_space<vmem>>, vector<1x32xf32>
    %cst_36 = arith.constant dense<0.000000e+00> : vector<16x32xf32>
    %42 = tpu.matmul %31, %32, %cst_36 {dimension_numbers = #tpu.dot_dimension_numbers<[1], [0], [0], [1], [0, 0, 1, 1], [], []>} : vector<16x32xf32>, vector<32x32xf32>, vector<16x32xf32> -> vector<16x32xf32>
    %43 = vector.broadcast %33 : vector<1x32xf32> to vector<16x32xf32>
    %44 = arith.addf %42, %43 : vector<16x32xf32>
    %cst_37 = arith.constant dense<0.000000e+00> : vector<16x32xf32>
    %45 = tpu.matmul %31, %34, %cst_37 {dimension_numbers = #tpu.dot_dimension_numbers<[1], [0], [0], [1], [0, 0, 1, 1], [], []>} : vector<16x32xf32>, vector<32x32xf32>, vector<16x32xf32> -> vector<16x32xf32>
    %46 = vector.broadcast %35 : vector<1x32xf32> to vector<16x32xf32>
    %47 = arith.addf %45, %46 : vector<16x32xf32>
    %cst_38 = arith.constant dense<0.000000e+00> : vector<16x32xf32>
    %48 = tpu.matmul %31, %36, %cst_38 {dimension_numbers = #tpu.dot_dimension_numbers<[1], [0], [0], [1], [0, 0, 1, 1], [], []>} : vector<16x32xf32>, vector<32x32xf32>, vector<16x32xf32> -> vector<16x32xf32>
    %49 = vector.broadcast %37 : vector<1x32xf32> to vector<16x32xf32>
    %50 = arith.addf %48, %49 : vector<16x32xf32>
    %51 = vector.extract_strided_slice %44 {offsets = [0, 0], sizes = [8, 32], strides = [1, 1]} : vector<16x32xf32> to vector<8x32xf32>
    %52 = vector.extract_strided_slice %47 {offsets = [0, 0], sizes = [8, 32], strides = [1, 1]} : vector<16x32xf32> to vector<8x32xf32>
    %53 = vector.extract_strided_slice %50 {offsets = [0, 0], sizes = [8, 32], strides = [1, 1]} : vector<16x32xf32> to vector<8x32xf32>
    %cst_39 = arith.constant 0.000000e+00 : f32
    %54 = vector.broadcast %cst_39 : f32 to vector<8x32xf32>
    %55 = vector.extract_strided_slice %51 {offsets = [0, 0], sizes = [8, 8], strides = [1, 1]} : vector<8x32xf32> to vector<8x8xf32>
    %56 = vector.extract_strided_slice %52 {offsets = [0, 0], sizes = [8, 8], strides = [1, 1]} : vector<8x32xf32> to vector<8x8xf32>
    %cst_40 = arith.constant dense<0.000000e+00> : vector<8x8xf32>
    %57 = tpu.matmul %55, %56, %cst_40 {dimension_numbers = #tpu.dot_dimension_numbers<[1], [1], [0], [0], [0, 0, 1, 0], [], []>} : vector<8x8xf32>, vector<8x8xf32>, vector<8x8xf32> -> vector<8x8xf32>
    %cst_41 = arith.constant 0.353553385 : f32
    %58 = vector.broadcast %cst_41 : f32 to vector<8x8xf32>
    %59 = arith.mulf %57, %58 : vector<8x8xf32>
    %cst_42 = arith.constant dense<0xFF800000> : vector<8xf32>
    %60 = vector.multi_reduction <maximumf>, %59, %cst_42 [1] : vector<8x8xf32> to vector<8xf32>
    %61 = vector.shape_cast %60 : vector<8xf32> to vector<8x1xf32>
    %62 = vector.broadcast %61 : vector<8x1xf32> to vector<8x8xf32>
    %63 = arith.subf %59, %62 : vector<8x8xf32>
    %64 = math.exp %63 : vector<8x8xf32>
    %cst_43 = arith.constant dense<0.000000e+00> : vector<8xf32>
    %65 = vector.multi_reduction <add>, %64, %cst_43 [1] : vector<8x8xf32> to vector<8xf32>
    %66 = vector.shape_cast %65 : vector<8xf32> to vector<8x1xf32>
    %67 = vector.broadcast %66 : vector<8x1xf32> to vector<8x8xf32>
    %68 = arith.divf %64, %67 : vector<8x8xf32>
    %69 = vector.extract_strided_slice %53 {offsets = [0, 0], sizes = [8, 8], strides = [1, 1]} : vector<8x32xf32> to vector<8x8xf32>
    %cst_44 = arith.constant dense<0.000000e+00> : vector<8x8xf32>
    %70 = tpu.matmul %68, %69, %cst_44 {dimension_numbers = #tpu.dot_dimension_numbers<[1], [0], [0], [1], [0, 0, 1, 1], [], []>} : vector<8x8xf32>, vector<8x8xf32>, vector<8x8xf32> -> vector<8x8xf32>
    %71 = vector.extract_strided_slice %38 {offsets = [0, 0], sizes = [8, 32], strides = [1, 1]} : vector<32x32xf32> to vector<8x32xf32>
    %cst_45 = arith.constant dense<0.000000e+00> : vector<8x32xf32>
    %72 = tpu.matmul %70, %71, %cst_45 {dimension_numbers = #tpu.dot_dimension_numbers<[1], [0], [0], [1], [0, 0, 1, 1], [], []>} : vector<8x8xf32>, vector<8x32xf32>, vector<8x32xf32> -> vector<8x32xf32>
    %73 = arith.addf %54, %72 : vector<8x32xf32>
    %74 = vector.extract_strided_slice %51 {offsets = [0, 8], sizes = [8, 8], strides = [1, 1]} : vector<8x32xf32> to vector<8x8xf32>
    %75 = vector.extract_strided_slice %52 {offsets = [0, 8], sizes = [8, 8], strides = [1, 1]} : vector<8x32xf32> to vector<8x8xf32>
    %cst_46 = arith.constant dense<0.000000e+00> : vector<8x8xf32>
    %76 = tpu.matmul %74, %75, %cst_46 {dimension_numbers = #tpu.dot_dimension_numbers<[1], [1], [0], [0], [0, 0, 1, 0], [], []>} : vector<8x8xf32>, vector<8x8xf32>, vector<8x8xf32> -> vector<8x8xf32>
    %cst_47 = arith.constant 0.353553385 : f32
    %77 = vector.broadcast %cst_47 : f32 to vector<8x8xf32>
    %78 = arith.mulf %76, %77 : vector<8x8xf32>
    %cst_48 = arith.constant dense<0xFF800000> : vector<8xf32>
    %79 = vector.multi_reduction <maximumf>, %78, %cst_48 [1] : vector<8x8xf32> to vector<8xf32>
    %80 = vector.shape_cast %79 : vector<8xf32> to vector<8x1xf32>
    %81 = vector.broadcast %80 : vector<8x1xf32> to vector<8x8xf32>
    %82 = arith.subf %78, %81 : vector<8x8xf32>
    %83 = math.exp %82 : vector<8x8xf32>
    %cst_49 = arith.constant dense<0.000000e+00> : vector<8xf32>
    %84 = vector.multi_reduction <add>, %83, %cst_49 [1] : vector<8x8xf32> to vector<8xf32>
    %85 = vector.shape_cast %84 : vector<8xf32> to vector<8x1xf32>
    %86 = vector.broadcast %85 : vector<8x1xf32> to vector<8x8xf32>
    %87 = arith.divf %83, %86 : vector<8x8xf32>
    %88 = vector.extract_strided_slice %53 {offsets = [0, 8], sizes = [8, 8], strides = [1, 1]} : vector<8x32xf32> to vector<8x8xf32>
    %cst_50 = arith.constant dense<0.000000e+00> : vector<8x8xf32>
    %89 = tpu.matmul %87, %88, %cst_50 {dimension_numbers = #tpu.dot_dimension_numbers<[1], [0], [0], [1], [0, 0, 1, 1], [], []>} : vector<8x8xf32>, vector<8x8xf32>, vector<8x8xf32> -> vector<8x8xf32>
    %90 = vector.extract_strided_slice %38 {offsets = [8, 0], sizes = [8, 32], strides = [1, 1]} : vector<32x32xf32> to vector<8x32xf32>
    %cst_51 = arith.constant dense<0.000000e+00> : vector<8x32xf32>
    %91 = tpu.matmul %89, %90, %cst_51 {dimension_numbers = #tpu.dot_dimension_numbers<[1], [0], [0], [1], [0, 0, 1, 1], [], []>} : vector<8x8xf32>, vector<8x32xf32>, vector<8x32xf32> -> vector<8x32xf32>
    %92 = arith.addf %73, %91 : vector<8x32xf32>
    %93 = vector.extract_strided_slice %51 {offsets = [0, 16], sizes = [8, 8], strides = [1, 1]} : vector<8x32xf32> to vector<8x8xf32>
    %94 = vector.extract_strided_slice %52 {offsets = [0, 16], sizes = [8, 8], strides = [1, 1]} : vector<8x32xf32> to vector<8x8xf32>
    %cst_52 = arith.constant dense<0.000000e+00> : vector<8x8xf32>
    %95 = tpu.matmul %93, %94, %cst_52 {dimension_numbers = #tpu.dot_dimension_numbers<[1], [1], [0], [0], [0, 0, 1, 0], [], []>} : vector<8x8xf32>, vector<8x8xf32>, vector<8x8xf32> -> vector<8x8xf32>
    %cst_53 = arith.constant 0.353553385 : f32
    %96 = vector.broadcast %cst_53 : f32 to vector<8x8xf32>
    %97 = arith.mulf %95, %96 : vector<8x8xf32>
    %cst_54 = arith.constant dense<0xFF800000> : vector<8xf32>
    %98 = vector.multi_reduction <maximumf>, %97, %cst_54 [1] : vector<8x8xf32> to vector<8xf32>
    %99 = vector.shape_cast %98 : vector<8xf32> to vector<8x1xf32>
    %100 = vector.broadcast %99 : vector<8x1xf32> to vector<8x8xf32>
    %101 = arith.subf %97, %100 : vector<8x8xf32>
    %102 = math.exp %101 : vector<8x8xf32>
    %cst_55 = arith.constant dense<0.000000e+00> : vector<8xf32>
    %103 = vector.multi_reduction <add>, %102, %cst_55 [1] : vector<8x8xf32> to vector<8xf32>
    %104 = vector.shape_cast %103 : vector<8xf32> to vector<8x1xf32>
    %105 = vector.broadcast %104 : vector<8x1xf32> to vector<8x8xf32>
    %106 = arith.divf %102, %105 : vector<8x8xf32>
    %107 = vector.extract_strided_slice %53 {offsets = [0, 16], sizes = [8, 8], strides = [1, 1]} : vector<8x32xf32> to vector<8x8xf32>
    %cst_56 = arith.constant dense<0.000000e+00> : vector<8x8xf32>
    %108 = tpu.matmul %106, %107, %cst_56 {dimension_numbers = #tpu.dot_dimension_numbers<[1], [0], [0], [1], [0, 0, 1, 1], [], []>} : vector<8x8xf32>, vector<8x8xf32>, vector<8x8xf32> -> vector<8x8xf32>
    %109 = vector.extract_strided_slice %38 {offsets = [16, 0], sizes = [8, 32], strides = [1, 1]} : vector<32x32xf32> to vector<8x32xf32>
    %cst_57 = arith.constant dense<0.000000e+00> : vector<8x32xf32>
    %110 = tpu.matmul %108, %109, %cst_57 {dimension_numbers = #tpu.dot_dimension_numbers<[1], [0], [0], [1], [0, 0, 1, 1], [], []>} : vector<8x8xf32>, vector<8x32xf32>, vector<8x32xf32> -> vector<8x32xf32>
    %111 = arith.addf %92, %110 : vector<8x32xf32>
    %112 = vector.extract_strided_slice %51 {offsets = [0, 24], sizes = [8, 8], strides = [1, 1]} : vector<8x32xf32> to vector<8x8xf32>
    %113 = vector.extract_strided_slice %52 {offsets = [0, 24], sizes = [8, 8], strides = [1, 1]} : vector<8x32xf32> to vector<8x8xf32>
    %cst_58 = arith.constant dense<0.000000e+00> : vector<8x8xf32>
    %114 = tpu.matmul %112, %113, %cst_58 {dimension_numbers = #tpu.dot_dimension_numbers<[1], [1], [0], [0], [0, 0, 1, 0], [], []>} : vector<8x8xf32>, vector<8x8xf32>, vector<8x8xf32> -> vector<8x8xf32>
    %cst_59 = arith.constant 0.353553385 : f32
    %115 = vector.broadcast %cst_59 : f32 to vector<8x8xf32>
    %116 = arith.mulf %114, %115 : vector<8x8xf32>
    %cst_60 = arith.constant dense<0xFF800000> : vector<8xf32>
    %117 = vector.multi_reduction <maximumf>, %116, %cst_60 [1] : vector<8x8xf32> to vector<8xf32>
    %118 = vector.shape_cast %117 : vector<8xf32> to vector<8x1xf32>
    %119 = vector.broadcast %118 : vector<8x1xf32> to vector<8x8xf32>
    %120 = arith.subf %116, %119 : vector<8x8xf32>
    %121 = math.exp %120 : vector<8x8xf32>
    %cst_61 = arith.constant dense<0.000000e+00> : vector<8xf32>
    %122 = vector.multi_reduction <add>, %121, %cst_61 [1] : vector<8x8xf32> to vector<8xf32>
    %123 = vector.shape_cast %122 : vector<8xf32> to vector<8x1xf32>
    %124 = vector.broadcast %123 : vector<8x1xf32> to vector<8x8xf32>
    %125 = arith.divf %121, %124 : vector<8x8xf32>
    %126 = vector.extract_strided_slice %53 {offsets = [0, 24], sizes = [8, 8], strides = [1, 1]} : vector<8x32xf32> to vector<8x8xf32>
    %cst_62 = arith.constant dense<0.000000e+00> : vector<8x8xf32>
    %127 = tpu.matmul %125, %126, %cst_62 {dimension_numbers = #tpu.dot_dimension_numbers<[1], [0], [0], [1], [0, 0, 1, 1], [], []>} : vector<8x8xf32>, vector<8x8xf32>, vector<8x8xf32> -> vector<8x8xf32>
    %128 = vector.extract_strided_slice %38 {offsets = [24, 0], sizes = [8, 32], strides = [1, 1]} : vector<32x32xf32> to vector<8x32xf32>
    %cst_63 = arith.constant dense<0.000000e+00> : vector<8x32xf32>
    %129 = tpu.matmul %127, %128, %cst_63 {dimension_numbers = #tpu.dot_dimension_numbers<[1], [0], [0], [1], [0, 0, 1, 1], [], []>} : vector<8x8xf32>, vector<8x32xf32>, vector<8x32xf32> -> vector<8x32xf32>
    %130 = arith.addf %111, %129 : vector<8x32xf32>
    %131 = vector.extract_strided_slice %44 {offsets = [8, 0], sizes = [8, 32], strides = [1, 1]} : vector<16x32xf32> to vector<8x32xf32>
    %132 = vector.extract_strided_slice %47 {offsets = [8, 0], sizes = [8, 32], strides = [1, 1]} : vector<16x32xf32> to vector<8x32xf32>
    %133 = vector.extract_strided_slice %50 {offsets = [8, 0], sizes = [8, 32], strides = [1, 1]} : vector<16x32xf32> to vector<8x32xf32>
    %cst_64 = arith.constant 0.000000e+00 : f32
    %134 = vector.broadcast %cst_64 : f32 to vector<8x32xf32>
    %135 = vector.extract_strided_slice %131 {offsets = [0, 0], sizes = [8, 8], strides = [1, 1]} : vector<8x32xf32> to vector<8x8xf32>
    %136 = vector.extract_strided_slice %132 {offsets = [0, 0], sizes = [8, 8], strides = [1, 1]} : vector<8x32xf32> to vector<8x8xf32>
    %cst_65 = arith.constant dense<0.000000e+00> : vector<8x8xf32>
    %137 = tpu.matmul %135, %136, %cst_65 {dimension_numbers = #tpu.dot_dimension_numbers<[1], [1], [0], [0], [0, 0, 1, 0], [], []>} : vector<8x8xf32>, vector<8x8xf32>, vector<8x8xf32> -> vector<8x8xf32>
    %cst_66 = arith.constant 0.353553385 : f32
    %138 = vector.broadcast %cst_66 : f32 to vector<8x8xf32>
    %139 = arith.mulf %137, %138 : vector<8x8xf32>
    %cst_67 = arith.constant dense<0xFF800000> : vector<8xf32>
    %140 = vector.multi_reduction <maximumf>, %139, %cst_67 [1] : vector<8x8xf32> to vector<8xf32>
    %141 = vector.shape_cast %140 : vector<8xf32> to vector<8x1xf32>
    %142 = vector.broadcast %141 : vector<8x1xf32> to vector<8x8xf32>
    %143 = arith.subf %139, %142 : vector<8x8xf32>
    %144 = math.exp %143 : vector<8x8xf32>
    %cst_68 = arith.constant dense<0.000000e+00> : vector<8xf32>
    %145 = vector.multi_reduction <add>, %144, %cst_68 [1] : vector<8x8xf32> to vector<8xf32>
    %146 = vector.shape_cast %145 : vector<8xf32> to vector<8x1xf32>
    %147 = vector.broadcast %146 : vector<8x1xf32> to vector<8x8xf32>
    %148 = arith.divf %144, %147 : vector<8x8xf32>
    %149 = vector.extract_strided_slice %133 {offsets = [0, 0], sizes = [8, 8], strides = [1, 1]} : vector<8x32xf32> to vector<8x8xf32>
    %cst_69 = arith.constant dense<0.000000e+00> : vector<8x8xf32>
    %150 = tpu.matmul %148, %149, %cst_69 {dimension_numbers = #tpu.dot_dimension_numbers<[1], [0], [0], [1], [0, 0, 1, 1], [], []>} : vector<8x8xf32>, vector<8x8xf32>, vector<8x8xf32> -> vector<8x8xf32>
    %151 = vector.extract_strided_slice %38 {offsets = [0, 0], sizes = [8, 32], strides = [1, 1]} : vector<32x32xf32> to vector<8x32xf32>
    %cst_70 = arith.constant dense<0.000000e+00> : vector<8x32xf32>
    %152 = tpu.matmul %150, %151, %cst_70 {dimension_numbers = #tpu.dot_dimension_numbers<[1], [0], [0], [1], [0, 0, 1, 1], [], []>} : vector<8x8xf32>, vector<8x32xf32>, vector<8x32xf32> -> vector<8x32xf32>
    %153 = arith.addf %134, %152 : vector<8x32xf32>
    %154 = vector.extract_strided_slice %131 {offsets = [0, 8], sizes = [8, 8], strides = [1, 1]} : vector<8x32xf32> to vector<8x8xf32>
    %155 = vector.extract_strided_slice %132 {offsets = [0, 8], sizes = [8, 8], strides = [1, 1]} : vector<8x32xf32> to vector<8x8xf32>
    %cst_71 = arith.constant dense<0.000000e+00> : vector<8x8xf32>
    %156 = tpu.matmul %154, %155, %cst_71 {dimension_numbers = #tpu.dot_dimension_numbers<[1], [1], [0], [0], [0, 0, 1, 0], [], []>} : vector<8x8xf32>, vector<8x8xf32>, vector<8x8xf32> -> vector<8x8xf32>
    %cst_72 = arith.constant 0.353553385 : f32
    %157 = vector.broadcast %cst_72 : f32 to vector<8x8xf32>
    %158 = arith.mulf %156, %157 : vector<8x8xf32>
    %cst_73 = arith.constant dense<0xFF800000> : vector<8xf32>
    %159 = vector.multi_reduction <maximumf>, %158, %cst_73 [1] : vector<8x8xf32> to vector<8xf32>
    %160 = vector.shape_cast %159 : vector<8xf32> to vector<8x1xf32>
    %161 = vector.broadcast %160 : vector<8x1xf32> to vector<8x8xf32>
    %162 = arith.subf %158, %161 : vector<8x8xf32>
    %163 = math.exp %162 : vector<8x8xf32>
    %cst_74 = arith.constant dense<0.000000e+00> : vector<8xf32>
    %164 = vector.multi_reduction <add>, %163, %cst_74 [1] : vector<8x8xf32> to vector<8xf32>
    %165 = vector.shape_cast %164 : vector<8xf32> to vector<8x1xf32>
    %166 = vector.broadcast %165 : vector<8x1xf32> to vector<8x8xf32>
    %167 = arith.divf %163, %166 : vector<8x8xf32>
    %168 = vector.extract_strided_slice %133 {offsets = [0, 8], sizes = [8, 8], strides = [1, 1]} : vector<8x32xf32> to vector<8x8xf32>
    %cst_75 = arith.constant dense<0.000000e+00> : vector<8x8xf32>
    %169 = tpu.matmul %167, %168, %cst_75 {dimension_numbers = #tpu.dot_dimension_numbers<[1], [0], [0], [1], [0, 0, 1, 1], [], []>} : vector<8x8xf32>, vector<8x8xf32>, vector<8x8xf32> -> vector<8x8xf32>
    %170 = vector.extract_strided_slice %38 {offsets = [8, 0], sizes = [8, 32], strides = [1, 1]} : vector<32x32xf32> to vector<8x32xf32>
    %cst_76 = arith.constant dense<0.000000e+00> : vector<8x32xf32>
    %171 = tpu.matmul %169, %170, %cst_76 {dimension_numbers = #tpu.dot_dimension_numbers<[1], [0], [0], [1], [0, 0, 1, 1], [], []>} : vector<8x8xf32>, vector<8x32xf32>, vector<8x32xf32> -> vector<8x32xf32>
    %172 = arith.addf %153, %171 : vector<8x32xf32>
    %173 = vector.extract_strided_slice %131 {offsets = [0, 16], sizes = [8, 8], strides = [1, 1]} : vector<8x32xf32> to vector<8x8xf32>
    %174 = vector.extract_strided_slice %132 {offsets = [0, 16], sizes = [8, 8], strides = [1, 1]} : vector<8x32xf32> to vector<8x8xf32>
    %cst_77 = arith.constant dense<0.000000e+00> : vector<8x8xf32>
    %175 = tpu.matmul %173, %174, %cst_77 {dimension_numbers = #tpu.dot_dimension_numbers<[1], [1], [0], [0], [0, 0, 1, 0], [], []>} : vector<8x8xf32>, vector<8x8xf32>, vector<8x8xf32> -> vector<8x8xf32>
    %cst_78 = arith.constant 0.353553385 : f32
    %176 = vector.broadcast %cst_78 : f32 to vector<8x8xf32>
    %177 = arith.mulf %175, %176 : vector<8x8xf32>
    %cst_79 = arith.constant dense<0xFF800000> : vector<8xf32>
    %178 = vector.multi_reduction <maximumf>, %177, %cst_79 [1] : vector<8x8xf32> to vector<8xf32>
    %179 = vector.shape_cast %178 : vector<8xf32> to vector<8x1xf32>
    %180 = vector.broadcast %179 : vector<8x1xf32> to vector<8x8xf32>
    %181 = arith.subf %177, %180 : vector<8x8xf32>
    %182 = math.exp %181 : vector<8x8xf32>
    %cst_80 = arith.constant dense<0.000000e+00> : vector<8xf32>
    %183 = vector.multi_reduction <add>, %182, %cst_80 [1] : vector<8x8xf32> to vector<8xf32>
    %184 = vector.shape_cast %183 : vector<8xf32> to vector<8x1xf32>
    %185 = vector.broadcast %184 : vector<8x1xf32> to vector<8x8xf32>
    %186 = arith.divf %182, %185 : vector<8x8xf32>
    %187 = vector.extract_strided_slice %133 {offsets = [0, 16], sizes = [8, 8], strides = [1, 1]} : vector<8x32xf32> to vector<8x8xf32>
    %cst_81 = arith.constant dense<0.000000e+00> : vector<8x8xf32>
    %188 = tpu.matmul %186, %187, %cst_81 {dimension_numbers = #tpu.dot_dimension_numbers<[1], [0], [0], [1], [0, 0, 1, 1], [], []>} : vector<8x8xf32>, vector<8x8xf32>, vector<8x8xf32> -> vector<8x8xf32>
    %189 = vector.extract_strided_slice %38 {offsets = [16, 0], sizes = [8, 32], strides = [1, 1]} : vector<32x32xf32> to vector<8x32xf32>
    %cst_82 = arith.constant dense<0.000000e+00> : vector<8x32xf32>
    %190 = tpu.matmul %188, %189, %cst_82 {dimension_numbers = #tpu.dot_dimension_numbers<[1], [0], [0], [1], [0, 0, 1, 1], [], []>} : vector<8x8xf32>, vector<8x32xf32>, vector<8x32xf32> -> vector<8x32xf32>
    %191 = arith.addf %172, %190 : vector<8x32xf32>
    %192 = vector.extract_strided_slice %131 {offsets = [0, 24], sizes = [8, 8], strides = [1, 1]} : vector<8x32xf32> to vector<8x8xf32>
    %193 = vector.extract_strided_slice %132 {offsets = [0, 24], sizes = [8, 8], strides = [1, 1]} : vector<8x32xf32> to vector<8x8xf32>
    %cst_83 = arith.constant dense<0.000000e+00> : vector<8x8xf32>
    %194 = tpu.matmul %192, %193, %cst_83 {dimension_numbers = #tpu.dot_dimension_numbers<[1], [1], [0], [0], [0, 0, 1, 0], [], []>} : vector<8x8xf32>, vector<8x8xf32>, vector<8x8xf32> -> vector<8x8xf32>
    %cst_84 = arith.constant 0.353553385 : f32
    %195 = vector.broadcast %cst_84 : f32 to vector<8x8xf32>
    %196 = arith.mulf %194, %195 : vector<8x8xf32>
    %cst_85 = arith.constant dense<0xFF800000> : vector<8xf32>
    %197 = vector.multi_reduction <maximumf>, %196, %cst_85 [1] : vector<8x8xf32> to vector<8xf32>
    %198 = vector.shape_cast %197 : vector<8xf32> to vector<8x1xf32>
    %199 = vector.broadcast %198 : vector<8x1xf32> to vector<8x8xf32>
    %200 = arith.subf %196, %199 : vector<8x8xf32>
    %201 = math.exp %200 : vector<8x8xf32>
    %cst_86 = arith.constant dense<0.000000e+00> : vector<8xf32>
    %202 = vector.multi_reduction <add>, %201, %cst_86 [1] : vector<8x8xf32> to vector<8xf32>
    %203 = vector.shape_cast %202 : vector<8xf32> to vector<8x1xf32>
    %204 = vector.broadcast %203 : vector<8x1xf32> to vector<8x8xf32>
    %205 = arith.divf %201, %204 : vector<8x8xf32>
    %206 = vector.extract_strided_slice %133 {offsets = [0, 24], sizes = [8, 8], strides = [1, 1]} : vector<8x32xf32> to vector<8x8xf32>
    %cst_87 = arith.constant dense<0.000000e+00> : vector<8x8xf32>
    %207 = tpu.matmul %205, %206, %cst_87 {dimension_numbers = #tpu.dot_dimension_numbers<[1], [0], [0], [1], [0, 0, 1, 1], [], []>} : vector<8x8xf32>, vector<8x8xf32>, vector<8x8xf32> -> vector<8x8xf32>
    %208 = vector.extract_strided_slice %38 {offsets = [24, 0], sizes = [8, 32], strides = [1, 1]} : vector<32x32xf32> to vector<8x32xf32>
    %cst_88 = arith.constant dense<0.000000e+00> : vector<8x32xf32>
    %209 = tpu.matmul %207, %208, %cst_88 {dimension_numbers = #tpu.dot_dimension_numbers<[1], [0], [0], [1], [0, 0, 1, 1], [], []>} : vector<8x8xf32>, vector<8x32xf32>, vector<8x32xf32> -> vector<8x32xf32>
    %210 = arith.addf %191, %209 : vector<8x32xf32>
    %211 = tpu.concatenate %130, %210 in 0 : vector<8x32xf32>, vector<8x32xf32> -> vector<16x32xf32>
    %212 = vector.broadcast %39 : vector<1x32xf32> to vector<16x32xf32>
    %213 = arith.addf %211, %212 : vector<16x32xf32>
    %214 = arith.addf %213, %31 : vector<16x32xf32>
    %cst_89 = arith.constant dense<0.000000e+00> : vector<16xf32>
    %215 = vector.multi_reduction <add>, %214, %cst_89 [1] : vector<16x32xf32> to vector<16xf32>
    %216 = vector.shape_cast %215 : vector<16xf32> to vector<16x1xf32>
    %cst_90 = arith.constant 3.200000e+01 : f32
    %217 = vector.broadcast %cst_90 : f32 to vector<16x1xf32>
    %218 = arith.divf %216, %217 : vector<16x1xf32>
    %219 = vector.broadcast %218 : vector<16x1xf32> to vector<16x32xf32>
    %220 = arith.subf %214, %219 : vector<16x32xf32>
    %221 = arith.mulf %220, %220 : vector<16x32xf32>
    %cst_91 = arith.constant dense<0.000000e+00> : vector<16xf32>
    %222 = vector.multi_reduction <add>, %221, %cst_91 [1] : vector<16x32xf32> to vector<16xf32>
    %223 = vector.shape_cast %222 : vector<16xf32> to vector<16x1xf32>
    %cst_92 = arith.constant 3.200000e+01 : f32
    %224 = vector.broadcast %cst_92 : f32 to vector<16x1xf32>
    %225 = arith.divf %223, %224 : vector<16x1xf32>
    %226 = vector.broadcast %218 : vector<16x1xf32> to vector<16x32xf32>
    %227 = arith.subf %214, %226 : vector<16x32xf32>
    %cst_93 = arith.constant 9.99999996E-13 : f32
    %228 = vector.broadcast %cst_93 : f32 to vector<16x1xf32>
    %229 = arith.addf %225, %228 : vector<16x1xf32>
    %230 = math.rsqrt %229 : vector<16x1xf32>
    %231 = vector.broadcast %230 : vector<16x1xf32> to vector<16x32xf32>
    %232 = arith.mulf %227, %231 : vector<16x32xf32>
    %233 = vector.broadcast %40 : vector<1x32xf32> to vector<16x32xf32>
    %234 = arith.mulf %232, %233 : vector<16x32xf32>
    %235 = vector.broadcast %41 : vector<1x32xf32> to vector<16x32xf32>
    %236 = arith.addf %234, %235 : vector<16x32xf32>
    %c0_94 = arith.constant 0 : index
    %c0_95 = arith.constant 0 : index
    %237 = vector.load %arg16[%c0_94, %c0_95] : memref<32x32xf32, #tpu.memory_space<vmem>>, vector<32x32xf32>
    %c0_96 = arith.constant 0 : index
    %c0_97 = arith.constant 0 : index
    %238 = vector.load %arg17[%c0_96, %c0_97] : memref<1x32xf32, #tpu.memory_space<vmem>>, vector<1x32xf32>
    %c0_98 = arith.constant 0 : index
    %c0_99 = arith.constant 0 : index
    %239 = vector.load %arg18[%c0_98, %c0_99] : memref<48x32xf32, #tpu.memory_space<vmem>>, vector<48x32xf32>
    %c0_100 = arith.constant 0 : index
    %c0_101 = arith.constant 0 : index
    %240 = vector.load %arg19[%c0_100, %c0_101] : memref<1x32xf32, #tpu.memory_space<vmem>>, vector<1x32xf32>
    %c0_102 = arith.constant 0 : index
    %c0_103 = arith.constant 0 : index
    %241 = vector.load %arg20[%c0_102, %c0_103] : memref<48x32xf32, #tpu.memory_space<vmem>>, vector<48x32xf32>
    %c0_104 = arith.constant 0 : index
    %c0_105 = arith.constant 0 : index
    %242 = vector.load %arg21[%c0_104, %c0_105] : memref<1x32xf32, #tpu.memory_space<vmem>>, vector<1x32xf32>
    %c0_106 = arith.constant 0 : index
    %c0_107 = arith.constant 0 : index
    %243 = vector.load %arg22[%c0_106, %c0_107] : memref<32x32xf32, #tpu.memory_space<vmem>>, vector<32x32xf32>
    %c0_108 = arith.constant 0 : index
    %c0_109 = arith.constant 0 : index
    %244 = vector.load %arg23[%c0_108, %c0_109] : memref<1x32xf32, #tpu.memory_space<vmem>>, vector<1x32xf32>
    %c0_110 = arith.constant 0 : index
    %c0_111 = arith.constant 0 : index
    %245 = vector.load %arg24[%c0_110, %c0_111] : memref<1x32xf32, #tpu.memory_space<vmem>>, vector<1x32xf32>
    %c0_112 = arith.constant 0 : index
    %c0_113 = arith.constant 0 : index
    %246 = vector.load %arg25[%c0_112, %c0_113] : memref<1x32xf32, #tpu.memory_space<vmem>>, vector<1x32xf32>
    %cst_114 = arith.constant dense<0.000000e+00> : vector<16x32xf32>
    %247 = tpu.matmul %236, %237, %cst_114 {dimension_numbers = #tpu.dot_dimension_numbers<[1], [0], [0], [1], [0, 0, 1, 1], [], []>} : vector<16x32xf32>, vector<32x32xf32>, vector<16x32xf32> -> vector<16x32xf32>
    %248 = vector.broadcast %238 : vector<1x32xf32> to vector<16x32xf32>
    %249 = arith.addf %247, %248 : vector<16x32xf32>
    %cst_115 = arith.constant dense<0.000000e+00> : vector<2x32xf32>
    %250 = tpu.matmul %8, %239, %cst_115 {dimension_numbers = #tpu.dot_dimension_numbers<[1], [0], [0], [1], [0, 0, 1, 1], [], []>} : vector<2x48xf32>, vector<48x32xf32>, vector<2x32xf32> -> vector<2x32xf32>
    %251 = vector.broadcast %240 : vector<1x32xf32> to vector<2x32xf32>
    %252 = arith.addf %250, %251 : vector<2x32xf32>
    %cst_116 = arith.constant dense<0.000000e+00> : vector<2x32xf32>
    %253 = tpu.matmul %8, %241, %cst_116 {dimension_numbers = #tpu.dot_dimension_numbers<[1], [0], [0], [1], [0, 0, 1, 1], [], []>} : vector<2x48xf32>, vector<48x32xf32>, vector<2x32xf32> -> vector<2x32xf32>
    %254 = vector.broadcast %242 : vector<1x32xf32> to vector<2x32xf32>
    %255 = arith.addf %253, %254 : vector<2x32xf32>
    %256 = vector.extract_strided_slice %249 {offsets = [0, 0], sizes = [8, 32], strides = [1, 1]} : vector<16x32xf32> to vector<8x32xf32>
    %257 = vector.extract_strided_slice %252 {offsets = [0, 0], sizes = [1, 32], strides = [1, 1]} : vector<2x32xf32> to vector<1x32xf32>
    %258 = vector.extract_strided_slice %255 {offsets = [0, 0], sizes = [1, 32], strides = [1, 1]} : vector<2x32xf32> to vector<1x32xf32>
    %cst_117 = arith.constant 0.000000e+00 : f32
    %259 = vector.broadcast %cst_117 : f32 to vector<8x32xf32>
    %260 = vector.extract_strided_slice %256 {offsets = [0, 0], sizes = [8, 8], strides = [1, 1]} : vector<8x32xf32> to vector<8x8xf32>
    %261 = vector.extract_strided_slice %257 {offsets = [0, 0], sizes = [1, 8], strides = [1, 1]} : vector<1x32xf32> to vector<1x8xf32>
    %cst_118 = arith.constant dense<0.000000e+00> : vector<8x1xf32>
    %262 = tpu.matmul %260, %261, %cst_118 {dimension_numbers = #tpu.dot_dimension_numbers<[1], [1], [0], [0], [0, 0, 1, 0], [], []>} : vector<8x8xf32>, vector<1x8xf32>, vector<8x1xf32> -> vector<8x1xf32>
    %cst_119 = arith.constant 0.353553385 : f32
    %263 = vector.broadcast %cst_119 : f32 to vector<8x1xf32>
    %264 = arith.mulf %262, %263 : vector<8x1xf32>
    %cst_120 = arith.constant dense<0xFF800000> : vector<8xf32>
    %265 = vector.multi_reduction <maximumf>, %264, %cst_120 [1] : vector<8x1xf32> to vector<8xf32>
    %266 = vector.shape_cast %265 : vector<8xf32> to vector<8x1xf32>
    %267 = arith.subf %264, %266 : vector<8x1xf32>
    %268 = math.exp %267 : vector<8x1xf32>
    %cst_121 = arith.constant dense<0.000000e+00> : vector<8xf32>
    %269 = vector.multi_reduction <add>, %268, %cst_121 [1] : vector<8x1xf32> to vector<8xf32>
    %270 = vector.shape_cast %269 : vector<8xf32> to vector<8x1xf32>
    %271 = arith.divf %268, %270 : vector<8x1xf32>
    %272 = vector.extract_strided_slice %258 {offsets = [0, 0], sizes = [1, 8], strides = [1, 1]} : vector<1x32xf32> to vector<1x8xf32>
    %cst_122 = arith.constant dense<0.000000e+00> : vector<8x8xf32>
    %273 = tpu.matmul %271, %272, %cst_122 {dimension_numbers = #tpu.dot_dimension_numbers<[1], [0], [0], [1], [0, 0, 1, 1], [], []>} : vector<8x1xf32>, vector<1x8xf32>, vector<8x8xf32> -> vector<8x8xf32>
    %274 = vector.extract_strided_slice %243 {offsets = [0, 0], sizes = [8, 32], strides = [1, 1]} : vector<32x32xf32> to vector<8x32xf32>
    %cst_123 = arith.constant dense<0.000000e+00> : vector<8x32xf32>
    %275 = tpu.matmul %273, %274, %cst_123 {dimension_numbers = #tpu.dot_dimension_numbers<[1], [0], [0], [1], [0, 0, 1, 1], [], []>} : vector<8x8xf32>, vector<8x32xf32>, vector<8x32xf32> -> vector<8x32xf32>
    %276 = arith.addf %259, %275 : vector<8x32xf32>
    %277 = vector.extract_strided_slice %256 {offsets = [0, 8], sizes = [8, 8], strides = [1, 1]} : vector<8x32xf32> to vector<8x8xf32>
    %278 = vector.extract_strided_slice %257 {offsets = [0, 8], sizes = [1, 8], strides = [1, 1]} : vector<1x32xf32> to vector<1x8xf32>
    %cst_124 = arith.constant dense<0.000000e+00> : vector<8x1xf32>
    %279 = tpu.matmul %277, %278, %cst_124 {dimension_numbers = #tpu.dot_dimension_numbers<[1], [1], [0], [0], [0, 0, 1, 0], [], []>} : vector<8x8xf32>, vector<1x8xf32>, vector<8x1xf32> -> vector<8x1xf32>
    %cst_125 = arith.constant 0.353553385 : f32
    %280 = vector.broadcast %cst_125 : f32 to vector<8x1xf32>
    %281 = arith.mulf %279, %280 : vector<8x1xf32>
    %cst_126 = arith.constant dense<0xFF800000> : vector<8xf32>
    %282 = vector.multi_reduction <maximumf>, %281, %cst_126 [1] : vector<8x1xf32> to vector<8xf32>
    %283 = vector.shape_cast %282 : vector<8xf32> to vector<8x1xf32>
    %284 = arith.subf %281, %283 : vector<8x1xf32>
    %285 = math.exp %284 : vector<8x1xf32>
    %cst_127 = arith.constant dense<0.000000e+00> : vector<8xf32>
    %286 = vector.multi_reduction <add>, %285, %cst_127 [1] : vector<8x1xf32> to vector<8xf32>
    %287 = vector.shape_cast %286 : vector<8xf32> to vector<8x1xf32>
    %288 = arith.divf %285, %287 : vector<8x1xf32>
    %289 = vector.extract_strided_slice %258 {offsets = [0, 8], sizes = [1, 8], strides = [1, 1]} : vector<1x32xf32> to vector<1x8xf32>
    %cst_128 = arith.constant dense<0.000000e+00> : vector<8x8xf32>
    %290 = tpu.matmul %288, %289, %cst_128 {dimension_numbers = #tpu.dot_dimension_numbers<[1], [0], [0], [1], [0, 0, 1, 1], [], []>} : vector<8x1xf32>, vector<1x8xf32>, vector<8x8xf32> -> vector<8x8xf32>
    %291 = vector.extract_strided_slice %243 {offsets = [8, 0], sizes = [8, 32], strides = [1, 1]} : vector<32x32xf32> to vector<8x32xf32>
    %cst_129 = arith.constant dense<0.000000e+00> : vector<8x32xf32>
    %292 = tpu.matmul %290, %291, %cst_129 {dimension_numbers = #tpu.dot_dimension_numbers<[1], [0], [0], [1], [0, 0, 1, 1], [], []>} : vector<8x8xf32>, vector<8x32xf32>, vector<8x32xf32> -> vector<8x32xf32>
    %293 = arith.addf %276, %292 : vector<8x32xf32>
    %294 = vector.extract_strided_slice %256 {offsets = [0, 16], sizes = [8, 8], strides = [1, 1]} : vector<8x32xf32> to vector<8x8xf32>
    %295 = vector.extract_strided_slice %257 {offsets = [0, 16], sizes = [1, 8], strides = [1, 1]} : vector<1x32xf32> to vector<1x8xf32>
    %cst_130 = arith.constant dense<0.000000e+00> : vector<8x1xf32>
    %296 = tpu.matmul %294, %295, %cst_130 {dimension_numbers = #tpu.dot_dimension_numbers<[1], [1], [0], [0], [0, 0, 1, 0], [], []>} : vector<8x8xf32>, vector<1x8xf32>, vector<8x1xf32> -> vector<8x1xf32>
    %cst_131 = arith.constant 0.353553385 : f32
    %297 = vector.broadcast %cst_131 : f32 to vector<8x1xf32>
    %298 = arith.mulf %296, %297 : vector<8x1xf32>
    %cst_132 = arith.constant dense<0xFF800000> : vector<8xf32>
    %299 = vector.multi_reduction <maximumf>, %298, %cst_132 [1] : vector<8x1xf32> to vector<8xf32>
    %300 = vector.shape_cast %299 : vector<8xf32> to vector<8x1xf32>
    %301 = arith.subf %298, %300 : vector<8x1xf32>
    %302 = math.exp %301 : vector<8x1xf32>
    %cst_133 = arith.constant dense<0.000000e+00> : vector<8xf32>
    %303 = vector.multi_reduction <add>, %302, %cst_133 [1] : vector<8x1xf32> to vector<8xf32>
    %304 = vector.shape_cast %303 : vector<8xf32> to vector<8x1xf32>
    %305 = arith.divf %302, %304 : vector<8x1xf32>
    %306 = vector.extract_strided_slice %258 {offsets = [0, 16], sizes = [1, 8], strides = [1, 1]} : vector<1x32xf32> to vector<1x8xf32>
    %cst_134 = arith.constant dense<0.000000e+00> : vector<8x8xf32>
    %307 = tpu.matmul %305, %306, %cst_134 {dimension_numbers = #tpu.dot_dimension_numbers<[1], [0], [0], [1], [0, 0, 1, 1], [], []>} : vector<8x1xf32>, vector<1x8xf32>, vector<8x8xf32> -> vector<8x8xf32>
    %308 = vector.extract_strided_slice %243 {offsets = [16, 0], sizes = [8, 32], strides = [1, 1]} : vector<32x32xf32> to vector<8x32xf32>
    %cst_135 = arith.constant dense<0.000000e+00> : vector<8x32xf32>
    %309 = tpu.matmul %307, %308, %cst_135 {dimension_numbers = #tpu.dot_dimension_numbers<[1], [0], [0], [1], [0, 0, 1, 1], [], []>} : vector<8x8xf32>, vector<8x32xf32>, vector<8x32xf32> -> vector<8x32xf32>
    %310 = arith.addf %293, %309 : vector<8x32xf32>
    %311 = vector.extract_strided_slice %256 {offsets = [0, 24], sizes = [8, 8], strides = [1, 1]} : vector<8x32xf32> to vector<8x8xf32>
    %312 = vector.extract_strided_slice %257 {offsets = [0, 24], sizes = [1, 8], strides = [1, 1]} : vector<1x32xf32> to vector<1x8xf32>
    %cst_136 = arith.constant dense<0.000000e+00> : vector<8x1xf32>
    %313 = tpu.matmul %311, %312, %cst_136 {dimension_numbers = #tpu.dot_dimension_numbers<[1], [1], [0], [0], [0, 0, 1, 0], [], []>} : vector<8x8xf32>, vector<1x8xf32>, vector<8x1xf32> -> vector<8x1xf32>
    %cst_137 = arith.constant 0.353553385 : f32
    %314 = vector.broadcast %cst_137 : f32 to vector<8x1xf32>
    %315 = arith.mulf %313, %314 : vector<8x1xf32>
    %cst_138 = arith.constant dense<0xFF800000> : vector<8xf32>
    %316 = vector.multi_reduction <maximumf>, %315, %cst_138 [1] : vector<8x1xf32> to vector<8xf32>
    %317 = vector.shape_cast %316 : vector<8xf32> to vector<8x1xf32>
    %318 = arith.subf %315, %317 : vector<8x1xf32>
    %319 = math.exp %318 : vector<8x1xf32>
    %cst_139 = arith.constant dense<0.000000e+00> : vector<8xf32>
    %320 = vector.multi_reduction <add>, %319, %cst_139 [1] : vector<8x1xf32> to vector<8xf32>
    %321 = vector.shape_cast %320 : vector<8xf32> to vector<8x1xf32>
    %322 = arith.divf %319, %321 : vector<8x1xf32>
    %323 = vector.extract_strided_slice %258 {offsets = [0, 24], sizes = [1, 8], strides = [1, 1]} : vector<1x32xf32> to vector<1x8xf32>
    %cst_140 = arith.constant dense<0.000000e+00> : vector<8x8xf32>
    %324 = tpu.matmul %322, %323, %cst_140 {dimension_numbers = #tpu.dot_dimension_numbers<[1], [0], [0], [1], [0, 0, 1, 1], [], []>} : vector<8x1xf32>, vector<1x8xf32>, vector<8x8xf32> -> vector<8x8xf32>
    %325 = vector.extract_strided_slice %243 {offsets = [24, 0], sizes = [8, 32], strides = [1, 1]} : vector<32x32xf32> to vector<8x32xf32>
    %cst_141 = arith.constant dense<0.000000e+00> : vector<8x32xf32>
    %326 = tpu.matmul %324, %325, %cst_141 {dimension_numbers = #tpu.dot_dimension_numbers<[1], [0], [0], [1], [0, 0, 1, 1], [], []>} : vector<8x8xf32>, vector<8x32xf32>, vector<8x32xf32> -> vector<8x32xf32>
    %327 = arith.addf %310, %326 : vector<8x32xf32>
    %328 = vector.extract_strided_slice %249 {offsets = [8, 0], sizes = [8, 32], strides = [1, 1]} : vector<16x32xf32> to vector<8x32xf32>
    %329 = vector.extract_strided_slice %252 {offsets = [1, 0], sizes = [1, 32], strides = [1, 1]} : vector<2x32xf32> to vector<1x32xf32>
    %330 = vector.extract_strided_slice %255 {offsets = [1, 0], sizes = [1, 32], strides = [1, 1]} : vector<2x32xf32> to vector<1x32xf32>
    %cst_142 = arith.constant 0.000000e+00 : f32
    %331 = vector.broadcast %cst_142 : f32 to vector<8x32xf32>
    %332 = vector.extract_strided_slice %328 {offsets = [0, 0], sizes = [8, 8], strides = [1, 1]} : vector<8x32xf32> to vector<8x8xf32>
    %333 = vector.extract_strided_slice %329 {offsets = [0, 0], sizes = [1, 8], strides = [1, 1]} : vector<1x32xf32> to vector<1x8xf32>
    %cst_143 = arith.constant dense<0.000000e+00> : vector<8x1xf32>
    %334 = tpu.matmul %332, %333, %cst_143 {dimension_numbers = #tpu.dot_dimension_numbers<[1], [1], [0], [0], [0, 0, 1, 0], [], []>} : vector<8x8xf32>, vector<1x8xf32>, vector<8x1xf32> -> vector<8x1xf32>
    %cst_144 = arith.constant 0.353553385 : f32
    %335 = vector.broadcast %cst_144 : f32 to vector<8x1xf32>
    %336 = arith.mulf %334, %335 : vector<8x1xf32>
    %cst_145 = arith.constant dense<0xFF800000> : vector<8xf32>
    %337 = vector.multi_reduction <maximumf>, %336, %cst_145 [1] : vector<8x1xf32> to vector<8xf32>
    %338 = vector.shape_cast %337 : vector<8xf32> to vector<8x1xf32>
    %339 = arith.subf %336, %338 : vector<8x1xf32>
    %340 = math.exp %339 : vector<8x1xf32>
    %cst_146 = arith.constant dense<0.000000e+00> : vector<8xf32>
    %341 = vector.multi_reduction <add>, %340, %cst_146 [1] : vector<8x1xf32> to vector<8xf32>
    %342 = vector.shape_cast %341 : vector<8xf32> to vector<8x1xf32>
    %343 = arith.divf %340, %342 : vector<8x1xf32>
    %344 = vector.extract_strided_slice %330 {offsets = [0, 0], sizes = [1, 8], strides = [1, 1]} : vector<1x32xf32> to vector<1x8xf32>
    %cst_147 = arith.constant dense<0.000000e+00> : vector<8x8xf32>
    %345 = tpu.matmul %343, %344, %cst_147 {dimension_numbers = #tpu.dot_dimension_numbers<[1], [0], [0], [1], [0, 0, 1, 1], [], []>} : vector<8x1xf32>, vector<1x8xf32>, vector<8x8xf32> -> vector<8x8xf32>
    %346 = vector.extract_strided_slice %243 {offsets = [0, 0], sizes = [8, 32], strides = [1, 1]} : vector<32x32xf32> to vector<8x32xf32>
    %cst_148 = arith.constant dense<0.000000e+00> : vector<8x32xf32>
    %347 = tpu.matmul %345, %346, %cst_148 {dimension_numbers = #tpu.dot_dimension_numbers<[1], [0], [0], [1], [0, 0, 1, 1], [], []>} : vector<8x8xf32>, vector<8x32xf32>, vector<8x32xf32> -> vector<8x32xf32>
    %348 = arith.addf %331, %347 : vector<8x32xf32>
    %349 = vector.extract_strided_slice %328 {offsets = [0, 8], sizes = [8, 8], strides = [1, 1]} : vector<8x32xf32> to vector<8x8xf32>
    %350 = vector.extract_strided_slice %329 {offsets = [0, 8], sizes = [1, 8], strides = [1, 1]} : vector<1x32xf32> to vector<1x8xf32>
    %cst_149 = arith.constant dense<0.000000e+00> : vector<8x1xf32>
    %351 = tpu.matmul %349, %350, %cst_149 {dimension_numbers = #tpu.dot_dimension_numbers<[1], [1], [0], [0], [0, 0, 1, 0], [], []>} : vector<8x8xf32>, vector<1x8xf32>, vector<8x1xf32> -> vector<8x1xf32>
    %cst_150 = arith.constant 0.353553385 : f32
    %352 = vector.broadcast %cst_150 : f32 to vector<8x1xf32>
    %353 = arith.mulf %351, %352 : vector<8x1xf32>
    %cst_151 = arith.constant dense<0xFF800000> : vector<8xf32>
    %354 = vector.multi_reduction <maximumf>, %353, %cst_151 [1] : vector<8x1xf32> to vector<8xf32>
    %355 = vector.shape_cast %354 : vector<8xf32> to vector<8x1xf32>
    %356 = arith.subf %353, %355 : vector<8x1xf32>
    %357 = math.exp %356 : vector<8x1xf32>
    %cst_152 = arith.constant dense<0.000000e+00> : vector<8xf32>
    %358 = vector.multi_reduction <add>, %357, %cst_152 [1] : vector<8x1xf32> to vector<8xf32>
    %359 = vector.shape_cast %358 : vector<8xf32> to vector<8x1xf32>
    %360 = arith.divf %357, %359 : vector<8x1xf32>
    %361 = vector.extract_strided_slice %330 {offsets = [0, 8], sizes = [1, 8], strides = [1, 1]} : vector<1x32xf32> to vector<1x8xf32>
    %cst_153 = arith.constant dense<0.000000e+00> : vector<8x8xf32>
    %362 = tpu.matmul %360, %361, %cst_153 {dimension_numbers = #tpu.dot_dimension_numbers<[1], [0], [0], [1], [0, 0, 1, 1], [], []>} : vector<8x1xf32>, vector<1x8xf32>, vector<8x8xf32> -> vector<8x8xf32>
    %363 = vector.extract_strided_slice %243 {offsets = [8, 0], sizes = [8, 32], strides = [1, 1]} : vector<32x32xf32> to vector<8x32xf32>
    %cst_154 = arith.constant dense<0.000000e+00> : vector<8x32xf32>
    %364 = tpu.matmul %362, %363, %cst_154 {dimension_numbers = #tpu.dot_dimension_numbers<[1], [0], [0], [1], [0, 0, 1, 1], [], []>} : vector<8x8xf32>, vector<8x32xf32>, vector<8x32xf32> -> vector<8x32xf32>
    %365 = arith.addf %348, %364 : vector<8x32xf32>
    %366 = vector.extract_strided_slice %328 {offsets = [0, 16], sizes = [8, 8], strides = [1, 1]} : vector<8x32xf32> to vector<8x8xf32>
    %367 = vector.extract_strided_slice %329 {offsets = [0, 16], sizes = [1, 8], strides = [1, 1]} : vector<1x32xf32> to vector<1x8xf32>
    %cst_155 = arith.constant dense<0.000000e+00> : vector<8x1xf32>
    %368 = tpu.matmul %366, %367, %cst_155 {dimension_numbers = #tpu.dot_dimension_numbers<[1], [1], [0], [0], [0, 0, 1, 0], [], []>} : vector<8x8xf32>, vector<1x8xf32>, vector<8x1xf32> -> vector<8x1xf32>
    %cst_156 = arith.constant 0.353553385 : f32
    %369 = vector.broadcast %cst_156 : f32 to vector<8x1xf32>
    %370 = arith.mulf %368, %369 : vector<8x1xf32>
    %cst_157 = arith.constant dense<0xFF800000> : vector<8xf32>
    %371 = vector.multi_reduction <maximumf>, %370, %cst_157 [1] : vector<8x1xf32> to vector<8xf32>
    %372 = vector.shape_cast %371 : vector<8xf32> to vector<8x1xf32>
    %373 = arith.subf %370, %372 : vector<8x1xf32>
    %374 = math.exp %373 : vector<8x1xf32>
    %cst_158 = arith.constant dense<0.000000e+00> : vector<8xf32>
    %375 = vector.multi_reduction <add>, %374, %cst_158 [1] : vector<8x1xf32> to vector<8xf32>
    %376 = vector.shape_cast %375 : vector<8xf32> to vector<8x1xf32>
    %377 = arith.divf %374, %376 : vector<8x1xf32>
    %378 = vector.extract_strided_slice %330 {offsets = [0, 16], sizes = [1, 8], strides = [1, 1]} : vector<1x32xf32> to vector<1x8xf32>
    %cst_159 = arith.constant dense<0.000000e+00> : vector<8x8xf32>
    %379 = tpu.matmul %377, %378, %cst_159 {dimension_numbers = #tpu.dot_dimension_numbers<[1], [0], [0], [1], [0, 0, 1, 1], [], []>} : vector<8x1xf32>, vector<1x8xf32>, vector<8x8xf32> -> vector<8x8xf32>
    %380 = vector.extract_strided_slice %243 {offsets = [16, 0], sizes = [8, 32], strides = [1, 1]} : vector<32x32xf32> to vector<8x32xf32>
    %cst_160 = arith.constant dense<0.000000e+00> : vector<8x32xf32>
    %381 = tpu.matmul %379, %380, %cst_160 {dimension_numbers = #tpu.dot_dimension_numbers<[1], [0], [0], [1], [0, 0, 1, 1], [], []>} : vector<8x8xf32>, vector<8x32xf32>, vector<8x32xf32> -> vector<8x32xf32>
    %382 = arith.addf %365, %381 : vector<8x32xf32>
    %383 = vector.extract_strided_slice %328 {offsets = [0, 24], sizes = [8, 8], strides = [1, 1]} : vector<8x32xf32> to vector<8x8xf32>
    %384 = vector.extract_strided_slice %329 {offsets = [0, 24], sizes = [1, 8], strides = [1, 1]} : vector<1x32xf32> to vector<1x8xf32>
    %cst_161 = arith.constant dense<0.000000e+00> : vector<8x1xf32>
    %385 = tpu.matmul %383, %384, %cst_161 {dimension_numbers = #tpu.dot_dimension_numbers<[1], [1], [0], [0], [0, 0, 1, 0], [], []>} : vector<8x8xf32>, vector<1x8xf32>, vector<8x1xf32> -> vector<8x1xf32>
    %cst_162 = arith.constant 0.353553385 : f32
    %386 = vector.broadcast %cst_162 : f32 to vector<8x1xf32>
    %387 = arith.mulf %385, %386 : vector<8x1xf32>
    %cst_163 = arith.constant dense<0xFF800000> : vector<8xf32>
    %388 = vector.multi_reduction <maximumf>, %387, %cst_163 [1] : vector<8x1xf32> to vector<8xf32>
    %389 = vector.shape_cast %388 : vector<8xf32> to vector<8x1xf32>
    %390 = arith.subf %387, %389 : vector<8x1xf32>
    %391 = math.exp %390 : vector<8x1xf32>
    %cst_164 = arith.constant dense<0.000000e+00> : vector<8xf32>
    %392 = vector.multi_reduction <add>, %391, %cst_164 [1] : vector<8x1xf32> to vector<8xf32>
    %393 = vector.shape_cast %392 : vector<8xf32> to vector<8x1xf32>
    %394 = arith.divf %391, %393 : vector<8x1xf32>
    %395 = vector.extract_strided_slice %330 {offsets = [0, 24], sizes = [1, 8], strides = [1, 1]} : vector<1x32xf32> to vector<1x8xf32>
    %cst_165 = arith.constant dense<0.000000e+00> : vector<8x8xf32>
    %396 = tpu.matmul %394, %395, %cst_165 {dimension_numbers = #tpu.dot_dimension_numbers<[1], [0], [0], [1], [0, 0, 1, 1], [], []>} : vector<8x1xf32>, vector<1x8xf32>, vector<8x8xf32> -> vector<8x8xf32>
    %397 = vector.extract_strided_slice %243 {offsets = [24, 0], sizes = [8, 32], strides = [1, 1]} : vector<32x32xf32> to vector<8x32xf32>
    %cst_166 = arith.constant dense<0.000000e+00> : vector<8x32xf32>
    %398 = tpu.matmul %396, %397, %cst_166 {dimension_numbers = #tpu.dot_dimension_numbers<[1], [0], [0], [1], [0, 0, 1, 1], [], []>} : vector<8x8xf32>, vector<8x32xf32>, vector<8x32xf32> -> vector<8x32xf32>
    %399 = arith.addf %382, %398 : vector<8x32xf32>
    %400 = tpu.concatenate %327, %399 in 0 : vector<8x32xf32>, vector<8x32xf32> -> vector<16x32xf32>
    %401 = vector.broadcast %244 : vector<1x32xf32> to vector<16x32xf32>
    %402 = arith.addf %400, %401 : vector<16x32xf32>
    %403 = arith.addf %402, %236 : vector<16x32xf32>
    %cst_167 = arith.constant dense<0.000000e+00> : vector<16xf32>
    %404 = vector.multi_reduction <add>, %403, %cst_167 [1] : vector<16x32xf32> to vector<16xf32>
    %405 = vector.shape_cast %404 : vector<16xf32> to vector<16x1xf32>
    %cst_168 = arith.constant 3.200000e+01 : f32
    %406 = vector.broadcast %cst_168 : f32 to vector<16x1xf32>
    %407 = arith.divf %405, %406 : vector<16x1xf32>
    %408 = vector.broadcast %407 : vector<16x1xf32> to vector<16x32xf32>
    %409 = arith.subf %403, %408 : vector<16x32xf32>
    %410 = arith.mulf %409, %409 : vector<16x32xf32>
    %cst_169 = arith.constant dense<0.000000e+00> : vector<16xf32>
    %411 = vector.multi_reduction <add>, %410, %cst_169 [1] : vector<16x32xf32> to vector<16xf32>
    %412 = vector.shape_cast %411 : vector<16xf32> to vector<16x1xf32>
    %cst_170 = arith.constant 3.200000e+01 : f32
    %413 = vector.broadcast %cst_170 : f32 to vector<16x1xf32>
    %414 = arith.divf %412, %413 : vector<16x1xf32>
    %415 = vector.broadcast %407 : vector<16x1xf32> to vector<16x32xf32>
    %416 = arith.subf %403, %415 : vector<16x32xf32>
    %cst_171 = arith.constant 9.99999996E-13 : f32
    %417 = vector.broadcast %cst_171 : f32 to vector<16x1xf32>
    %418 = arith.addf %414, %417 : vector<16x1xf32>
    %419 = math.rsqrt %418 : vector<16x1xf32>
    %420 = vector.broadcast %419 : vector<16x1xf32> to vector<16x32xf32>
    %421 = arith.mulf %416, %420 : vector<16x32xf32>
    %422 = vector.broadcast %245 : vector<1x32xf32> to vector<16x32xf32>
    %423 = arith.mulf %421, %422 : vector<16x32xf32>
    %424 = vector.broadcast %246 : vector<1x32xf32> to vector<16x32xf32>
    %425 = arith.addf %423, %424 : vector<16x32xf32>
    %c0_172 = arith.constant 0 : index
    %c0_173 = arith.constant 0 : index
    %426 = vector.load %arg26[%c0_172, %c0_173] : memref<32x64xf32, #tpu.memory_space<vmem>>, vector<32x64xf32>
    %c0_174 = arith.constant 0 : index
    %c0_175 = arith.constant 0 : index
    %427 = vector.load %arg27[%c0_174, %c0_175] : memref<1x64xf32, #tpu.memory_space<vmem>>, vector<1x64xf32>
    %c0_176 = arith.constant 0 : index
    %c0_177 = arith.constant 0 : index
    %428 = vector.load %arg28[%c0_176, %c0_177] : memref<64x32xf32, #tpu.memory_space<vmem>>, vector<64x32xf32>
    %c0_178 = arith.constant 0 : index
    %c0_179 = arith.constant 0 : index
    %429 = vector.load %arg29[%c0_178, %c0_179] : memref<1x32xf32, #tpu.memory_space<vmem>>, vector<1x32xf32>
    %c0_180 = arith.constant 0 : index
    %c0_181 = arith.constant 0 : index
    %430 = vector.load %arg30[%c0_180, %c0_181] : memref<1x32xf32, #tpu.memory_space<vmem>>, vector<1x32xf32>
    %c0_182 = arith.constant 0 : index
    %c0_183 = arith.constant 0 : index
    %431 = vector.load %arg31[%c0_182, %c0_183] : memref<1x32xf32, #tpu.memory_space<vmem>>, vector<1x32xf32>
    %cst_184 = arith.constant dense<0.000000e+00> : vector<16x64xf32>
    %432 = tpu.matmul %425, %426, %cst_184 {dimension_numbers = #tpu.dot_dimension_numbers<[1], [0], [0], [1], [0, 0, 1, 1], [], []>} : vector<16x32xf32>, vector<32x64xf32>, vector<16x64xf32> -> vector<16x64xf32>
    %433 = vector.broadcast %427 : vector<1x64xf32> to vector<16x64xf32>
    %434 = arith.addf %432, %433 : vector<16x64xf32>
    %cst_185 = arith.constant 5.000000e-01 : f32
    %435 = vector.broadcast %cst_185 : f32 to vector<16x64xf32>
    %436 = arith.mulf %435, %434 : vector<16x64xf32>
    %cst_186 = arith.constant 0.707106769 : f32
    %437 = vector.broadcast %cst_186 : f32 to vector<16x64xf32>
    %438 = arith.mulf %434, %437 : vector<16x64xf32>
    %439 = math.erf %438 : vector<16x64xf32>
    %cst_187 = arith.constant 1.000000e+00 : f32
    %440 = vector.broadcast %cst_187 : f32 to vector<16x64xf32>
    %441 = arith.addf %440, %439 : vector<16x64xf32>
    %442 = arith.mulf %436, %441 : vector<16x64xf32>
    %cst_188 = arith.constant dense<0.000000e+00> : vector<16x32xf32>
    %443 = tpu.matmul %442, %428, %cst_188 {dimension_numbers = #tpu.dot_dimension_numbers<[1], [0], [0], [1], [0, 0, 1, 1], [], []>} : vector<16x64xf32>, vector<64x32xf32>, vector<16x32xf32> -> vector<16x32xf32>
    %444 = vector.broadcast %429 : vector<1x32xf32> to vector<16x32xf32>
    %445 = arith.addf %443, %444 : vector<16x32xf32>
    %446 = arith.addf %445, %425 : vector<16x32xf32>
    %cst_189 = arith.constant dense<0.000000e+00> : vector<16xf32>
    %447 = vector.multi_reduction <add>, %446, %cst_189 [1] : vector<16x32xf32> to vector<16xf32>
    %448 = vector.shape_cast %447 : vector<16xf32> to vector<16x1xf32>
    %cst_190 = arith.constant 3.200000e+01 : f32
    %449 = vector.broadcast %cst_190 : f32 to vector<16x1xf32>
    %450 = arith.divf %448, %449 : vector<16x1xf32>
    %451 = vector.broadcast %450 : vector<16x1xf32> to vector<16x32xf32>
    %452 = arith.subf %446, %451 : vector<16x32xf32>
    %453 = arith.mulf %452, %452 : vector<16x32xf32>
    %cst_191 = arith.constant dense<0.000000e+00> : vector<16xf32>
    %454 = vector.multi_reduction <add>, %453, %cst_191 [1] : vector<16x32xf32> to vector<16xf32>
    %455 = vector.shape_cast %454 : vector<16xf32> to vector<16x1xf32>
    %cst_192 = arith.constant 3.200000e+01 : f32
    %456 = vector.broadcast %cst_192 : f32 to vector<16x1xf32>
    %457 = arith.divf %455, %456 : vector<16x1xf32>
    %458 = vector.broadcast %450 : vector<16x1xf32> to vector<16x32xf32>
    %459 = arith.subf %446, %458 : vector<16x32xf32>
    %cst_193 = arith.constant 9.99999996E-13 : f32
    %460 = vector.broadcast %cst_193 : f32 to vector<16x1xf32>
    %461 = arith.addf %457, %460 : vector<16x1xf32>
    %462 = math.rsqrt %461 : vector<16x1xf32>
    %463 = vector.broadcast %462 : vector<16x1xf32> to vector<16x32xf32>
    %464 = arith.mulf %459, %463 : vector<16x32xf32>
    %465 = vector.broadcast %430 : vector<1x32xf32> to vector<16x32xf32>
    %466 = arith.mulf %464, %465 : vector<16x32xf32>
    %467 = vector.broadcast %431 : vector<1x32xf32> to vector<16x32xf32>
    %468 = arith.addf %466, %467 : vector<16x32xf32>
    %c0_194 = arith.constant 0 : index
    %c0_195 = arith.constant 0 : index
    %469 = vector.load %arg32[%c0_194, %c0_195] : memref<32x32xf32, #tpu.memory_space<vmem>>, vector<32x32xf32>
    %c0_196 = arith.constant 0 : index
    %c0_197 = arith.constant 0 : index
    %470 = vector.load %arg33[%c0_196, %c0_197] : memref<1x32xf32, #tpu.memory_space<vmem>>, vector<1x32xf32>
    %c0_198 = arith.constant 0 : index
    %c0_199 = arith.constant 0 : index
    %471 = vector.load %arg34[%c0_198, %c0_199] : memref<32x32xf32, #tpu.memory_space<vmem>>, vector<32x32xf32>
    %c0_200 = arith.constant 0 : index
    %c0_201 = arith.constant 0 : index
    %472 = vector.load %arg35[%c0_200, %c0_201] : memref<1x32xf32, #tpu.memory_space<vmem>>, vector<1x32xf32>
    %c0_202 = arith.constant 0 : index
    %c0_203 = arith.constant 0 : index
    %473 = vector.load %arg36[%c0_202, %c0_203] : memref<32x32xf32, #tpu.memory_space<vmem>>, vector<32x32xf32>
    %c0_204 = arith.constant 0 : index
    %c0_205 = arith.constant 0 : index
    %474 = vector.load %arg37[%c0_204, %c0_205] : memref<1x32xf32, #tpu.memory_space<vmem>>, vector<1x32xf32>
    %c0_206 = arith.constant 0 : index
    %c0_207 = arith.constant 0 : index
    %475 = vector.load %arg38[%c0_206, %c0_207] : memref<32x32xf32, #tpu.memory_space<vmem>>, vector<32x32xf32>
    %c0_208 = arith.constant 0 : index
    %c0_209 = arith.constant 0 : index
    %476 = vector.load %arg39[%c0_208, %c0_209] : memref<1x32xf32, #tpu.memory_space<vmem>>, vector<1x32xf32>
    %c0_210 = arith.constant 0 : index
    %c0_211 = arith.constant 0 : index
    %477 = vector.load %arg40[%c0_210, %c0_211] : memref<1x32xf32, #tpu.memory_space<vmem>>, vector<1x32xf32>
    %c0_212 = arith.constant 0 : index
    %c0_213 = arith.constant 0 : index
    %478 = vector.load %arg41[%c0_212, %c0_213] : memref<1x32xf32, #tpu.memory_space<vmem>>, vector<1x32xf32>
    %cst_214 = arith.constant dense<0.000000e+00> : vector<16x32xf32>
    %479 = tpu.matmul %468, %469, %cst_214 {dimension_numbers = #tpu.dot_dimension_numbers<[1], [0], [0], [1], [0, 0, 1, 1], [], []>} : vector<16x32xf32>, vector<32x32xf32>, vector<16x32xf32> -> vector<16x32xf32>
    %480 = vector.broadcast %470 : vector<1x32xf32> to vector<16x32xf32>
    %481 = arith.addf %479, %480 : vector<16x32xf32>
    %cst_215 = arith.constant dense<0.000000e+00> : vector<16x32xf32>
    %482 = tpu.matmul %468, %471, %cst_215 {dimension_numbers = #tpu.dot_dimension_numbers<[1], [0], [0], [1], [0, 0, 1, 1], [], []>} : vector<16x32xf32>, vector<32x32xf32>, vector<16x32xf32> -> vector<16x32xf32>
    %483 = vector.broadcast %472 : vector<1x32xf32> to vector<16x32xf32>
    %484 = arith.addf %482, %483 : vector<16x32xf32>
    %cst_216 = arith.constant dense<0.000000e+00> : vector<16x32xf32>
    %485 = tpu.matmul %468, %473, %cst_216 {dimension_numbers = #tpu.dot_dimension_numbers<[1], [0], [0], [1], [0, 0, 1, 1], [], []>} : vector<16x32xf32>, vector<32x32xf32>, vector<16x32xf32> -> vector<16x32xf32>
    %486 = vector.broadcast %474 : vector<1x32xf32> to vector<16x32xf32>
    %487 = arith.addf %485, %486 : vector<16x32xf32>
    %488 = vector.extract_strided_slice %481 {offsets = [0, 0], sizes = [8, 32], strides = [1, 1]} : vector<16x32xf32> to vector<8x32xf32>
    %489 = vector.extract_strided_slice %484 {offsets = [0, 0], sizes = [8, 32], strides = [1, 1]} : vector<16x32xf32> to vector<8x32xf32>
    %490 = vector.extract_strided_slice %487 {offsets = [0, 0], sizes = [8, 32], strides = [1, 1]} : vector<16x32xf32> to vector<8x32xf32>
    %cst_217 = arith.constant 0.000000e+00 : f32
    %491 = vector.broadcast %cst_217 : f32 to vector<8x32xf32>
    %492 = vector.extract_strided_slice %488 {offsets = [0, 0], sizes = [8, 8], strides = [1, 1]} : vector<8x32xf32> to vector<8x8xf32>
    %493 = vector.extract_strided_slice %489 {offsets = [0, 0], sizes = [8, 8], strides = [1, 1]} : vector<8x32xf32> to vector<8x8xf32>
    %cst_218 = arith.constant dense<0.000000e+00> : vector<8x8xf32>
    %494 = tpu.matmul %492, %493, %cst_218 {dimension_numbers = #tpu.dot_dimension_numbers<[1], [1], [0], [0], [0, 0, 1, 0], [], []>} : vector<8x8xf32>, vector<8x8xf32>, vector<8x8xf32> -> vector<8x8xf32>
    %cst_219 = arith.constant 0.353553385 : f32
    %495 = vector.broadcast %cst_219 : f32 to vector<8x8xf32>
    %496 = arith.mulf %494, %495 : vector<8x8xf32>
    %cst_220 = arith.constant dense<0xFF800000> : vector<8xf32>
    %497 = vector.multi_reduction <maximumf>, %496, %cst_220 [1] : vector<8x8xf32> to vector<8xf32>
    %498 = vector.shape_cast %497 : vector<8xf32> to vector<8x1xf32>
    %499 = vector.broadcast %498 : vector<8x1xf32> to vector<8x8xf32>
    %500 = arith.subf %496, %499 : vector<8x8xf32>
    %501 = math.exp %500 : vector<8x8xf32>
    %cst_221 = arith.constant dense<0.000000e+00> : vector<8xf32>
    %502 = vector.multi_reduction <add>, %501, %cst_221 [1] : vector<8x8xf32> to vector<8xf32>
    %503 = vector.shape_cast %502 : vector<8xf32> to vector<8x1xf32>
    %504 = vector.broadcast %503 : vector<8x1xf32> to vector<8x8xf32>
    %505 = arith.divf %501, %504 : vector<8x8xf32>
    %506 = vector.extract_strided_slice %490 {offsets = [0, 0], sizes = [8, 8], strides = [1, 1]} : vector<8x32xf32> to vector<8x8xf32>
    %cst_222 = arith.constant dense<0.000000e+00> : vector<8x8xf32>
    %507 = tpu.matmul %505, %506, %cst_222 {dimension_numbers = #tpu.dot_dimension_numbers<[1], [0], [0], [1], [0, 0, 1, 1], [], []>} : vector<8x8xf32>, vector<8x8xf32>, vector<8x8xf32> -> vector<8x8xf32>
    %508 = vector.extract_strided_slice %475 {offsets = [0, 0], sizes = [8, 32], strides = [1, 1]} : vector<32x32xf32> to vector<8x32xf32>
    %cst_223 = arith.constant dense<0.000000e+00> : vector<8x32xf32>
    %509 = tpu.matmul %507, %508, %cst_223 {dimension_numbers = #tpu.dot_dimension_numbers<[1], [0], [0], [1], [0, 0, 1, 1], [], []>} : vector<8x8xf32>, vector<8x32xf32>, vector<8x32xf32> -> vector<8x32xf32>
    %510 = arith.addf %491, %509 : vector<8x32xf32>
    %511 = vector.extract_strided_slice %488 {offsets = [0, 8], sizes = [8, 8], strides = [1, 1]} : vector<8x32xf32> to vector<8x8xf32>
    %512 = vector.extract_strided_slice %489 {offsets = [0, 8], sizes = [8, 8], strides = [1, 1]} : vector<8x32xf32> to vector<8x8xf32>
    %cst_224 = arith.constant dense<0.000000e+00> : vector<8x8xf32>
    %513 = tpu.matmul %511, %512, %cst_224 {dimension_numbers = #tpu.dot_dimension_numbers<[1], [1], [0], [0], [0, 0, 1, 0], [], []>} : vector<8x8xf32>, vector<8x8xf32>, vector<8x8xf32> -> vector<8x8xf32>
    %cst_225 = arith.constant 0.353553385 : f32
    %514 = vector.broadcast %cst_225 : f32 to vector<8x8xf32>
    %515 = arith.mulf %513, %514 : vector<8x8xf32>
    %cst_226 = arith.constant dense<0xFF800000> : vector<8xf32>
    %516 = vector.multi_reduction <maximumf>, %515, %cst_226 [1] : vector<8x8xf32> to vector<8xf32>
    %517 = vector.shape_cast %516 : vector<8xf32> to vector<8x1xf32>
    %518 = vector.broadcast %517 : vector<8x1xf32> to vector<8x8xf32>
    %519 = arith.subf %515, %518 : vector<8x8xf32>
    %520 = math.exp %519 : vector<8x8xf32>
    %cst_227 = arith.constant dense<0.000000e+00> : vector<8xf32>
    %521 = vector.multi_reduction <add>, %520, %cst_227 [1] : vector<8x8xf32> to vector<8xf32>
    %522 = vector.shape_cast %521 : vector<8xf32> to vector<8x1xf32>
    %523 = vector.broadcast %522 : vector<8x1xf32> to vector<8x8xf32>
    %524 = arith.divf %520, %523 : vector<8x8xf32>
    %525 = vector.extract_strided_slice %490 {offsets = [0, 8], sizes = [8, 8], strides = [1, 1]} : vector<8x32xf32> to vector<8x8xf32>
    %cst_228 = arith.constant dense<0.000000e+00> : vector<8x8xf32>
    %526 = tpu.matmul %524, %525, %cst_228 {dimension_numbers = #tpu.dot_dimension_numbers<[1], [0], [0], [1], [0, 0, 1, 1], [], []>} : vector<8x8xf32>, vector<8x8xf32>, vector<8x8xf32> -> vector<8x8xf32>
    %527 = vector.extract_strided_slice %475 {offsets = [8, 0], sizes = [8, 32], strides = [1, 1]} : vector<32x32xf32> to vector<8x32xf32>
    %cst_229 = arith.constant dense<0.000000e+00> : vector<8x32xf32>
    %528 = tpu.matmul %526, %527, %cst_229 {dimension_numbers = #tpu.dot_dimension_numbers<[1], [0], [0], [1], [0, 0, 1, 1], [], []>} : vector<8x8xf32>, vector<8x32xf32>, vector<8x32xf32> -> vector<8x32xf32>
    %529 = arith.addf %510, %528 : vector<8x32xf32>
    %530 = vector.extract_strided_slice %488 {offsets = [0, 16], sizes = [8, 8], strides = [1, 1]} : vector<8x32xf32> to vector<8x8xf32>
    %531 = vector.extract_strided_slice %489 {offsets = [0, 16], sizes = [8, 8], strides = [1, 1]} : vector<8x32xf32> to vector<8x8xf32>
    %cst_230 = arith.constant dense<0.000000e+00> : vector<8x8xf32>
    %532 = tpu.matmul %530, %531, %cst_230 {dimension_numbers = #tpu.dot_dimension_numbers<[1], [1], [0], [0], [0, 0, 1, 0], [], []>} : vector<8x8xf32>, vector<8x8xf32>, vector<8x8xf32> -> vector<8x8xf32>
    %cst_231 = arith.constant 0.353553385 : f32
    %533 = vector.broadcast %cst_231 : f32 to vector<8x8xf32>
    %534 = arith.mulf %532, %533 : vector<8x8xf32>
    %cst_232 = arith.constant dense<0xFF800000> : vector<8xf32>
    %535 = vector.multi_reduction <maximumf>, %534, %cst_232 [1] : vector<8x8xf32> to vector<8xf32>
    %536 = vector.shape_cast %535 : vector<8xf32> to vector<8x1xf32>
    %537 = vector.broadcast %536 : vector<8x1xf32> to vector<8x8xf32>
    %538 = arith.subf %534, %537 : vector<8x8xf32>
    %539 = math.exp %538 : vector<8x8xf32>
    %cst_233 = arith.constant dense<0.000000e+00> : vector<8xf32>
    %540 = vector.multi_reduction <add>, %539, %cst_233 [1] : vector<8x8xf32> to vector<8xf32>
    %541 = vector.shape_cast %540 : vector<8xf32> to vector<8x1xf32>
    %542 = vector.broadcast %541 : vector<8x1xf32> to vector<8x8xf32>
    %543 = arith.divf %539, %542 : vector<8x8xf32>
    %544 = vector.extract_strided_slice %490 {offsets = [0, 16], sizes = [8, 8], strides = [1, 1]} : vector<8x32xf32> to vector<8x8xf32>
    %cst_234 = arith.constant dense<0.000000e+00> : vector<8x8xf32>
    %545 = tpu.matmul %543, %544, %cst_234 {dimension_numbers = #tpu.dot_dimension_numbers<[1], [0], [0], [1], [0, 0, 1, 1], [], []>} : vector<8x8xf32>, vector<8x8xf32>, vector<8x8xf32> -> vector<8x8xf32>
    %546 = vector.extract_strided_slice %475 {offsets = [16, 0], sizes = [8, 32], strides = [1, 1]} : vector<32x32xf32> to vector<8x32xf32>
    %cst_235 = arith.constant dense<0.000000e+00> : vector<8x32xf32>
    %547 = tpu.matmul %545, %546, %cst_235 {dimension_numbers = #tpu.dot_dimension_numbers<[1], [0], [0], [1], [0, 0, 1, 1], [], []>} : vector<8x8xf32>, vector<8x32xf32>, vector<8x32xf32> -> vector<8x32xf32>
    %548 = arith.addf %529, %547 : vector<8x32xf32>
    %549 = vector.extract_strided_slice %488 {offsets = [0, 24], sizes = [8, 8], strides = [1, 1]} : vector<8x32xf32> to vector<8x8xf32>
    %550 = vector.extract_strided_slice %489 {offsets = [0, 24], sizes = [8, 8], strides = [1, 1]} : vector<8x32xf32> to vector<8x8xf32>
    %cst_236 = arith.constant dense<0.000000e+00> : vector<8x8xf32>
    %551 = tpu.matmul %549, %550, %cst_236 {dimension_numbers = #tpu.dot_dimension_numbers<[1], [1], [0], [0], [0, 0, 1, 0], [], []>} : vector<8x8xf32>, vector<8x8xf32>, vector<8x8xf32> -> vector<8x8xf32>
    %cst_237 = arith.constant 0.353553385 : f32
    %552 = vector.broadcast %cst_237 : f32 to vector<8x8xf32>
    %553 = arith.mulf %551, %552 : vector<8x8xf32>
    %cst_238 = arith.constant dense<0xFF800000> : vector<8xf32>
    %554 = vector.multi_reduction <maximumf>, %553, %cst_238 [1] : vector<8x8xf32> to vector<8xf32>
    %555 = vector.shape_cast %554 : vector<8xf32> to vector<8x1xf32>
    %556 = vector.broadcast %555 : vector<8x1xf32> to vector<8x8xf32>
    %557 = arith.subf %553, %556 : vector<8x8xf32>
    %558 = math.exp %557 : vector<8x8xf32>
    %cst_239 = arith.constant dense<0.000000e+00> : vector<8xf32>
    %559 = vector.multi_reduction <add>, %558, %cst_239 [1] : vector<8x8xf32> to vector<8xf32>
    %560 = vector.shape_cast %559 : vector<8xf32> to vector<8x1xf32>
    %561 = vector.broadcast %560 : vector<8x1xf32> to vector<8x8xf32>
    %562 = arith.divf %558, %561 : vector<8x8xf32>
    %563 = vector.extract_strided_slice %490 {offsets = [0, 24], sizes = [8, 8], strides = [1, 1]} : vector<8x32xf32> to vector<8x8xf32>
    %cst_240 = arith.constant dense<0.000000e+00> : vector<8x8xf32>
    %564 = tpu.matmul %562, %563, %cst_240 {dimension_numbers = #tpu.dot_dimension_numbers<[1], [0], [0], [1], [0, 0, 1, 1], [], []>} : vector<8x8xf32>, vector<8x8xf32>, vector<8x8xf32> -> vector<8x8xf32>
    %565 = vector.extract_strided_slice %475 {offsets = [24, 0], sizes = [8, 32], strides = [1, 1]} : vector<32x32xf32> to vector<8x32xf32>
    %cst_241 = arith.constant dense<0.000000e+00> : vector<8x32xf32>
    %566 = tpu.matmul %564, %565, %cst_241 {dimension_numbers = #tpu.dot_dimension_numbers<[1], [0], [0], [1], [0, 0, 1, 1], [], []>} : vector<8x8xf32>, vector<8x32xf32>, vector<8x32xf32> -> vector<8x32xf32>
    %567 = arith.addf %548, %566 : vector<8x32xf32>
    %568 = vector.extract_strided_slice %481 {offsets = [8, 0], sizes = [8, 32], strides = [1, 1]} : vector<16x32xf32> to vector<8x32xf32>
    %569 = vector.extract_strided_slice %484 {offsets = [8, 0], sizes = [8, 32], strides = [1, 1]} : vector<16x32xf32> to vector<8x32xf32>
    %570 = vector.extract_strided_slice %487 {offsets = [8, 0], sizes = [8, 32], strides = [1, 1]} : vector<16x32xf32> to vector<8x32xf32>
    %cst_242 = arith.constant 0.000000e+00 : f32
    %571 = vector.broadcast %cst_242 : f32 to vector<8x32xf32>
    %572 = vector.extract_strided_slice %568 {offsets = [0, 0], sizes = [8, 8], strides = [1, 1]} : vector<8x32xf32> to vector<8x8xf32>
    %573 = vector.extract_strided_slice %569 {offsets = [0, 0], sizes = [8, 8], strides = [1, 1]} : vector<8x32xf32> to vector<8x8xf32>
    %cst_243 = arith.constant dense<0.000000e+00> : vector<8x8xf32>
    %574 = tpu.matmul %572, %573, %cst_243 {dimension_numbers = #tpu.dot_dimension_numbers<[1], [1], [0], [0], [0, 0, 1, 0], [], []>} : vector<8x8xf32>, vector<8x8xf32>, vector<8x8xf32> -> vector<8x8xf32>
    %cst_244 = arith.constant 0.353553385 : f32
    %575 = vector.broadcast %cst_244 : f32 to vector<8x8xf32>
    %576 = arith.mulf %574, %575 : vector<8x8xf32>
    %cst_245 = arith.constant dense<0xFF800000> : vector<8xf32>
    %577 = vector.multi_reduction <maximumf>, %576, %cst_245 [1] : vector<8x8xf32> to vector<8xf32>
    %578 = vector.shape_cast %577 : vector<8xf32> to vector<8x1xf32>
    %579 = vector.broadcast %578 : vector<8x1xf32> to vector<8x8xf32>
    %580 = arith.subf %576, %579 : vector<8x8xf32>
    %581 = math.exp %580 : vector<8x8xf32>
    %cst_246 = arith.constant dense<0.000000e+00> : vector<8xf32>
    %582 = vector.multi_reduction <add>, %581, %cst_246 [1] : vector<8x8xf32> to vector<8xf32>
    %583 = vector.shape_cast %582 : vector<8xf32> to vector<8x1xf32>
    %584 = vector.broadcast %583 : vector<8x1xf32> to vector<8x8xf32>
    %585 = arith.divf %581, %584 : vector<8x8xf32>
    %586 = vector.extract_strided_slice %570 {offsets = [0, 0], sizes = [8, 8], strides = [1, 1]} : vector<8x32xf32> to vector<8x8xf32>
    %cst_247 = arith.constant dense<0.000000e+00> : vector<8x8xf32>
    %587 = tpu.matmul %585, %586, %cst_247 {dimension_numbers = #tpu.dot_dimension_numbers<[1], [0], [0], [1], [0, 0, 1, 1], [], []>} : vector<8x8xf32>, vector<8x8xf32>, vector<8x8xf32> -> vector<8x8xf32>
    %588 = vector.extract_strided_slice %475 {offsets = [0, 0], sizes = [8, 32], strides = [1, 1]} : vector<32x32xf32> to vector<8x32xf32>
    %cst_248 = arith.constant dense<0.000000e+00> : vector<8x32xf32>
    %589 = tpu.matmul %587, %588, %cst_248 {dimension_numbers = #tpu.dot_dimension_numbers<[1], [0], [0], [1], [0, 0, 1, 1], [], []>} : vector<8x8xf32>, vector<8x32xf32>, vector<8x32xf32> -> vector<8x32xf32>
    %590 = arith.addf %571, %589 : vector<8x32xf32>
    %591 = vector.extract_strided_slice %568 {offsets = [0, 8], sizes = [8, 8], strides = [1, 1]} : vector<8x32xf32> to vector<8x8xf32>
    %592 = vector.extract_strided_slice %569 {offsets = [0, 8], sizes = [8, 8], strides = [1, 1]} : vector<8x32xf32> to vector<8x8xf32>
    %cst_249 = arith.constant dense<0.000000e+00> : vector<8x8xf32>
    %593 = tpu.matmul %591, %592, %cst_249 {dimension_numbers = #tpu.dot_dimension_numbers<[1], [1], [0], [0], [0, 0, 1, 0], [], []>} : vector<8x8xf32>, vector<8x8xf32>, vector<8x8xf32> -> vector<8x8xf32>
    %cst_250 = arith.constant 0.353553385 : f32
    %594 = vector.broadcast %cst_250 : f32 to vector<8x8xf32>
    %595 = arith.mulf %593, %594 : vector<8x8xf32>
    %cst_251 = arith.constant dense<0xFF800000> : vector<8xf32>
    %596 = vector.multi_reduction <maximumf>, %595, %cst_251 [1] : vector<8x8xf32> to vector<8xf32>
    %597 = vector.shape_cast %596 : vector<8xf32> to vector<8x1xf32>
    %598 = vector.broadcast %597 : vector<8x1xf32> to vector<8x8xf32>
    %599 = arith.subf %595, %598 : vector<8x8xf32>
    %600 = math.exp %599 : vector<8x8xf32>
    %cst_252 = arith.constant dense<0.000000e+00> : vector<8xf32>
    %601 = vector.multi_reduction <add>, %600, %cst_252 [1] : vector<8x8xf32> to vector<8xf32>
    %602 = vector.shape_cast %601 : vector<8xf32> to vector<8x1xf32>
    %603 = vector.broadcast %602 : vector<8x1xf32> to vector<8x8xf32>
    %604 = arith.divf %600, %603 : vector<8x8xf32>
    %605 = vector.extract_strided_slice %570 {offsets = [0, 8], sizes = [8, 8], strides = [1, 1]} : vector<8x32xf32> to vector<8x8xf32>
    %cst_253 = arith.constant dense<0.000000e+00> : vector<8x8xf32>
    %606 = tpu.matmul %604, %605, %cst_253 {dimension_numbers = #tpu.dot_dimension_numbers<[1], [0], [0], [1], [0, 0, 1, 1], [], []>} : vector<8x8xf32>, vector<8x8xf32>, vector<8x8xf32> -> vector<8x8xf32>
    %607 = vector.extract_strided_slice %475 {offsets = [8, 0], sizes = [8, 32], strides = [1, 1]} : vector<32x32xf32> to vector<8x32xf32>
    %cst_254 = arith.constant dense<0.000000e+00> : vector<8x32xf32>
    %608 = tpu.matmul %606, %607, %cst_254 {dimension_numbers = #tpu.dot_dimension_numbers<[1], [0], [0], [1], [0, 0, 1, 1], [], []>} : vector<8x8xf32>, vector<8x32xf32>, vector<8x32xf32> -> vector<8x32xf32>
    %609 = arith.addf %590, %608 : vector<8x32xf32>
    %610 = vector.extract_strided_slice %568 {offsets = [0, 16], sizes = [8, 8], strides = [1, 1]} : vector<8x32xf32> to vector<8x8xf32>
    %611 = vector.extract_strided_slice %569 {offsets = [0, 16], sizes = [8, 8], strides = [1, 1]} : vector<8x32xf32> to vector<8x8xf32>
    %cst_255 = arith.constant dense<0.000000e+00> : vector<8x8xf32>
    %612 = tpu.matmul %610, %611, %cst_255 {dimension_numbers = #tpu.dot_dimension_numbers<[1], [1], [0], [0], [0, 0, 1, 0], [], []>} : vector<8x8xf32>, vector<8x8xf32>, vector<8x8xf32> -> vector<8x8xf32>
    %cst_256 = arith.constant 0.353553385 : f32
    %613 = vector.broadcast %cst_256 : f32 to vector<8x8xf32>
    %614 = arith.mulf %612, %613 : vector<8x8xf32>
    %cst_257 = arith.constant dense<0xFF800000> : vector<8xf32>
    %615 = vector.multi_reduction <maximumf>, %614, %cst_257 [1] : vector<8x8xf32> to vector<8xf32>
    %616 = vector.shape_cast %615 : vector<8xf32> to vector<8x1xf32>
    %617 = vector.broadcast %616 : vector<8x1xf32> to vector<8x8xf32>
    %618 = arith.subf %614, %617 : vector<8x8xf32>
    %619 = math.exp %618 : vector<8x8xf32>
    %cst_258 = arith.constant dense<0.000000e+00> : vector<8xf32>
    %620 = vector.multi_reduction <add>, %619, %cst_258 [1] : vector<8x8xf32> to vector<8xf32>
    %621 = vector.shape_cast %620 : vector<8xf32> to vector<8x1xf32>
    %622 = vector.broadcast %621 : vector<8x1xf32> to vector<8x8xf32>
    %623 = arith.divf %619, %622 : vector<8x8xf32>
    %624 = vector.extract_strided_slice %570 {offsets = [0, 16], sizes = [8, 8], strides = [1, 1]} : vector<8x32xf32> to vector<8x8xf32>
    %cst_259 = arith.constant dense<0.000000e+00> : vector<8x8xf32>
    %625 = tpu.matmul %623, %624, %cst_259 {dimension_numbers = #tpu.dot_dimension_numbers<[1], [0], [0], [1], [0, 0, 1, 1], [], []>} : vector<8x8xf32>, vector<8x8xf32>, vector<8x8xf32> -> vector<8x8xf32>
    %626 = vector.extract_strided_slice %475 {offsets = [16, 0], sizes = [8, 32], strides = [1, 1]} : vector<32x32xf32> to vector<8x32xf32>
    %cst_260 = arith.constant dense<0.000000e+00> : vector<8x32xf32>
    %627 = tpu.matmul %625, %626, %cst_260 {dimension_numbers = #tpu.dot_dimension_numbers<[1], [0], [0], [1], [0, 0, 1, 1], [], []>} : vector<8x8xf32>, vector<8x32xf32>, vector<8x32xf32> -> vector<8x32xf32>
    %628 = arith.addf %609, %627 : vector<8x32xf32>
    %629 = vector.extract_strided_slice %568 {offsets = [0, 24], sizes = [8, 8], strides = [1, 1]} : vector<8x32xf32> to vector<8x8xf32>
    %630 = vector.extract_strided_slice %569 {offsets = [0, 24], sizes = [8, 8], strides = [1, 1]} : vector<8x32xf32> to vector<8x8xf32>
    %cst_261 = arith.constant dense<0.000000e+00> : vector<8x8xf32>
    %631 = tpu.matmul %629, %630, %cst_261 {dimension_numbers = #tpu.dot_dimension_numbers<[1], [1], [0], [0], [0, 0, 1, 0], [], []>} : vector<8x8xf32>, vector<8x8xf32>, vector<8x8xf32> -> vector<8x8xf32>
    %cst_262 = arith.constant 0.353553385 : f32
    %632 = vector.broadcast %cst_262 : f32 to vector<8x8xf32>
    %633 = arith.mulf %631, %632 : vector<8x8xf32>
    %cst_263 = arith.constant dense<0xFF800000> : vector<8xf32>
    %634 = vector.multi_reduction <maximumf>, %633, %cst_263 [1] : vector<8x8xf32> to vector<8xf32>
    %635 = vector.shape_cast %634 : vector<8xf32> to vector<8x1xf32>
    %636 = vector.broadcast %635 : vector<8x1xf32> to vector<8x8xf32>
    %637 = arith.subf %633, %636 : vector<8x8xf32>
    %638 = math.exp %637 : vector<8x8xf32>
    %cst_264 = arith.constant dense<0.000000e+00> : vector<8xf32>
    %639 = vector.multi_reduction <add>, %638, %cst_264 [1] : vector<8x8xf32> to vector<8xf32>
    %640 = vector.shape_cast %639 : vector<8xf32> to vector<8x1xf32>
    %641 = vector.broadcast %640 : vector<8x1xf32> to vector<8x8xf32>
    %642 = arith.divf %638, %641 : vector<8x8xf32>
    %643 = vector.extract_strided_slice %570 {offsets = [0, 24], sizes = [8, 8], strides = [1, 1]} : vector<8x32xf32> to vector<8x8xf32>
    %cst_265 = arith.constant dense<0.000000e+00> : vector<8x8xf32>
    %644 = tpu.matmul %642, %643, %cst_265 {dimension_numbers = #tpu.dot_dimension_numbers<[1], [0], [0], [1], [0, 0, 1, 1], [], []>} : vector<8x8xf32>, vector<8x8xf32>, vector<8x8xf32> -> vector<8x8xf32>
    %645 = vector.extract_strided_slice %475 {offsets = [24, 0], sizes = [8, 32], strides = [1, 1]} : vector<32x32xf32> to vector<8x32xf32>
    %cst_266 = arith.constant dense<0.000000e+00> : vector<8x32xf32>
    %646 = tpu.matmul %644, %645, %cst_266 {dimension_numbers = #tpu.dot_dimension_numbers<[1], [0], [0], [1], [0, 0, 1, 1], [], []>} : vector<8x8xf32>, vector<8x32xf32>, vector<8x32xf32> -> vector<8x32xf32>
    %647 = arith.addf %628, %646 : vector<8x32xf32>
    %648 = tpu.concatenate %567, %647 in 0 : vector<8x32xf32>, vector<8x32xf32> -> vector<16x32xf32>
    %649 = vector.broadcast %476 : vector<1x32xf32> to vector<16x32xf32>
    %650 = arith.addf %648, %649 : vector<16x32xf32>
    %651 = arith.addf %650, %468 : vector<16x32xf32>
    %cst_267 = arith.constant dense<0.000000e+00> : vector<16xf32>
    %652 = vector.multi_reduction <add>, %651, %cst_267 [1] : vector<16x32xf32> to vector<16xf32>
    %653 = vector.shape_cast %652 : vector<16xf32> to vector<16x1xf32>
    %cst_268 = arith.constant 3.200000e+01 : f32
    %654 = vector.broadcast %cst_268 : f32 to vector<16x1xf32>
    %655 = arith.divf %653, %654 : vector<16x1xf32>
    %656 = vector.broadcast %655 : vector<16x1xf32> to vector<16x32xf32>
    %657 = arith.subf %651, %656 : vector<16x32xf32>
    %658 = arith.mulf %657, %657 : vector<16x32xf32>
    %cst_269 = arith.constant dense<0.000000e+00> : vector<16xf32>
    %659 = vector.multi_reduction <add>, %658, %cst_269 [1] : vector<16x32xf32> to vector<16xf32>
    %660 = vector.shape_cast %659 : vector<16xf32> to vector<16x1xf32>
    %cst_270 = arith.constant 3.200000e+01 : f32
    %661 = vector.broadcast %cst_270 : f32 to vector<16x1xf32>
    %662 = arith.divf %660, %661 : vector<16x1xf32>
    %663 = vector.broadcast %655 : vector<16x1xf32> to vector<16x32xf32>
    %664 = arith.subf %651, %663 : vector<16x32xf32>
    %cst_271 = arith.constant 9.99999996E-13 : f32
    %665 = vector.broadcast %cst_271 : f32 to vector<16x1xf32>
    %666 = arith.addf %662, %665 : vector<16x1xf32>
    %667 = math.rsqrt %666 : vector<16x1xf32>
    %668 = vector.broadcast %667 : vector<16x1xf32> to vector<16x32xf32>
    %669 = arith.mulf %664, %668 : vector<16x32xf32>
    %670 = vector.broadcast %477 : vector<1x32xf32> to vector<16x32xf32>
    %671 = arith.mulf %669, %670 : vector<16x32xf32>
    %672 = vector.broadcast %478 : vector<1x32xf32> to vector<16x32xf32>
    %673 = arith.addf %671, %672 : vector<16x32xf32>
    %c0_272 = arith.constant 0 : index
    %c0_273 = arith.constant 0 : index
    %674 = vector.load %arg42[%c0_272, %c0_273] : memref<32x64xf32, #tpu.memory_space<vmem>>, vector<32x64xf32>
    %c0_274 = arith.constant 0 : index
    %c0_275 = arith.constant 0 : index
    %675 = vector.load %arg43[%c0_274, %c0_275] : memref<1x64xf32, #tpu.memory_space<vmem>>, vector<1x64xf32>
    %c0_276 = arith.constant 0 : index
    %c0_277 = arith.constant 0 : index
    %676 = vector.load %arg44[%c0_276, %c0_277] : memref<64x32xf32, #tpu.memory_space<vmem>>, vector<64x32xf32>
    %c0_278 = arith.constant 0 : index
    %c0_279 = arith.constant 0 : index
    %677 = vector.load %arg45[%c0_278, %c0_279] : memref<1x32xf32, #tpu.memory_space<vmem>>, vector<1x32xf32>
    %c0_280 = arith.constant 0 : index
    %c0_281 = arith.constant 0 : index
    %678 = vector.load %arg46[%c0_280, %c0_281] : memref<1x32xf32, #tpu.memory_space<vmem>>, vector<1x32xf32>
    %c0_282 = arith.constant 0 : index
    %c0_283 = arith.constant 0 : index
    %679 = vector.load %arg47[%c0_282, %c0_283] : memref<1x32xf32, #tpu.memory_space<vmem>>, vector<1x32xf32>
    %cst_284 = arith.constant dense<0.000000e+00> : vector<16x64xf32>
    %680 = tpu.matmul %673, %674, %cst_284 {dimension_numbers = #tpu.dot_dimension_numbers<[1], [0], [0], [1], [0, 0, 1, 1], [], []>} : vector<16x32xf32>, vector<32x64xf32>, vector<16x64xf32> -> vector<16x64xf32>
    %681 = vector.broadcast %675 : vector<1x64xf32> to vector<16x64xf32>
    %682 = arith.addf %680, %681 : vector<16x64xf32>
    %cst_285 = arith.constant 5.000000e-01 : f32
    %683 = vector.broadcast %cst_285 : f32 to vector<16x64xf32>
    %684 = arith.mulf %683, %682 : vector<16x64xf32>
    %cst_286 = arith.constant 0.707106769 : f32
    %685 = vector.broadcast %cst_286 : f32 to vector<16x64xf32>
    %686 = arith.mulf %682, %685 : vector<16x64xf32>
    %687 = math.erf %686 : vector<16x64xf32>
    %cst_287 = arith.constant 1.000000e+00 : f32
    %688 = vector.broadcast %cst_287 : f32 to vector<16x64xf32>
    %689 = arith.addf %688, %687 : vector<16x64xf32>
    %690 = arith.mulf %684, %689 : vector<16x64xf32>
    %cst_288 = arith.constant dense<0.000000e+00> : vector<16x32xf32>
    %691 = tpu.matmul %690, %676, %cst_288 {dimension_numbers = #tpu.dot_dimension_numbers<[1], [0], [0], [1], [0, 0, 1, 1], [], []>} : vector<16x64xf32>, vector<64x32xf32>, vector<16x32xf32> -> vector<16x32xf32>
    %692 = vector.broadcast %677 : vector<1x32xf32> to vector<16x32xf32>
    %693 = arith.addf %691, %692 : vector<16x32xf32>
    %694 = arith.addf %693, %673 : vector<16x32xf32>
    %cst_289 = arith.constant dense<0.000000e+00> : vector<16xf32>
    %695 = vector.multi_reduction <add>, %694, %cst_289 [1] : vector<16x32xf32> to vector<16xf32>
    %696 = vector.shape_cast %695 : vector<16xf32> to vector<16x1xf32>
    %cst_290 = arith.constant 3.200000e+01 : f32
    %697 = vector.broadcast %cst_290 : f32 to vector<16x1xf32>
    %698 = arith.divf %696, %697 : vector<16x1xf32>
    %699 = vector.broadcast %698 : vector<16x1xf32> to vector<16x32xf32>
    %700 = arith.subf %694, %699 : vector<16x32xf32>
    %701 = arith.mulf %700, %700 : vector<16x32xf32>
    %cst_291 = arith.constant dense<0.000000e+00> : vector<16xf32>
    %702 = vector.multi_reduction <add>, %701, %cst_291 [1] : vector<16x32xf32> to vector<16xf32>
    %703 = vector.shape_cast %702 : vector<16xf32> to vector<16x1xf32>
    %cst_292 = arith.constant 3.200000e+01 : f32
    %704 = vector.broadcast %cst_292 : f32 to vector<16x1xf32>
    %705 = arith.divf %703, %704 : vector<16x1xf32>
    %706 = vector.broadcast %698 : vector<16x1xf32> to vector<16x32xf32>
    %707 = arith.subf %694, %706 : vector<16x32xf32>
    %cst_293 = arith.constant 9.99999996E-13 : f32
    %708 = vector.broadcast %cst_293 : f32 to vector<16x1xf32>
    %709 = arith.addf %705, %708 : vector<16x1xf32>
    %710 = math.rsqrt %709 : vector<16x1xf32>
    %711 = vector.broadcast %710 : vector<16x1xf32> to vector<16x32xf32>
    %712 = arith.mulf %707, %711 : vector<16x32xf32>
    %713 = vector.broadcast %678 : vector<1x32xf32> to vector<16x32xf32>
    %714 = arith.mulf %712, %713 : vector<16x32xf32>
    %715 = vector.broadcast %679 : vector<1x32xf32> to vector<16x32xf32>
    %716 = arith.addf %714, %715 : vector<16x32xf32>
    %c0_294 = arith.constant 0 : index
    %c0_295 = arith.constant 0 : index
    %717 = vector.load %arg48[%c0_294, %c0_295] : memref<32x64xf32, #tpu.memory_space<vmem>>, vector<32x64xf32>
    %c0_296 = arith.constant 0 : index
    %c0_297 = arith.constant 0 : index
    %718 = vector.load %arg49[%c0_296, %c0_297] : memref<1x64xf32, #tpu.memory_space<vmem>>, vector<1x64xf32>
    %cst_298 = arith.constant dense<0.000000e+00> : vector<16x64xf32>
    %719 = tpu.matmul %716, %717, %cst_298 {dimension_numbers = #tpu.dot_dimension_numbers<[1], [0], [0], [1], [0, 0, 1, 1], [], []>} : vector<16x32xf32>, vector<32x64xf32>, vector<16x64xf32> -> vector<16x64xf32>
    %720 = vector.broadcast %718 : vector<1x64xf32> to vector<16x64xf32>
    %721 = arith.addf %719, %720 : vector<16x64xf32>
    %cst_299 = arith.constant 5.000000e-01 : f32
    %722 = vector.broadcast %cst_299 : f32 to vector<16x64xf32>
    %723 = arith.mulf %722, %721 : vector<16x64xf32>
    %cst_300 = arith.constant 0.707106769 : f32
    %724 = vector.broadcast %cst_300 : f32 to vector<16x64xf32>
    %725 = arith.mulf %721, %724 : vector<16x64xf32>
    %726 = math.erf %725 : vector<16x64xf32>
    %cst_301 = arith.constant 1.000000e+00 : f32
    %727 = vector.broadcast %cst_301 : f32 to vector<16x64xf32>
    %728 = arith.addf %727, %726 : vector<16x64xf32>
    %729 = arith.mulf %723, %728 : vector<16x64xf32>
    %c0_302 = arith.constant 0 : index
    %c0_303 = arith.constant 0 : index
    %730 = vector.load %arg50[%c0_302, %c0_303] : memref<16x64xf32, #tpu.memory_space<vmem>>, vector<16x64xf32>
    tpu.vector_store %arg50[%c0_302, %c0_303], %729 {strides = array<i32>} : memref<16x64xf32, #tpu.memory_space<vmem>>, vector<16x64xf32>,
    return
  }
}

</mosaic_0001>

<bundles_post_ra>
// kernel: tpu_custom_call.1
= control target key start
LH: loop header
LB: loop body
LE: loop exit
PB: predicated region body
PF: predicated region fallthrough
CT: control target
= control target key end

     0   :  { %s9138_s6 = smov 1   ;;  %s9139_s10 = smov 2   ;;  %s10285_s0 = inlined_call_operand.smem [shape: u32[51], index: -1, kind: input, shape index: {}] }
   0x1   :  { %s9228_s5 = sld [smem:[%s10285_s0]]   ;;  %s9140_s14 = smov 3  }
   0x2   :  { %s9233_s9 = sld [smem:[%s10285_s0 + %s9138_s6]]   ;;  %s9141_s18 = smov 4  }
   0x3   :  { %s9238_s13 = sld [smem:[%s10285_s0 + %s9139_s10]]   ;;  %s9142_s22 = smov 5  }
   0x4   :  { %s9243_s17 = sld [smem:[%s10285_s0 + %s9140_s14]]   ;;  %s9143_s26 = smov 6  }
   0x5   :  { %s9248_s21 = sld [smem:[%s10285_s0 + %s9141_s18]]   ;;  %s9144_s30 = smov 7  }
   0x6   :  { %s9253_s25 = sld [smem:[%s10285_s0 + %s9142_s22]]   ;;  %s9145_s4 = smov 8  }
   0x7   :  { %s9258_s29 = sld [smem:[%s10285_s0 + %s9143_s26]]   ;;  %s9146_s10 = smov 9  }
   0x8   :  { %10312 = sst [smem:[#allocation52_spill]] %s9233_s9  ;;  %s9147_s15 = smov 10  }
   0x9   :  { %s9263_s3 = sld [smem:[%s10285_s0 + %s9144_s30]]   ;;  %s9148_s20 = smov 11  }
   0xa   :  { %s9268_s8 = sld [smem:[%s10285_s0 + %s9145_s4]]   ;;  %s9149_s26 = smov 12  }
   0xb   :  { %s9273_s14 = sld [smem:[%s10285_s0 + %s9146_s10]]   ;;  %s9150_s1 = smov 13  }
   0xc   :  { %s9278_s19 = sld [smem:[%s10285_s0 + %s9147_s15]]   ;;  %s9151_s7 = smov 14  }
   0xd   :  { %10313 = sst [smem:[#allocation53_spill]] %s9258_s29  ;;  %s9152_s15 = smov 15  }
   0xe   :  { %s9283_s24 = sld [smem:[%s10285_s0 + %s9148_s20]]   ;;  %s9153_s22 = smov 16  }
   0xf   :  { %s9288_s30 = sld [smem:[%s10285_s0 + %s9149_s26]]   ;;  %s9154_s28 = smov 17  }
  0x10   :  { %10314 = sst [smem:[#allocation54_spill]] %s9268_s8 }
  0x11   :  { %10315 = sst [smem:[#allocation55_spill]] %s9273_s14 }
  0x12   :  { %10316 = sst [smem:[#allocation56_spill]] %s9278_s19 }
  0x13   :  { %s9293_s6 = sld [smem:[%s10285_s0 + %s9150_s1]]  }
  0x14   :  { %s9298_s12 = sld [smem:[%s10285_s0 + %s9151_s7]]   ;;  %s9155_s7 = smov 18  }
  0x15   :  { %10317 = sst [smem:[#allocation57_spill]] %s9288_s30 }
  0x16   :  { %s9303_s20 = sld [smem:[%s10285_s0 + %s9152_s15]]   ;;  %s9156_s15 = smov 19  }
  0x17   :  { %s9308_s27 = sld [smem:[%s10285_s0 + %s9153_s22]]   ;;  %s9157_s22 = smov 20  }
  0x18   :  { %s9313_s4 = sld [smem:[%s10285_s0 + %s9154_s28]]   ;;  %s9158_s28 = smov 21  }
  0x19   :  { %10318 = sst [smem:[#allocation58_spill]] %s9293_s6 }
  0x1a   :  { %s9318_s30 = sld [smem:[%s10285_s0 + %s9155_s7]]   ;;  %s9159_s7 = smov 22  }
  0x1b   :  { %s9323_s19 = sld [smem:[%s10285_s0 + %s9156_s15]]   ;;  %s9160_s15 = smov 23  }
  0x1c   :  { %10319 = sst [smem:[#allocation59_spill]] %s9303_s20 }
  0x1d   :  { %10320 = sst [smem:[#allocation60_spill]] %s9308_s27 }
  0x1e   :  { %s9328_s27 = sld [smem:[%s10285_s0 + %s9157_s22]]   ;;  %s9161_s22 = smov 24  }
  0x1f   :  { %s9333_s8 = sld [smem:[%s10285_s0 + %s9158_s28]]   ;;  %s9162_s28 = smov 25  }
  0x20   :  { %10321 = sst [smem:[#allocation61_spill]] %s9318_s30 }
  0x21   :  { %10322 = sst [smem:[#allocation62_spill]] %s9323_s19 }
  0x22   :  { %s9338_s30 = sld [smem:[%s10285_s0 + %s9159_s7]]   ;;  %s9163_s7 = smov 26  }
  0x23   :  { %s9343_s29 = sld [smem:[%s10285_s0 + %s9160_s15]]   ;;  %s9164_s15 = smov 27  }
  0x24   :  { %10323 = sst [smem:[#allocation63_spill]] %s9328_s27 }
  0x25   :  { %s9348_s27 = sld [smem:[%s10285_s0 + %s9161_s22]]   ;;  %s9165_s22 = smov 28  }
  0x26   :  { %s9353_s9 = sld [smem:[%s10285_s0 + %s9162_s28]]   ;;  %s9166_s28 = smov 29  }
  0x27   :  { %s9368_s19 = sld [smem:[%s10285_s0 + %s9165_s22]]   ;;  %s9169_s22 = smov 32  }
  0x28   :  { %10324 = sst [smem:[#allocation64_spill]] %s9338_s30 }
  0x29   :  { %10325 = sst [smem:[#allocation65_spill]] %s9343_s29 }
  0x2a   :  { %s9358_s30 = sld [smem:[%s10285_s0 + %s9163_s7]]   ;;  %s9167_s7 = smov 30  }
  0x2b   :  { %s9363_s29 = sld [smem:[%s10285_s0 + %s9164_s15]]   ;;  %s9168_s15 = smov 31  }
  0x2c   :  { %10326 = sst [smem:[#allocation66_spill]] %s9353_s9 }
  0x2d   :  { %10328 = sst [smem:[#allocation68_spill]] %s9368_s19 }
  0x2e   :  { %s9373_s9 = sld [smem:[%s10285_s0 + %s9166_s28]]   ;;  %s9170_s28 = smov 33  }
  0x2f   :  { %s9383_s20 = sld [smem:[%s10285_s0 + %s9168_s15]]   ;;  %s9172_s15 = smov 35  }
  0x30   :  { %10327 = sst [smem:[#allocation67_spill]] %s9358_s30 }
  0x31   :  { %s9378_s30 = sld [smem:[%s10285_s0 + %s9167_s7]]   ;;  %s9171_s7 = smov 34  }
  0x32   :  { %s9388_s19 = sld [smem:[%s10285_s0 + %s9169_s22]]   ;;  %s9173_s22 = smov 36  }
  0x33   :  { %s9398_s6 = sld [smem:[%s10285_s0 + %s9171_s7]]   ;;  %s9175_s7 = smov 38  }
  0x34   :  { %10329 = sst [smem:[#allocation69_spill]] %s9373_s9 }
  0x35   :  { %10330 = sst [smem:[#allocation70_spill]] %s9383_s20 }
  0x36   :  { %s9393_s9 = sld [smem:[%s10285_s0 + %s9170_s28]]   ;;  %s9174_s28 = smov 37  }
  0x37   :  { %s9403_s20 = sld [smem:[%s10285_s0 + %s9172_s15]]   ;;  %s9176_s15 = smov 39  }
  0x38   :  { %10331 = sst [smem:[#allocation71_spill]] %s9388_s19 }
  0x39   :  { %10332 = sst [smem:[#allocation72_spill]] %s9398_s6 }
  0x3a   :  { %s9408_s19 = sld [smem:[%s10285_s0 + %s9173_s22]]   ;;  %s9177_s22 = smov 40  }
  0x3b   :  { %s9413_s14 = sld [smem:[%s10285_s0 + %s9174_s28]]   ;;  %s9178_s28 = smov 41  }
  0x3c   :  { %s9418_s6 = sld [smem:[%s10285_s0 + %s9175_s7]]   ;;  %s9179_s7 = smov 42  }
  0x3d   :  { %10333 = sst [smem:[#allocation73_spill]] %s9403_s20 }
  0x3e   :  { %s9423_s20 = sld [smem:[%s10285_s0 + %s9176_s15]]   ;;  %s9180_s15 = smov 43  }
  0x40   :  { %10334 = sst [smem:[#allocation74_spill]] %s9408_s19 }
  0x41   :  { %10335 = sst [smem:[#allocation75_spill]] %s9413_s14 }
  0x42   :  { %10336 = sst [smem:[#allocation76_spill]] %s9418_s6 }
  0x43   :  { %s9428_s19 = sld [smem:[%s10285_s0 + %s9177_s22]]   ;;  %s9181_s22 = smov 44  }
  0x44   :  { %10337 = sst [smem:[#allocation77_spill]] %s9423_s20 }
  0x45   :  { %s9433_s14 = sld [smem:[%s10285_s0 + %s9178_s28]]   ;;  %s9182_s28 = smov 45  }
  0x46   :  { %s9438_s6 = sld [smem:[%s10285_s0 + %s9179_s7]]   ;;  %s9183_s7 = smov 46  }
  0x47   :  { %s9443_s20 = sld [smem:[%s10285_s0 + %s9180_s15]]   ;;  %s9184_s15 = smov 47  }
  0x49   :  { %10338 = sst [smem:[#allocation78_spill]] %s9428_s19 }
  0x4a   :  { %s9448_s19 = sld [smem:[%s10285_s0 + %s9181_s22]]   ;;  %s9185_s22 = smov 48  }
  0x4b   :  { %10339 = sst [smem:[#allocation79_spill]] %s9433_s14 }
  0x4c   :  { %10340 = sst [smem:[#allocation80_spill]] %s9438_s6 }
  0x4d   :  { %10341 = sst [smem:[#allocation81_spill]] %s9443_s20 }
  0x4e   :  { %s9453_s14 = sld [smem:[%s10285_s0 + %s9182_s28]]   ;;  %s9186_s28 = smov 49  }
  0x4f   :  { %s9458_s6 = sld [smem:[%s10285_s0 + %s9183_s7]]   ;;  %s9187_s7 = smov 50  }
  0x50   :  { %10342 = sst [smem:[#allocation82_spill]] %s9448_s19 }
  0x51   :  { %s9463_s20 = sld [smem:[%s10285_s0 + %s9184_s15]]  }
  0x52   :  { %s9468_s19 = sld [smem:[%s10285_s0 + %s9185_s22]]  }
  0x54   :  { %10343 = sst [smem:[#allocation83_spill]] %s9453_s14 }
  0x55   :  { %10344 = sst [smem:[#allocation84_spill]] %s9458_s6 }
  0x56   :  { %s9473_s14 = sld [smem:[%s10285_s0 + %s9186_s28]]  }
  0x57   :  { %s9478_s6 = sld [smem:[%s10285_s0 + %s9187_s7]]  }
  0x58   :  { %106 = vsyncpa [#allocation3], 0 }
  0x59   :  { %107 = vsyncpa [#allocation6], 0 }
  0x5a   :  { %108 = vsyncpa [#allocation9], 0 }
  0x5b   :  { %109 = vsyncpa [#allocation12], 0 }
  0x5c   :  { %110 = vsyncpa [#allocation15], 0 }
  0x5d   :  { %111 = vsyncpa [#allocation18], 0 }
  0x5e   :  { %112 = vsyncpa [#allocation21], 0 }
  0x5f   :  { %113 = vsyncpa [#allocation24], 0 }
  0x60   :  { %114 = vsyncpa [#allocation27], 0 }
  0x61   :  { %115 = vsyncpa [#allocation30], 0 }
  0x62   :  { %116 = vsyncpa [#allocation33], 0 }
  0x63   :  { %117 = vsyncpa [#allocation36], 0 }
  0x64   :  { %118 = vsyncpa [#allocation4], 0  ;;  %s9188_s15 = smov [#allocation5]   ;;  %s9189_s0 = smov [#allocation8]  }
  0x65   :  { %s137_s16 = sshll.u32 %s9188_s15, 4  ;;  %s157_s18 = sshll.u32 %s9189_s0, 4  ;;  %s138_s16 = int_to_ptr.vmem [resolvable:$true] %s137_s16  ;;  %s158_s18 = int_to_ptr.vmem [resolvable:$true] %s157_s18 }
  0x66   :  { %s8584_s22 = scalar_lea.hbm %s9238_s13, 16 }
  0x67   :  { %p8585_p0 = scmp.ne.s32.totalorder %s9238_s13, %s8584_s22  ;;  %p8588_p1 = scmp.lt.u32.totalorder %s8584_s22, %s9238_s13 }
  0x69   :  { %p8590_p2 = pnand %p8588_p1, %p8585_p0 }
  0x6b   :  { %8593 = shalt.err (!%p8590_p2)
}
  0x6c   :  { %s8594_s23 = scalar_lea.vmem %s138_s16, 16  ;;  %s8598_s26 = scalar_lea.vmem %s138_s16, 32 }
  0x6d   :  { %p8595_p3 = scmp.ne.s32.totalorder %s138_s16, %s8594_s23  ;;  %p8599_p4 = scmp.lt.s32.totalorder %s138_s16, %s138_s16 }
  0x6e   :  { %p8600_p5 = scmp.lt.s32.totalorder %s8598_s26, %s8594_s23 }
  0x70   :  { %p8601_p6 = por %p8600_p5, %p8599_p4 }
  0x72   :  { %p8602_p7 = pnand %p8601_p6, %p8595_p3 }
  0x74   :  { %8605 = shalt.err (!%p8602_p7)
}
  0x75   :  { %140 = dma.hbm_to_vmem [thread:$0]  %s9238_s13, 16, %s138_s16, [#allocation6]  }
  0x76   :  { %s8606_s28 = scalar_lea.hbm %s9248_s21, 16 }
  0x77   :  { %p8607_p8 = scmp.ne.s32.totalorder %s9248_s21, %s8606_s28  ;;  %p8610_p9 = scmp.lt.u32.totalorder %s8606_s28, %s9248_s21 }
  0x79   :  { %p8612_p10 = pnand %p8610_p9, %p8607_p8 }
  0x7b   :  { %8615 = shalt.err (!%p8612_p10)
}
  0x7c   :  { %s8616_s1 = scalar_lea.vmem %s158_s18, 16  ;;  %s8620_s2 = scalar_lea.vmem %s158_s18, 32 }
  0x7d   :  { %p8617_p11 = scmp.ne.s32.totalorder %s158_s18, %s8616_s1  ;;  %p8621_p12 = scmp.lt.s32.totalorder %s158_s18, %s158_s18 }
  0x7e   :  { %p8622_p13 = scmp.lt.s32.totalorder %s8620_s2, %s8616_s1 }
  0x80   :  { %p8623_p0 = por %p8622_p13, %p8621_p12 }
  0x82   :  { %p8624_p1 = pnand %p8623_p0, %p8617_p11 }
  0x84   :  { %8627 = shalt.err (!%p8624_p1)
}
  0x85   :  { %160 = dma.hbm_to_vmem [thread:$0]  %s9248_s21, 16, %s158_s18, [#allocation9]  }
  0x86   :  { %s9190_s7 = smov [#allocation11]   ;;  %s9191_s10 = smov [#allocation14]  }
  0x87   :  { %s179_s13 = sshll.u32 %s9190_s7, 4  ;;  %s203_s11 = sshll.u32 %s9191_s10, 4  ;;  %s180_s13 = int_to_ptr.vmem [resolvable:$true] %s179_s13  ;;  %s204_s11 = int_to_ptr.vmem [resolvable:$true] %s203_s11 }
  0x88   :  { %s8628_s15 = scalar_lea.hbm %s9263_s3, 16 }
  0x89   :  { %p8629_p2 = scmp.ne.s32.totalorder %s9263_s3, %s8628_s15  ;;  %p8632_p3 = scmp.lt.u32.totalorder %s8628_s15, %s9263_s3 }
  0x8b   :  { %p8634_p4 = pnand %p8632_p3, %p8629_p2 }
  0x8d   :  { %8637 = shalt.err (!%p8634_p4)
}
  0x8e   :  { %s8638_s16 = scalar_lea.vmem %s180_s13, 16  ;;  %s8642_s0 = scalar_lea.vmem %s180_s13, 32 }
  0x8f   :  { %p8639_p5 = scmp.ne.s32.totalorder %s180_s13, %s8638_s16  ;;  %p8643_p6 = scmp.lt.s32.totalorder %s180_s13, %s180_s13 }
  0x90   :  { %p8644_p7 = scmp.lt.s32.totalorder %s8642_s0, %s8638_s16 }
  0x92   :  { %p8645_p8 = por %p8644_p7, %p8643_p6 }
  0x94   :  { %p8646_p9 = pnand %p8645_p8, %p8639_p5 }
  0x96   :  { %8649 = shalt.err (!%p8646_p9)
}
  0x97   :  { %182 = dma.hbm_to_vmem [thread:$0]  %s9263_s3, 16, %s180_s13, [#allocation12]  }
  0x98   :  { %s8650_s21 = scalar_lea.hbm %s9283_s24, 16 }
  0x99   :  { %p8651_p10 = scmp.ne.s32.totalorder %s9283_s24, %s8650_s21  ;;  %p8654_p11 = scmp.lt.u32.totalorder %s8650_s21, %s9283_s24 }
  0x9b   :  { %p8656_p12 = pnand %p8654_p11, %p8651_p10 }
  0x9d   :  { %8659 = shalt.err (!%p8656_p12)
}
  0x9e   :  { %s8660_s18 = scalar_lea.vmem %s204_s11, 16  ;;  %s8664_s22 = scalar_lea.vmem %s204_s11, 32 }
  0x9f   :  { %p8661_p13 = scmp.ne.s32.totalorder %s204_s11, %s8660_s18  ;;  %p8665_p0 = scmp.lt.s32.totalorder %s204_s11, %s204_s11 }
  0xa0   :  { %p8666_p1 = scmp.lt.s32.totalorder %s8664_s22, %s8660_s18 }
  0xa2   :  { %p8667_p2 = por %p8666_p1, %p8665_p0 }
  0xa4   :  { %p8668_p3 = pnand %p8667_p2, %p8661_p13 }
  0xa6   :  { %8671 = shalt.err (!%p8668_p3)
}
  0xa7   :  { %206 = dma.hbm_to_vmem [thread:$0]  %s9283_s24, 16, %s204_s11, [#allocation15]  }
  0xa8   :  { %s9192_s23 = smov [#allocation17]   ;;  %s9193_s26 = smov [#allocation20]  }
  0xa9   :  { %s225_s3 = sshll.u32 %s9192_s23, 4  ;;  %s247_s28 = sshll.u32 %s9193_s26, 4  ;;  %s226_s3 = int_to_ptr.vmem [resolvable:$true] %s225_s3  ;;  %s248_s28 = int_to_ptr.vmem [resolvable:$true] %s247_s28 }
  0xaa   :  { %s8672_s1 = scalar_lea.hbm %s9298_s12, 16 }
  0xab   :  { %p8673_p4 = scmp.ne.s32.totalorder %s9298_s12, %s8672_s1  ;;  %p8676_p5 = scmp.lt.u32.totalorder %s8672_s1, %s9298_s12 }
  0xad   :  { %p8678_p6 = pnand %p8676_p5, %p8673_p4 }
  0xaf   :  { %8681 = shalt.err (!%p8678_p6)
}
  0xb0   :  { %s8682_s2 = scalar_lea.vmem %s226_s3, 16  ;;  %s8686_s7 = scalar_lea.vmem %s226_s3, 32 }
  0xb1   :  { %p8683_p7 = scmp.ne.s32.totalorder %s226_s3, %s8682_s2  ;;  %p8687_p8 = scmp.lt.s32.totalorder %s226_s3, %s226_s3 }
  0xb2   :  { %p8688_p9 = scmp.lt.s32.totalorder %s8686_s7, %s8682_s2 }
  0xb4   :  { %p8689_p10 = por %p8688_p9, %p8687_p8 }
  0xb6   :  { %p8690_p11 = pnand %p8689_p10, %p8683_p7 }
  0xb8   :  { %8693 = shalt.err (!%p8690_p11)
}
  0xb9   :  { %228 = dma.hbm_to_vmem [thread:$0]  %s9298_s12, 16, %s226_s3, [#allocation18]  }
  0xba   :  { %s8694_s24 = scalar_lea.hbm %s9313_s4, 16 }
  0xbb   :  { %p8695_p12 = scmp.ne.s32.totalorder %s9313_s4, %s8694_s24  ;;  %p8698_p13 = scmp.lt.u32.totalorder %s8694_s24, %s9313_s4 }
  0xbd   :  { %p8700_p0 = pnand %p8698_p13, %p8695_p12 }
  0xbf   :  { %8703 = shalt.err (!%p8700_p0)
}
  0xc0   :  { %s8704_s13 = scalar_lea.vmem %s248_s28, 16  ;;  %s8708_s10 = scalar_lea.vmem %s248_s28, 32 }
  0xc1   :  { %p8705_p1 = scmp.ne.s32.totalorder %s248_s28, %s8704_s13  ;;  %p8709_p2 = scmp.lt.s32.totalorder %s248_s28, %s248_s28 }
  0xc2   :  { %p8710_p3 = scmp.lt.s32.totalorder %s8708_s10, %s8704_s13 }
  0xc4   :  { %p8711_p4 = por %p8710_p3, %p8709_p2 }
  0xc6   :  { %p8712_p5 = pnand %p8711_p4, %p8705_p1 }
  0xc8   :  { %8715 = shalt.err (!%p8712_p5)
}
  0xc9   :  { %250 = dma.hbm_to_vmem [thread:$0]  %s9313_s4, 16, %s248_s28, [#allocation21]  }
  0xca   :  { %s9194_s11 = smov [#allocation23]   ;;  %s9195_s15 = smov [#allocation26]  }
  0xcb   :  { %s271_s12 = sshll.u32 %s9194_s11, 4  ;;  %s293_s16 = sshll.u32 %s9195_s15, 4  ;;  %s272_s12 = int_to_ptr.vmem [resolvable:$true] %s271_s12  ;;  %s294_s16 = int_to_ptr.vmem [resolvable:$true] %s293_s16 }
  0xcc   :  { %s8716_s0 = scalar_lea.hbm %s9333_s8, 16 }
  0xcd   :  { %p8717_p6 = scmp.ne.s32.totalorder %s9333_s8, %s8716_s0  ;;  %p8720_p7 = scmp.lt.u32.totalorder %s8716_s0, %s9333_s8 }
  0xcf   :  { %p8722_p8 = pnand %p8720_p7, %p8717_p6 }
  0xd1   :  { %8725 = shalt.err (!%p8722_p8)
}
  0xd2   :  { %s8726_s21 = scalar_lea.vmem %s272_s12, 16  ;;  %s8730_s18 = scalar_lea.vmem %s272_s12, 32 }
  0xd3   :  { %p8727_p9 = scmp.ne.s32.totalorder %s272_s12, %s8726_s21  ;;  %p8731_p10 = scmp.lt.s32.totalorder %s272_s12, %s272_s12 }
  0xd4   :  { %p8732_p11 = scmp.lt.s32.totalorder %s8730_s18, %s8726_s21 }
  0xd6   :  { %p8733_p12 = por %p8732_p11, %p8731_p10 }
  0xd8   :  { %p8734_p13 = pnand %p8733_p12, %p8727_p9 }
  0xda   :  { %8737 = shalt.err (!%p8734_p13)
}
  0xdb   :  { %274 = dma.hbm_to_vmem [thread:$0]  %s9333_s8, 16, %s272_s12, [#allocation24]  }
  0xdc   :  { %s8738_s4 = scalar_lea.hbm %s9348_s27, 16 }
  0xdd   :  { %p8739_p0 = scmp.ne.s32.totalorder %s9348_s27, %s8738_s4  ;;  %p8742_p1 = scmp.lt.u32.totalorder %s8738_s4, %s9348_s27 }
  0xdf   :  { %p8744_p2 = pnand %p8742_p1, %p8739_p0 }
  0xe1   :  { %8747 = shalt.err (!%p8744_p2)
}
  0xe2   :  { %s8748_s22 = scalar_lea.vmem %s294_s16, 16  ;;  %s8752_s23 = scalar_lea.vmem %s294_s16, 32 }
  0xe3   :  { %p8749_p3 = scmp.ne.s32.totalorder %s294_s16, %s8748_s22  ;;  %p8753_p4 = scmp.lt.s32.totalorder %s294_s16, %s294_s16 }
  0xe4   :  { %p8754_p5 = scmp.lt.s32.totalorder %s8752_s23, %s8748_s22 }
  0xe6   :  { %p8755_p6 = por %p8754_p5, %p8753_p4 }
  0xe8   :  { %p8756_p7 = pnand %p8755_p6, %p8749_p3 }
  0xea   :  { %8759 = shalt.err (!%p8756_p7)
}
  0xeb   :  { %296 = dma.hbm_to_vmem [thread:$0]  %s9348_s27, 16, %s294_s16, [#allocation27]  }
  0xec   :  { %s9196_s3 = smov [#allocation29]   ;;  %s9197_s26 = smov [#allocation32]  }
  0xed   :  { %s315_s8 = sshll.u32 %s9196_s3, 4  ;;  %s337_s28 = sshll.u32 %s9197_s26, 4  ;;  %s316_s8 = int_to_ptr.vmem [resolvable:$true] %s315_s8  ;;  %s338_s28 = int_to_ptr.vmem [resolvable:$true] %s337_s28 }
  0xee   :  { %s8760_s1 = scalar_lea.hbm %s9363_s29, 16 }
  0xef   :  { %p8761_p8 = scmp.ne.s32.totalorder %s9363_s29, %s8760_s1  ;;  %p8764_p9 = scmp.lt.u32.totalorder %s8760_s1, %s9363_s29 }
  0xf1   :  { %p8766_p10 = pnand %p8764_p9, %p8761_p8 }
  0xf3   :  { %8769 = shalt.err (!%p8766_p10)
}
  0xf4   :  { %s8770_s2 = scalar_lea.vmem %s316_s8, 16  ;;  %s8774_s7 = scalar_lea.vmem %s316_s8, 32 }
  0xf5   :  { %p8771_p11 = scmp.ne.s32.totalorder %s316_s8, %s8770_s2  ;;  %p8775_p12 = scmp.lt.s32.totalorder %s316_s8, %s316_s8 }
  0xf6   :  { %p8776_p13 = scmp.lt.s32.totalorder %s8774_s7, %s8770_s2 }
  0xf8   :  { %p8777_p0 = por %p8776_p13, %p8775_p12 }
  0xfa   :  { %p8778_p1 = pnand %p8777_p0, %p8771_p11 }
  0xfc   :  { %8781 = shalt.err (!%p8778_p1)
}
  0xfd   :  { %318 = dma.hbm_to_vmem [thread:$0]  %s9363_s29, 16, %s316_s8, [#allocation30]  }
  0xfe   :  { %s8782_s27 = scalar_lea.hbm %s9378_s30, 16 }
  0xff   :  { %p8783_p2 = scmp.ne.s32.totalorder %s9378_s30, %s8782_s27  ;;  %p8786_p3 = scmp.lt.u32.totalorder %s8782_s27, %s9378_s30 }
 0x101   :  { %p8788_p4 = pnand %p8786_p3, %p8783_p2 }
 0x103   :  { %8791 = shalt.err (!%p8788_p4)
}
 0x104   :  { %s8792_s24 = scalar_lea.vmem %s338_s28, 16  ;;  %s8796_s13 = scalar_lea.vmem %s338_s28, 32 }
 0x105   :  { %p8793_p5 = scmp.ne.s32.totalorder %s338_s28, %s8792_s24  ;;  %p8797_p6 = scmp.lt.s32.totalorder %s338_s28, %s338_s28 }
 0x106   :  { %p8798_p7 = scmp.lt.s32.totalorder %s8796_s13, %s8792_s24 }
 0x108   :  { %p8799_p8 = por %p8798_p7, %p8797_p6 }
 0x10a   :  { %p8800_p9 = pnand %p8799_p8, %p8793_p5 }
 0x10c   :  { %8803 = shalt.err (!%p8800_p9)
}
 0x10d   :  { %340 = dma.hbm_to_vmem [thread:$0]  %s9378_s30, 16, %s338_s28, [#allocation33]  }
 0x10e   :  { %s9198_s10 = smov [#allocation35]   ;;  %s9199_s11 = smov [#allocation2]  }
 0x10f   :  { %s359_s29 = sshll.u32 %s9198_s10, 4  ;;  %s125_s12 = sshll.u32 %s9199_s11, 4  ;;  %s360_s29 = int_to_ptr.vmem [resolvable:$true] %s359_s29  ;;  %s126_s12 = int_to_ptr.vmem [resolvable:$true] %s125_s12 }
 0x110   :  { %s8804_s15 = scalar_lea.hbm %s9393_s9, 16 }
 0x111   :  { %p8805_p10 = scmp.ne.s32.totalorder %s9393_s9, %s8804_s15  ;;  %p8808_p11 = scmp.lt.u32.totalorder %s8804_s15, %s9393_s9 }
 0x113   :  { %p8810_p12 = pnand %p8808_p11, %p8805_p10 }
 0x115   :  { %8813 = shalt.err (!%p8810_p12)
}
 0x116   :  { %s8814_s16 = scalar_lea.vmem %s360_s29, 16  ;;  %s8818_s0 = scalar_lea.vmem %s360_s29, 32 }
 0x117   :  { %p8815_p13 = scmp.ne.s32.totalorder %s360_s29, %s8814_s16  ;;  %p8819_p0 = scmp.lt.s32.totalorder %s360_s29, %s360_s29 }
 0x118   :  { %p8820_p1 = scmp.lt.s32.totalorder %s8818_s0, %s8814_s16 }
 0x11a   :  { %p8821_p2 = por %p8820_p1, %p8819_p0 }
 0x11c   :  { %p8822_p3 = pnand %p8821_p2, %p8815_p13 }
 0x11e   :  { %8825 = shalt.err (!%p8822_p3)
}
 0x11f   :  { %362 = dma.hbm_to_vmem [thread:$0]  %s9393_s9, 16, %s360_s29, [#allocation36]  }
 0x120   :  { %s8826_s30 = scalar_lea.hbm %s9228_s5, 32 }
 0x121   :  { %p8827_p4 = scmp.ne.s32.totalorder %s9228_s5, %s8826_s30  ;;  %p8830_p5 = scmp.lt.u32.totalorder %s8826_s30, %s9228_s5 }
 0x123   :  { %p8832_p6 = pnand %p8830_p5, %p8827_p4 }
 0x125   :  { %8835 = shalt.err (!%p8832_p6)
}
 0x126   :  { %s8836_s21 = scalar_lea.vmem %s126_s12, 32  ;;  %p8841_p8 = scmp.lt.s32.totalorder %s126_s12, %s126_s12 }
 0x127   :  { %p8837_p7 = scmp.ne.s32.totalorder %s126_s12, %s8836_s21  ;;  %p8842_p9 = scmp.lt.s32.totalorder %s8836_s21, %s8836_s21 }
 0x129   :  { %p8843_p10 = por %p8842_p9, %p8841_p8 }
 0x12b   :  { %p8844_p11 = pnand %p8843_p10, %p8837_p7 }
 0x12d   :  { %8847 = shalt.err (!%p8844_p11)
}
 0x12e   :  { %128 = dma.hbm_to_vmem [thread:$0]  %s9228_s5, 32, %s126_s12, [#allocation3]  }
 0x12f   :  { %s9200_s18 = smov [#allocation7]   ;;  %s9201_s9 = smov [#allocation10]  }
 0x130   :  { %s147_s4 = sshll.u32 %s9200_s18, 4  ;;  %s167_s22 = sshll.u32 %s9201_s9, 4  ;;  %s148_s4 = int_to_ptr.vmem [resolvable:$true] %s147_s4  ;;  %s168_s22 = int_to_ptr.vmem [resolvable:$true] %s167_s22 }
 0x131   :  { %s8848_s23 = scalar_lea.hbm %s9243_s17, 128 }
 0x132   :  { %p8849_p12 = scmp.ne.s32.totalorder %s9243_s17, %s8848_s23  ;;  %p8852_p13 = scmp.lt.u32.totalorder %s8848_s23, %s9243_s17 }
 0x134   :  { %p8854_p0 = pnand %p8852_p13, %p8849_p12 }
 0x136   :  { %8857 = shalt.err (!%p8854_p0)
}
 0x137   :  { %s8858_s3 = scalar_lea.vmem %s148_s4, 128  ;;  %p8863_p2 = scmp.lt.s32.totalorder %s148_s4, %s148_s4 }
 0x138   :  { %p8859_p1 = scmp.ne.s32.totalorder %s148_s4, %s8858_s3  ;;  %p8864_p3 = scmp.lt.s32.totalorder %s8858_s3, %s8858_s3 }
 0x13a   :  { %p8865_p4 = por %p8864_p3, %p8863_p2 }
 0x13c   :  { %p8866_p5 = pnand %p8865_p4, %p8859_p1 }
 0x13e   :  { %8869 = shalt.err (!%p8866_p5)
}
 0x13f   :  { %150 = dma.hbm_to_vmem [thread:$0]  %s9243_s17, 128, %s148_s4, [#allocation6]  }
 0x140   :  { %s8870_s5 = scalar_lea.hbm %s9253_s25, 16 }
 0x141   :  { %p8871_p6 = scmp.ne.s32.totalorder %s9253_s25, %s8870_s5  ;;  %p8874_p7 = scmp.lt.u32.totalorder %s8870_s5, %s9253_s25 }
 0x143   :  { %p8876_p8 = pnand %p8874_p7, %p8871_p6 }
 0x145   :  { %8879 = shalt.err (!%p8876_p8)
}
 0x146   :  { %s8880_s8 = scalar_lea.vmem %s168_s22, 16  ;;  %s8884_s26 = scalar_lea.vmem %s168_s22, 32 }
 0x147   :  { %p8881_p9 = scmp.ne.s32.totalorder %s168_s22, %s8880_s8  ;;  %p8885_p10 = scmp.lt.s32.totalorder %s168_s22, %s168_s22 }
 0x148   :  { %p8886_p11 = scmp.lt.s32.totalorder %s8884_s26, %s8880_s8 }
 0x14a   :  { %p8887_p12 = por %p8886_p11, %p8885_p10 }
 0x14c   :  { %p8888_p13 = pnand %p8887_p12, %p8881_p9 }
 0x14e   :  { %8891 = shalt.err (!%p8888_p13)
}
 0x14f   :  { %s10345_s28 = sld [smem:[#allocation55_spill]]  ;;  %s9202_s1 = smov [#allocation13]  }
 0x150   :  { %170 = dma.hbm_to_vmem [thread:$0]  %s9253_s25, 16, %s168_s22, [#allocation9]  }
 0x151   :  { %s191_s17 = sshll.u32 %s9202_s1, 4  ;;  %s9203_s2 = smov [#allocation16]   ;;  %s192_s17 = int_to_ptr.vmem [resolvable:$true] %s191_s17 }
 0x152   :  { %s215_s7 = sshll.u32 %s9203_s2, 4  ;;  %s216_s7 = int_to_ptr.vmem [resolvable:$true] %s215_s7 }
 0x155   :  { %s8892_s27 = scalar_lea.hbm %s10345_s28, 16 }
 0x156   :  { %p8893_p0 = scmp.ne.s32.totalorder %s10345_s28, %s8892_s27  ;;  %p8896_p1 = scmp.lt.u32.totalorder %s8892_s27, %s10345_s28 }
 0x158   :  { %p8898_p2 = pnand %p8896_p1, %p8893_p0 }
 0x15a   :  { %8901 = shalt.err (!%p8898_p2)
}
 0x15b   :  { %s8902_s24 = scalar_lea.vmem %s192_s17, 16  ;;  %s8906_s13 = scalar_lea.vmem %s192_s17, 32 }
 0x15c   :  { %p8903_p3 = scmp.ne.s32.totalorder %s192_s17, %s8902_s24  ;;  %p8907_p4 = scmp.lt.s32.totalorder %s192_s17, %s192_s17 }
 0x15d   :  { %p8908_p5 = scmp.lt.s32.totalorder %s8906_s13, %s8902_s24 }
 0x15f   :  { %p8909_p6 = por %p8908_p5, %p8907_p4 }
 0x161   :  { %p8910_p7 = pnand %p8909_p6, %p8903_p3 }
 0x163   :  { %8913 = shalt.err (!%p8910_p7)
}
 0x164   :  { %s10346_s25 = sld [smem:[#allocation58_spill]] }
 0x165   :  { %194 = dma.hbm_to_vmem [thread:$0]  %s10345_s28, 16, %s192_s17, [#allocation12]  }
 0x16a   :  { %s8914_s10 = scalar_lea.hbm %s10346_s25, 16 }
 0x16b   :  { %p8915_p8 = scmp.ne.s32.totalorder %s10346_s25, %s8914_s10  ;;  %p8918_p9 = scmp.lt.u32.totalorder %s8914_s10, %s10346_s25 }
 0x16d   :  { %p8920_p10 = pnand %p8918_p9, %p8915_p8 }
 0x16f   :  { %8923 = shalt.err (!%p8920_p10)
}
 0x170   :  { %s8924_s29 = scalar_lea.vmem %s216_s7, 16  ;;  %s8928_s11 = scalar_lea.vmem %s216_s7, 32 }
 0x171   :  { %p8925_p11 = scmp.ne.s32.totalorder %s216_s7, %s8924_s29  ;;  %p8929_p12 = scmp.lt.s32.totalorder %s216_s7, %s216_s7 }
 0x172   :  { %p8930_p13 = scmp.lt.s32.totalorder %s8928_s11, %s8924_s29 }
 0x174   :  { %p8931_p0 = por %p8930_p13, %p8929_p12 }
 0x176   :  { %p8932_p1 = pnand %p8931_p0, %p8925_p11 }
 0x178   :  { %8935 = shalt.err (!%p8932_p1)
}
 0x179   :  { %s10347_s12 = sld [smem:[#allocation59_spill]]  ;;  %s9204_s15 = smov [#allocation19]  }
 0x17a   :  { %218 = dma.hbm_to_vmem [thread:$0]  %s10346_s25, 16, %s216_s7, [#allocation15]  }
 0x17b   :  { %s235_s16 = sshll.u32 %s9204_s15, 4  ;;  %s9205_s0 = smov [#allocation22]   ;;  %s236_s16 = int_to_ptr.vmem [resolvable:$true] %s235_s16 }
 0x17c   :  { %s259_s30 = sshll.u32 %s9205_s0, 4  ;;  %s260_s30 = int_to_ptr.vmem [resolvable:$true] %s259_s30 }
 0x17f   :  { %s8936_s21 = scalar_lea.hbm %s10347_s12, 16 }
 0x180   :  { %p8937_p2 = scmp.ne.s32.totalorder %s10347_s12, %s8936_s21  ;;  %p8940_p3 = scmp.lt.u32.totalorder %s8936_s21, %s10347_s12 }
 0x182   :  { %p8942_p4 = pnand %p8940_p3, %p8937_p2 }
 0x184   :  { %8945 = shalt.err (!%p8942_p4)
}
 0x185   :  { %s8946_s18 = scalar_lea.vmem %s236_s16, 16  ;;  %s8950_s4 = scalar_lea.vmem %s236_s16, 32 }
 0x186   :  { %p8947_p5 = scmp.ne.s32.totalorder %s236_s16, %s8946_s18  ;;  %p8951_p6 = scmp.lt.s32.totalorder %s236_s16, %s236_s16 }
 0x187   :  { %p8952_p7 = scmp.lt.s32.totalorder %s8950_s4, %s8946_s18 }
 0x189   :  { %p8953_p8 = por %p8952_p7, %p8951_p6 }
 0x18b   :  { %p8954_p9 = pnand %p8953_p8, %p8947_p5 }
 0x18d   :  { %8957 = shalt.err (!%p8954_p9)
}
 0x18e   :  { %s10348_s9 = sld [smem:[#allocation62_spill]] }
 0x18f   :  { %238 = dma.hbm_to_vmem [thread:$0]  %s10347_s12, 16, %s236_s16, [#allocation18]  }
 0x194   :  { %s8958_s22 = scalar_lea.hbm %s10348_s9, 16 }
 0x195   :  { %p8959_p10 = scmp.ne.s32.totalorder %s10348_s9, %s8958_s22  ;;  %p8962_p11 = scmp.lt.u32.totalorder %s8958_s22, %s10348_s9 }
 0x197   :  { %p8964_p12 = pnand %p8962_p11, %p8959_p10 }
 0x199   :  { %8967 = shalt.err (!%p8964_p12)
}
 0x19a   :  { %s8968_s23 = scalar_lea.vmem %s260_s30, 16  ;;  %s8972_s3 = scalar_lea.vmem %s260_s30, 32 }
 0x19b   :  { %p8969_p13 = scmp.ne.s32.totalorder %s260_s30, %s8968_s23  ;;  %p8973_p0 = scmp.lt.s32.totalorder %s260_s30, %s260_s30 }
 0x19c   :  { %p8974_p1 = scmp.lt.s32.totalorder %s8972_s3, %s8968_s23 }
 0x19e   :  { %p8975_p2 = por %p8974_p1, %p8973_p0 }
 0x1a0   :  { %p8976_p3 = pnand %p8975_p2, %p8969_p13 }
 0x1a2   :  { %8979 = shalt.err (!%p8976_p3)
}
 0x1a3   :  { %s10349_s5 = sld [smem:[#allocation65_spill]]  ;;  %s9206_s8 = smov [#allocation25]  }
 0x1a4   :  { %262 = dma.hbm_to_vmem [thread:$0]  %s10348_s9, 16, %s260_s30, [#allocation21]  }
 0x1a5   :  { %s283_s26 = sshll.u32 %s9206_s8, 4  ;;  %s9207_s28 = smov [#allocation28]   ;;  %s284_s26 = int_to_ptr.vmem [resolvable:$true] %s283_s26 }
 0x1a6   :  { %s303_s1 = sshll.u32 %s9207_s28, 4  ;;  %s304_s1 = int_to_ptr.vmem [resolvable:$true] %s303_s1 }
 0x1a9   :  { %s8980_s17 = scalar_lea.hbm %s10349_s5, 16 }
 0x1aa   :  { %p8981_p4 = scmp.ne.s32.totalorder %s10349_s5, %s8980_s17  ;;  %p8984_p5 = scmp.lt.u32.totalorder %s8980_s17, %s10349_s5 }
 0x1ac   :  { %p8986_p6 = pnand %p8984_p5, %p8981_p4 }
 0x1ae   :  { %8989 = shalt.err (!%p8986_p6)
}
 0x1af   :  { %s8990_s2 = scalar_lea.vmem %s284_s26, 16  ;;  %s8994_s7 = scalar_lea.vmem %s284_s26, 32 }
 0x1b0   :  { %p8991_p7 = scmp.ne.s32.totalorder %s284_s26, %s8990_s2  ;;  %p8995_p8 = scmp.lt.s32.totalorder %s284_s26, %s284_s26 }
 0x1b1   :  { %p8996_p9 = scmp.lt.s32.totalorder %s8994_s7, %s8990_s2 }
 0x1b3   :  { %p8997_p10 = por %p8996_p9, %p8995_p8 }
 0x1b5   :  { %p8998_p11 = pnand %p8997_p10, %p8991_p7 }
 0x1b7   :  { %9001 = shalt.err (!%p8998_p11)
}
 0x1b8   :  { %s10350_s27 = sld [smem:[#allocation66_spill]] }
 0x1b9   :  { %286 = dma.hbm_to_vmem [thread:$0]  %s10349_s5, 16, %s284_s26, [#allocation24]  }
 0x1be   :  { %s9002_s24 = scalar_lea.hbm %s10350_s27, 16 }
 0x1bf   :  { %p9003_p12 = scmp.ne.s32.totalorder %s10350_s27, %s9002_s24  ;;  %p9006_p13 = scmp.lt.u32.totalorder %s9002_s24, %s10350_s27 }
 0x1c1   :  { %p9008_p0 = pnand %p9006_p13, %p9003_p12 }
 0x1c3   :  { %9011 = shalt.err (!%p9008_p0)
}
 0x1c4   :  { %s9012_s13 = scalar_lea.vmem %s304_s1, 16  ;;  %s9016_s25 = scalar_lea.vmem %s304_s1, 32 }
 0x1c5   :  { %p9013_p1 = scmp.ne.s32.totalorder %s304_s1, %s9012_s13  ;;  %p9017_p2 = scmp.lt.s32.totalorder %s304_s1, %s304_s1 }
 0x1c6   :  { %p9018_p3 = scmp.lt.s32.totalorder %s9016_s25, %s9012_s13 }
 0x1c8   :  { %p9019_p4 = por %p9018_p3, %p9017_p2 }
 0x1ca   :  { %p9020_p5 = pnand %p9019_p4, %p9013_p1 }
 0x1cc   :  { %9023 = shalt.err (!%p9020_p5)
}
 0x1cd   :  { %s10351_s10 = sld [smem:[#allocation69_spill]]  ;;  %s9208_s29 = smov [#allocation31]  }
 0x1ce   :  { %306 = dma.hbm_to_vmem [thread:$0]  %s10350_s27, 16, %s304_s1, [#allocation27]  }
 0x1cf   :  { %s327_s11 = sshll.u32 %s9208_s29, 4  ;;  %s9209_s12 = smov [#allocation34]   ;;  %s328_s11 = int_to_ptr.vmem [resolvable:$true] %s327_s11 }
 0x1d0   :  { %s347_s15 = sshll.u32 %s9209_s12, 4  ;;  %s348_s15 = int_to_ptr.vmem [resolvable:$true] %s347_s15 }
 0x1d3   :  { %s9024_s16 = scalar_lea.hbm %s10351_s10, 16 }
 0x1d4   :  { %p9025_p6 = scmp.ne.s32.totalorder %s10351_s10, %s9024_s16  ;;  %p9028_p7 = scmp.lt.u32.totalorder %s9024_s16, %s10351_s10 }
 0x1d6   :  { %p9030_p8 = pnand %p9028_p7, %p9025_p6 }
 0x1d8   :  { %9033 = shalt.err (!%p9030_p8)
}
 0x1d9   :  { %s9034_s0 = scalar_lea.vmem %s328_s11, 16  ;;  %s9038_s30 = scalar_lea.vmem %s328_s11, 32 }
 0x1da   :  { %p9035_p9 = scmp.ne.s32.totalorder %s328_s11, %s9034_s0  ;;  %p9039_p10 = scmp.lt.s32.totalorder %s328_s11, %s328_s11 }
 0x1db   :  { %p9040_p11 = scmp.lt.s32.totalorder %s9038_s30, %s9034_s0 }
 0x1dd   :  { %p9041_p12 = por %p9040_p11, %p9039_p10 }
 0x1df   :  { %p9042_p13 = pnand %p9041_p12, %p9035_p9 }
 0x1e1   :  { %9045 = shalt.err (!%p9042_p13)
}
 0x1e2   :  { %s10352_s21 = sld [smem:[#allocation70_spill]] }
 0x1e3   :  { %330 = dma.hbm_to_vmem [thread:$0]  %s10351_s10, 16, %s328_s11, [#allocation30]  }
 0x1e8   :  { %s9046_s18 = scalar_lea.hbm %s10352_s21, 16 }
 0x1e9   :  { %p9047_p0 = scmp.ne.s32.totalorder %s10352_s21, %s9046_s18  ;;  %p9050_p1 = scmp.lt.u32.totalorder %s9046_s18, %s10352_s21 }
 0x1eb   :  { %p9052_p2 = pnand %p9050_p1, %p9047_p0 }
 0x1ed   :  { %9055 = shalt.err (!%p9052_p2)
}
 0x1ee   :  { %s9056_s4 = scalar_lea.vmem %s348_s15, 16  ;;  %s9060_s9 = scalar_lea.vmem %s348_s15, 32 }
 0x1ef   :  { %p9057_p3 = scmp.ne.s32.totalorder %s348_s15, %s9056_s4  ;;  %p9061_p4 = scmp.lt.s32.totalorder %s348_s15, %s348_s15 }
 0x1f0   :  { %p9062_p5 = scmp.lt.s32.totalorder %s9060_s9, %s9056_s4 }
 0x1f2   :  { %p9063_p6 = por %p9062_p5, %p9061_p4 }
 0x1f4   :  { %p9064_p7 = pnand %p9063_p6, %p9057_p3 }
 0x1f6   :  { %9067 = shalt.err (!%p9064_p7)
}
 0x1f7   :  { %s10353_s22 = sld [smem:[#allocation73_spill]]  ;;  %s9210_s23 = smov [#allocation37]  }
 0x1f8   :  { %350 = dma.hbm_to_vmem [thread:$0]  %s10352_s21, 16, %s348_s15, [#allocation33]  }
 0x1f9   :  { %s371_s3 = sshll.u32 %s9210_s23, 4  ;;  %s372_s3 = int_to_ptr.vmem [resolvable:$true] %s371_s3 }
 0x1fd   :  { %s9068_s5 = scalar_lea.hbm %s10353_s22, 16 }
 0x1fe   :  { %p9069_p8 = scmp.ne.s32.totalorder %s10353_s22, %s9068_s5  ;;  %p9072_p9 = scmp.lt.u32.totalorder %s9068_s5, %s10353_s22 }
 0x200   :  { %p9074_p10 = pnand %p9072_p9, %p9069_p8 }
 0x202   :  { %9077 = shalt.err (!%p9074_p10)
}
 0x203   :  { %s9078_s8 = scalar_lea.vmem %s372_s3, 16  ;;  %s9082_s26 = scalar_lea.vmem %s372_s3, 32 }
 0x204   :  { %p9079_p11 = scmp.ne.s32.totalorder %s372_s3, %s9078_s8  ;;  %p9083_p12 = scmp.lt.s32.totalorder %s372_s3, %s372_s3 }
 0x205   :  { %p9084_p13 = scmp.lt.s32.totalorder %s9082_s26, %s9078_s8 }
 0x207   :  { %p9085_p0 = por %p9084_p13, %p9083_p12 }
 0x209   :  { %p9086_p1 = pnand %p9085_p0, %p9079_p11 }
 0x20b   :  { %9089 = shalt.err (!%p9086_p1)
}
 0x20c   :  { %374 = dma.hbm_to_vmem [thread:$0]  %s10353_s22, 16, %s372_s3, [#allocation36]  }
 0x20d   :  { %9112 = dma.done.wait [#allocation3], 32  }
 0x20e   :  { %9113 = vsyncadd [#allocation3], 4294967264 }
 0x20f   :  { %9114 = dma.done.wait [#allocation6], 144  }
 0x210   :  { %9115 = vsyncadd [#allocation6], 4294967152 }
 0x211   :  { %9116 = dma.done.wait [#allocation9], 32  }
 0x212   :  { %9117 = vsyncadd [#allocation9], 4294967264 }
 0x213   :  { %9118 = dma.done.wait [#allocation12], 32  }
 0x214   :  { %9119 = vsyncadd [#allocation12], 4294967264 }
 0x215   :  { %9120 = dma.done.wait [#allocation15], 32  }
 0x216   :  { %9121 = vsyncadd [#allocation15], 4294967264 }
 0x217   :  { %9122 = dma.done.wait [#allocation18], 32  }
 0x218   :  { %9123 = vsyncadd [#allocation18], 4294967264 }
 0x219   :  { %9124 = dma.done.wait [#allocation21], 32  }
 0x21a   :  { %9125 = vsyncadd [#allocation21], 4294967264 }
 0x21b   :  { %9126 = dma.done.wait [#allocation24], 32  }
 0x21c   :  { %9127 = vsyncadd [#allocation24], 4294967264 }
 0x21d   :  { %9128 = dma.done.wait [#allocation27], 32  }
 0x21e   :  { %9129 = vsyncadd [#allocation27], 4294967264 }
 0x21f   :  { %9130 = dma.done.wait [#allocation30], 32  }
 0x220   :  { %9131 = vsyncadd [#allocation30], 4294967264 }
 0x221   :  { %9132 = dma.done.wait [#allocation33], 32  }
 0x222   :  { %9133 = vsyncadd [#allocation33], 4294967264 }
 0x223   :  { %9134 = dma.done.wait [#allocation36], 32  }
 0x224   :  { %9135 = vsyncadd [#allocation36], 4294967264  ;;  %s10354_s28 = sld [smem:[#allocation52_spill]]  ;;  %vm487_vm0 = vcmask 261120   ;;  %v478_v0 = vld [vmem:[#allocation7] sm:$0xff]  ;;  %s10355_s1 = sld [smem:[#allocation53_spill]] }
 0x225   :  { %v561_v1 = vsel %vm487_vm0, %v478_v0, 0.0  ;;  %s10356_s17 = sld [smem:[#allocation54_spill]]  ;;  %v9211_v10 = vmov 0.0|0.0   ;;  %vm9212_vm1 = vmmov 0   ;;  %v9213_v20 = vmov 0.0   ;;  %s10357_s2 = sld [smem:[#allocation56_spill]] }
 0x226   :  { %562 = vadd.xlane.f32.xlu0 %v561_v1  ;;  %8236 = vmatprep.subr.bf16.mxu0 %v9211_v10  ;;  %v472_v21 = vld [vmem:[#allocation2] sm:$0x3]  ;;  %v7357_v35 = vld [vmem:[#allocation8] ss:$0 sm:$0xff]  ;;  %v7358_v37 = vld [vmem:[#allocation10] ss:$0 sm:$0xff] }
 0x227   :  { %7735 = vmatprep.mubr.msk.f32.mxu0 %vm9212_vm1, %v9213_v20  ;;  %v7359_v45 = vld [vmem:[#allocation11] ss:$0 sm:$0xff]  ;;  %v7362_v46 = vld [vmem:[#allocation13] ss:$0 sm:$0xff]  ;;  %vm857_vm2 = vcmask 64512   ;;  %s9214_s7 = smov 120  }
 0x228   :  { %v7365_v55 = vld [vmem:[#allocation14] ss:$0 sm:$0xff]  ;;  %s9215_s27 = smov 112   ;;  %s10358_s24 = sld [smem:[#allocation57_spill]]  ;;  %vm2937_vm3 = vcmask 392192   ;;  %vm3106_vm4 = vcmask 1040384  }
 0x229   :  { %s9216_s13 = smov 104   ;;  %s10359_s25 = sld [smem:[#allocation61_spill]]  ;;  %vm3102_vm5 = vcmask 7168   ;;  %vm4572_vm6 = vcmask 523264  }
 0x22a   :  { %v473_v7 = vld [vmem:[%s10354_s28] sm:$0xff]  ;;  %v474_v8 = vld [vmem:[%s10354_s28 + $0x8] sm:$0xff]  ;;  %v475_v11 = vld [vmem:[%s10354_s28 + $0x10] sm:$0xff]  ;;  %s10360_s10 = sld [smem:[#allocation60_spill]]  ;;  %s10361_s29 = sld [smem:[#allocation63_spill]] }
 0x22b   :  { %v8237_v9 = vpack.c.bf16 %v474_v8, %v473_v7  ;;  %v476_v12 = vld [vmem:[%s10354_s28 + $0x18] sm:$0xff]  ;;  %v589_v14 = vld [vmem:[%s10355_s1] sm:$0xff]  ;;  %v590_v15 = vld [vmem:[%s10355_s1 + $0x8] sm:$0xff]  ;;  %s10362_s11 = sld [smem:[#allocation64_spill]]  ;;  %s10363_s12 = sld [smem:[#allocation67_spill]] }
 0x22c   :  { %v8240_v13 = vpack.c.bf16 %v476_v12, %v475_v11  ;;  %v8242_v16 = vpack.c.bf16 %v590_v15, %v589_v14  ;;  %v594_v17 = vld [vmem:[%s10356_s17] sm:$0xff]  ;;  %v595_v18 = vld [vmem:[%s10356_s17 + $0x8] sm:$0xff]  ;;  %v591_v22 = vld [vmem:[%s10355_s1 + $0x10] sm:$0xff]  ;;  %s10364_s15 = sld [smem:[#allocation68_spill]]  ;;  %s10365_s16 = sld [smem:[#allocation71_spill]] }
 0x22d   :  { %8238 = vmatpush3.bf16.msra.mxu0 %v8237_v9  ;;  %v8250_v19 = vpack.c.bf16 %v595_v18, %v594_v17  ;;  %v592_v23 = vld [vmem:[%s10355_s1 + $0x18] sm:$0xff]  ;;  %v596_v25 = vld [vmem:[%s10356_s17 + $0x10] sm:$0xff]  ;;  %v599_v28 = vld [vmem:[%s10357_s2] sm:$0xff]  ;;  %s10366_s0 = sld [smem:[#allocation74_spill]]  ;;  %s10367_s30 = sld [smem:[#allocation72_spill]] }
 0x22e   :  { %8239 = vmatprep.subr.bf16.mxu0 %v9211_v10  ;;  %8243 = vmatprep.subr.bf16.mxu1 %v8242_v16  ;;  %v8246_v24 = vpack.c.bf16 %v592_v23, %v591_v22  ;;  %v597_v26 = vld [vmem:[%s10356_s17 + $0x18] sm:$0xff]  ;;  %v600_v29 = vld [vmem:[%s10357_s2 + $0x8] sm:$0xff]  ;;  %v601_v39 = vld [vmem:[%s10357_s2 + $0x10] sm:$0xff]  ;;  %s10368_s21 = sld [smem:[#allocation75_spill]]  ;;  %s10369_s18 = sld [smem:[#allocation76_spill]] }
 0x22f   :  { %8245 = vmatpush3.bf16.msra.mxu1 %v8242_v16  ;;  %v8254_v27 = vpack.c.bf16 %v597_v26, %v596_v25  ;;  %v8258_v30 = vpack.c.bf16 %v600_v29, %v599_v28  ;;  %v602_v40 = vld [vmem:[%s10357_s2 + $0x18] sm:$0xff]  ;;  %v9667_v26 = vld [vmem:[%s10358_s24] sm:$0xff]  ;;  %s10370_s4 = sld [smem:[#allocation77_spill]]  ;;  %s10371_s9 = sld [smem:[#allocation78_spill]] }
 0x230   :  { %8247 = vmatprep.subr.bf16.mxu1 %v8246_v24  ;;  %v8262_v42 = vpack.c.bf16 %v602_v40, %v601_v39  ;;  %s10372_s22 = sld [smem:[#allocation79_spill]]  ;;  %s10373_s23 = sld [smem:[#allocation80_spill]] }
 0x231   :  { %8241 = vmatpush3.bf16.msra.mxu0 %v8240_v13  ;;  %s10374_s3 = sld [smem:[#allocation82_spill]]  ;;  %s10375_s5 = sld [smem:[#allocation81_spill]] }
 0x232   :  { %8251 = vmatprep.subr.bf16.mxu0 %v8250_v19  ;;  %s10376_s8 = sld [smem:[#allocation83_spill]]  ;;  %s10377_s26 = sld [smem:[#allocation84_spill]] }
 0x233   :  { %8249 = vmatpush3.bf16.msra.mxu1 %v8246_v24 }
 0x234   :  { %7736 = vmatmul.mubr.msk.f32.vlgmr.msra.gmra.mrb[0].mxu0 %vm487_vm0, %v472_v21  ;;  %8259 = vmatprep.subr.bf16.mxu1 %v8258_v30  ;;  %v9661_v21 = vld [vmem:[%s10358_s24 + $0x8] sm:$0xff] }
 0x235   :  { %8253 = vmatpush3.bf16.msra.mxu0 %v8250_v19 }
 0x236   :  { %8255 = vmatprep.subr.bf16.mxu0 %v8254_v27 }
 0x239   :  { %8257 = vmatpush3.bf16.msra.mxu0 %v8254_v27 }
 0x23a   :  { %7771 = vmatprep.subr.mxu0 %v9213_v20 }
 0x2b3   :  { %v563_v2 = vpop.xlane.xlu0 %562 }
 0x2b4   :  { %v565_v3 = vmul.f32 0.03125, %v563_v2 }
 0x2b6   :  { %v566_v4 = vsub.f32 %v478_v0, %v565_v3 }
 0x2b8   :  { %v567_v5 = vmul.f32 %v566_v4, %v566_v4 }
 0x2ba   :  { %v568_v6 = vsel %vm487_vm0, %v567_v5, 0.0 }
 0x2bb   :  { %569 = vadd.xlane.f32.xlu0 %v568_v6 }
 0x307   :  { %v9615_v43 = vpop.f32.mrb[0].mxu0 }
 0x308   :  { %v7737_v44 = vpop.f32.mrb[1].mxu0 }
 0x348   :  { %v570_v31 = vpop.xlane.xlu0 %569 }
 0x349   :  { %v571_v32 = vmul.f32 0.03125, %v570_v31 }
 0x34b   :  { %v572_v33 = vadd.f32 1e-12, %v571_v32 }
 0x34d   :  { %8454 = vrsqrt.f32 %v572_v33 }
 0x357   :  { %v8455_v34 = vpop.eup %8454 }
 0x358   :  { %v574_v36 = vmul.f32 %v8455_v34, %v566_v4 }
 0x35a   :  { %v581_v38 = vmul.f32 %v7357_v35, %v574_v36 }
 0x35c   :  { %v9596_v41 = vadd.f32 %v7358_v37, %v581_v38 }
 0x35e   :  { %7746 = vmatprep.mubr.msk.f32.mxu1 %vm487_vm0, %v9596_v41  ;;  %7757 = vmatprep.mubr.msk.f32.mxu0 %vm487_vm0, %v9596_v41 }
 0x35f   :  { %7747 = vmatmul.mubr.msk.f32.vlgmr.msra.gmra.mrb[0].mxu1 %vm487_vm0, %v9596_v41  ;;  %7758 = vmatmul.mubr.msk.f32.vlgmr.msra.gmra.mrb[2].mxu0 %vm487_vm0, %v9596_v41 }
 0x360   :  { %8261 = vmatpush3.bf16.msra.mxu1 %v8258_v30  ;;  %7768 = vmatprep.mubr.msk.f32.mxu1 %vm487_vm0, %v9596_v41 }
 0x361   :  { %8263 = vmatprep.subr.bf16.mxu1 %v8262_v42  ;;  %7773 = vmatprep.mubr.msk.f32.mxu0 %vm9212_vm1, %v9213_v20 }
 0x364   :  { %8265 = vmatpush3.bf16.msra.mxu1 %v8262_v42 }
 0x365   :  { %7776 = vmatprep.subr.mxu1 %v9213_v20 }
 0x367   :  { %7769 = vmatmul.mubr.msk.f32.vlgmr.msra.gmra.mrb[2].mxu1 %vm487_vm0, %v9596_v41 }
 0x368   :  { %7778 = vmatprep.mubr.msk.f32.mxu1 %vm9212_vm1, %v9213_v20 }
 0x432   :  { %v7748_v47 = vpop.f32.mrb[0].mxu1  ;;  %v7759_v48 = vpop.f32.mrb[2].mxu0 }
 0x433   :  { %v9617_v49 = vadd.f32 %v7748_v47, %v7359_v45  ;;  %v9619_v50 = vadd.f32 %v7759_v48, %v7362_v46  ;;  %v686_v51 = vpop.f32.mrb[1].mxu1  ;;  %v767_v52 = vpop.f32.mrb[3].mxu0 }
 0x434   :  { %v9621_v53 = vadd.f32 %v7362_v46, %v767_v52  ;;  %v9627_v54 = vadd.f32 %v7359_v45, %v686_v51 }
 0x436   :  { %1021 = vrot.lane.b32.xlu1 %v9621_v53, %s9214_s7  ;;  %7772 = vmatpush3.xpose.msk.msra.mxu0 %vm857_vm2, %v9621_v53 }
 0x437   :  { %7781 = vmatprep.subr.mxu0 %v9213_v20 }
 0x439   :  { %7774 = vmatmul.mubr.msk.f32.vlgmr.msra.gmra.mrb[4].mxu0 %vm857_vm2, %v9627_v54 }
 0x43a   :  { %v7770_v56 = vpop.f32.mrb[2].mxu1  ;;  %1019 = vrot.lane.b32.xlu1 %v9627_v54, %s9214_s7  ;;  %7783 = vmatprep.mubr.msk.f32.mxu0 %vm9212_vm1, %v9213_v20 }
 0x43b   :  { %v9636_v57 = vadd.f32 %v7770_v56, %v7365_v55  ;;  %v848_v58 = vpop.f32.mrb[3].mxu1 }
 0x43c   :  { %v9638_v59 = vadd.f32 %v7365_v55, %v848_v58 }
 0x43e   :  { %7777 = vmatpush3.msra.mxu1 %v9638_v59 }
 0x43f   :  { %7786 = vmatprep.subr.mxu1 %v9213_v20 }
 0x4a8   :  { %v1022_v60 = vpop.permute.xlu1 %1021 }
 0x4a9   :  { %7782 = vmatpush3.xpose.msk.msra.mxu0 %vm857_vm2, %v1022_v60 }
 0x4aa   :  { %7791 = vmatprep.subr.mxu0 %v9213_v20 }
 0x4ac   :  { %v1020_v61 = vpop.permute.xlu1 %1019 }
 0x4ad   :  { %7784 = vmatmul.mubr.msk.f32.vlgmr.msra.gmra.mrb[6].mxu0 %vm857_vm2, %v1020_v61 }
 0x4ae   :  { %7793 = vmatprep.mubr.msk.f32.mxu0 %vm9212_vm1, %v9213_v20  ;;  %7792 = vmatpush3.msra.mxu0 %v9661_v21 }
 0x4af   :  { %7801 = vmatprep.subr.mxu0 %v9213_v20 }
 0x50c   :  { %v930_v62 = vpop.f32.mrb[4].mxu0 }
 0x50d   :  { %v934_v63 = vmul.f32 0.35355338, %v930_v62  ;;  %v7775_v0 = vpop.f32.mrb[5].mxu0 }
 0x50f   :  { %v935_v1 = vsel %vm857_vm2, %v934_v63, -inf }
 0x510   :  { %936 = vmax.xlane.f32.xlu0 %v935_v1 }
 0x580   :  { %v1093_v2 = vpop.f32.mrb[6].mxu0 }
 0x581   :  { %v1097_v3 = vmul.f32 0.35355338, %v1093_v2  ;;  %v7785_v4 = vpop.f32.mrb[7].mxu0 }
 0x583   :  { %v1098_v5 = vsel %vm857_vm2, %v1097_v3, -inf }
 0x584   :  { %1099 = vmax.xlane.f32.xlu1 %v1098_v5 }
 0x595   :  { %1332 = vrot.lane.b32.xlu1 %v9627_v54, %s9215_s27 }
 0x59d   :  { %v937_v6 = vpop.xlane.xlu0 %936 }
 0x59e   :  { %v938_v7 = vsub.f32 %v934_v63, %v937_v6 }
 0x5a0   :  { %v939_v8 = vmul.f32 1.442695, %v938_v7 }
 0x5a2   :  { %8456 = vpow2.f32 %v939_v8  ;;  %v9720_v8 = vld [vmem:[%s10358_s24 + $0x18] sm:$0xff] }
 0x5ac   :  { %v8457_v9 = vpop.eup %8456 }
 0x5ad   :  { %v941_v11 = vsel %vm857_vm2, %v8457_v9, 0.0 }
 0x5ae   :  { %942 = vadd.xlane.f32.xlu0 %v941_v11 }
 0x611   :  { %v1100_v12 = vpop.xlane.xlu1 %1099 }
 0x612   :  { %v1101_v13 = vsub.f32 %v1097_v3, %v1100_v12 }
 0x614   :  { %v1102_v14 = vmul.f32 1.442695, %v1101_v13 }
 0x615   :  { %v1333_v32 = vpop.permute.xlu1 %1332 }
 0x616   :  { %8458 = vpow2.f32 %v1102_v14 }
 0x620   :  { %v8459_v15 = vpop.eup %8458 }
 0x621   :  { %v1104_v16 = vsel %vm857_vm2, %v8459_v15, 0.0 }
 0x622   :  { %1105 = vadd.xlane.f32.xlu0 %v1104_v16 }
 0x638   :  { %1110 = vrot.lane.b32.xlu0 %v9638_v59, %s9214_s7 }
 0x63b   :  { %v943_v17 = vpop.xlane.xlu0 %942 }
 0x63c   :  { %8460 = vrcp.f32 %v943_v17  ;;  %1334 = vrot.lane.b32.xlu0 %v9621_v53, %s9215_s27 }
 0x646   :  { %v8461_v18 = vpop.eup %8460 }
 0x647   :  { %v945_v19 = vmul.f32 %v8461_v18, %v8457_v9 }
 0x649   :  { %7779 = vmatmul.mubr.msk.f32.vlgmr.msra.gmra.mrb[4].mxu1 %vm857_vm2, %v945_v19 }
 0x64a   :  { %7788 = vmatprep.mubr.msk.f32.mxu1 %vm9212_vm1, %v9213_v20 }
 0x6af   :  { %v1106_v22 = vpop.xlane.xlu0 %1105 }
 0x6b0   :  { %8462 = vrcp.f32 %v1106_v22 }
 0x6b3   :  { %v1111_v23 = vpop.permute.xlu0 %1110 }
 0x6b4   :  { %7787 = vmatpush3.msra.mxu1 %v1111_v23 }
 0x6b5   :  { %7796 = vmatprep.subr.mxu1 %v9213_v20 }
 0x6b7   :  { %v1335_v30 = vpop.permute.xlu0 %1334 }
 0x6ba   :  { %v8463_v24 = vpop.eup %8462 }
 0x6bb   :  { %v1108_v25 = vmul.f32 %v8463_v24, %v8459_v15 }
 0x6bd   :  { %7789 = vmatmul.mubr.msk.f32.vlgmr.msra.gmra.mrb[6].mxu1 %vm857_vm2, %v1108_v25 }
 0x6be   :  { %7797 = vmatpush3.msra.mxu1 %v9667_v26  ;;  %7798 = vmatprep.mubr.msk.f32.mxu1 %vm9212_vm1, %v9213_v20 }
 0x6bf   :  { %7806 = vmatprep.subr.mxu1 %v9213_v20 }
 0x71c   :  { %v1015_v27 = vpop.f32.mrb[4].mxu1 }
 0x71d   :  { %v7780_v28 = vpop.f32.mrb[5].mxu1  ;;  %7799 = vmatmul.mubr.msk.f32.vlgmr.msra.gmra.mrb[8].mxu1 %vm857_vm2, %v1015_v27 }
 0x71e   :  { %7808 = vmatprep.mubr.msk.f32.mxu1 %vm9212_vm1, %v9213_v20 }
 0x790   :  { %v1182_v29 = vpop.f32.mrb[6].mxu1 }
 0x791   :  { %v7790_v31 = vpop.f32.mrb[7].mxu1  ;;  %7794 = vmatmul.mubr.msk.f32.vlgmr.msra.gmra.mrb[8].mxu0 %vm857_vm2, %v1182_v29 }
 0x792   :  { %7802 = vmatpush3.xpose.msk.msra.mxu0 %vm857_vm2, %v1335_v30  ;;  %7803 = vmatprep.mubr.msk.f32.mxu0 %vm9212_vm1, %v9213_v20 }
 0x793   :  { %7811 = vmatprep.subr.mxu0 %v9213_v20 }
 0x795   :  { %7804 = vmatmul.mubr.msk.f32.vlgmr.msra.gmra.mrb[10].mxu0 %vm857_vm2, %v1333_v32 }
 0x796   :  { %7813 = vmatprep.mubr.msk.f32.mxu0 %vm9212_vm1, %v9213_v20 }
 0x7f0   :  { %v1328_v33 = vpop.f32.mrb[8].mxu1 }
 0x7f1   :  { %v7800_v34 = vpop.f32.mrb[9].mxu1 }
 0x864   :  { %v1255_v35 = vpop.f32.mrb[8].mxu0 }
 0x865   :  { %v1329_v36 = vadd.f32 %v1328_v33, %v1255_v35  ;;  %v7795_v37 = vpop.f32.mrb[9].mxu0 }
 0x868   :  { %v1406_v38 = vpop.f32.mrb[10].mxu0 }
 0x869   :  { %v1410_v39 = vmul.f32 0.35355338, %v1406_v38  ;;  %v7805_v40 = vpop.f32.mrb[11].mxu0 }
 0x86b   :  { %v1411_v42 = vsel %vm857_vm2, %v1410_v39, -inf }
 0x86c   :  { %1412 = vmax.xlane.f32.xlu0 %v1411_v42 }
 0x882   :  { %1422 = vrot.lane.b32.xlu0 %v9638_v59, %s9215_s27 }
 0x886   :  { %1572 = vrot.lane.b32.xlu0 %v9627_v54, %s9216_s13 }
 0x8f9   :  { %v1413_v44 = vpop.xlane.xlu0 %1412 }
 0x8fa   :  { %v1414_v45 = vsub.f32 %v1410_v39, %v1413_v44 }
 0x8fc   :  { %v1415_v46 = vmul.f32 1.442695, %v1414_v45 }
 0x8fd   :  { %v1423_v47 = vpop.permute.xlu0 %1422 }
 0x8fe   :  { %8464 = vpow2.f32 %v1415_v46  ;;  %7807 = vmatpush3.msra.mxu1 %v1423_v47 }
 0x8ff   :  { %7816 = vmatprep.subr.mxu1 %v9213_v20 }
 0x901   :  { %v1573_v58 = vpop.permute.xlu0 %1572 }
 0x908   :  { %v8465_v48 = vpop.eup %8464 }
 0x909   :  { %v1417_v51 = vsel %vm857_vm2, %v8465_v48, 0.0 }
 0x90a   :  { %1418 = vadd.xlane.f32.xlu1 %v1417_v51 }
 0x91b   :  { %1574 = vrot.lane.b32.xlu1 %v9621_v53, %s9216_s13  ;;  %v9703_v53 = vld [vmem:[%s10358_s24 + $0x10] sm:$0xff] }
 0x91c   :  { %7812 = vmatpush3.msra.mxu0 %v9703_v53 }
 0x91d   :  { %7821 = vmatprep.subr.mxu0 %v9213_v20 }
 0x997   :  { %v1419_v52 = vpop.xlane.xlu1 %1418 }
 0x998   :  { %8466 = vrcp.f32 %v1419_v52 }
 0x99b   :  { %v1575_v56 = vpop.permute.xlu1 %1574 }
 0x9a2   :  { %v8467_v55 = vpop.eup %8466 }
 0x9a3   :  { %v1421_v54 = vmul.f32 %v8467_v55, %v8465_v48 }
 0x9a5   :  { %7809 = vmatmul.mubr.msk.f32.vlgmr.msra.gmra.mrb[10].mxu1 %vm857_vm2, %v1421_v54 }
 0x9a6   :  { %7817 = vmatpush3.xpose.msk.msra.mxu1 %vm857_vm2, %v1575_v56  ;;  %7818 = vmatprep.mubr.msk.f32.mxu1 %vm9212_vm1, %v9213_v20 }
 0x9a7   :  { %7826 = vmatprep.subr.mxu1 %v9213_v20 }
 0x9a9   :  { %7819 = vmatmul.mubr.msk.f32.vlgmr.msra.gmra.mrb[12].mxu1 %vm857_vm2, %v1573_v58 }
 0x9aa   :  { %7828 = vmatprep.mubr.msk.f32.mxu1 %vm9212_vm1, %v9213_v20  ;;  %7827 = vmatpush3.msra.mxu1 %v9720_v8 }
 0x9ab   :  { %7836 = vmatprep.subr.mxu1 %v9213_v20 }
 0xa78   :  { %v1494_v60 = vpop.f32.mrb[10].mxu1 }
 0xa79   :  { %v7810_v61 = vpop.f32.mrb[11].mxu1  ;;  %7814 = vmatmul.mubr.msk.f32.vlgmr.msra.gmra.mrb[12].mxu0 %vm857_vm2, %v1494_v60 }
 0xa7a   :  { %7823 = vmatprep.mubr.msk.f32.mxu0 %vm9212_vm1, %v9213_v20 }
 0xa7c   :  { %v1646_v62 = vpop.f32.mrb[12].mxu1 }
 0xa7d   :  { %v1650_v63 = vmul.f32 0.35355338, %v1646_v62  ;;  %v7820_v0 = vpop.f32.mrb[13].mxu1 }
 0xa7f   :  { %v1651_v1 = vsel %vm857_vm2, %v1650_v63, -inf }
 0xa80   :  { %1652 = vmax.xlane.f32.xlu0 %v1651_v1 }
 0xa96   :  { %1662 = vrot.lane.b32.xlu0 %v9638_v59, %s9216_s13 }
 0xa9a   :  { %1973 = vrot.lane.b32.xlu0 %v9617_v49, %s9214_s7 }
 0xb0d   :  { %v1653_v2 = vpop.xlane.xlu0 %1652 }
 0xb0e   :  { %v1654_v3 = vsub.f32 %v1650_v63, %v1653_v2 }
 0xb10   :  { %v1655_v4 = vmul.f32 1.442695, %v1654_v3 }
 0xb11   :  { %v1663_v5 = vpop.permute.xlu0 %1662 }
 0xb12   :  { %8468 = vpow2.f32 %v1655_v4  ;;  %7822 = vmatpush3.msra.mxu0 %v1663_v5 }
 0xb13   :  { %7831 = vmatprep.subr.mxu0 %v9213_v20 }
 0xb15   :  { %v1974_v16 = vpop.permute.xlu0 %1973 }
 0xb1c   :  { %v8469_v6 = vpop.eup %8468 }
 0xb1d   :  { %v1657_v7 = vsel %vm857_vm2, %v8469_v6, 0.0 }
 0xb1e   :  { %1658 = vadd.xlane.f32.xlu1 %v1657_v7 }
 0xb2f   :  { %1975 = vrot.lane.b32.xlu1 %v9619_v50, %s9214_s7 }
 0xb4c   :  { %v1567_v59 = vpop.f32.mrb[12].mxu0 }
 0xb4d   :  { %v1571_v9 = vadd.f32 %v1567_v59, %v1329_v36  ;;  %v7815_v11 = vpop.f32.mrb[13].mxu0 }
 0xbab   :  { %v1659_v12 = vpop.xlane.xlu1 %1658 }
 0xbac   :  { %8470 = vrcp.f32 %v1659_v12 }
 0xbaf   :  { %v1976_v15 = vpop.permute.xlu1 %1975 }
 0xbb6   :  { %v8471_v13 = vpop.eup %8470 }
 0xbb7   :  { %v1661_v14 = vmul.f32 %v8471_v13, %v8469_v6 }
 0xbb9   :  { %7824 = vmatmul.mubr.msk.f32.vlgmr.msra.gmra.mrb[14].mxu0 %vm857_vm2, %v1661_v14 }
 0xbba   :  { %7832 = vmatpush3.xpose.msk.msra.mxu0 %vm857_vm2, %v9619_v50  ;;  %7833 = vmatprep.mubr.msk.f32.mxu0 %vm9212_vm1, %v9213_v20 }
 0xbbb   :  { %7841 = vmatprep.subr.mxu0 %v9213_v20 }
 0xbbd   :  { %7834 = vmatmul.mubr.msk.f32.vlgmr.msra.gmra.mrb[16].mxu0 %vm857_vm2, %v9617_v49 }
 0xbbe   :  { %7842 = vmatpush3.xpose.msk.msra.mxu0 %vm857_vm2, %v1976_v15  ;;  %7843 = vmatprep.mubr.msk.f32.mxu0 %vm9212_vm1, %v9213_v20 }
 0xbbf   :  { %7851 = vmatprep.subr.mxu0 %v9213_v20 }
 0xbc1   :  { %7844 = vmatmul.mubr.msk.f32.vlgmr.msra.gmra.mrb[18].mxu0 %vm857_vm2, %v1974_v16 }
 0xbc2   :  { %7852 = vmatpush3.msra.mxu0 %v9661_v21  ;;  %7853 = vmatprep.mubr.msk.f32.mxu0 %vm9212_vm1, %v9213_v20 }
 0xbc3   :  { %7861 = vmatprep.subr.mxu0 %v9213_v20 }
 0xc8c   :  { %v1734_v17 = vpop.f32.mrb[14].mxu0 }
 0xc8d   :  { %v7825_v18 = vpop.f32.mrb[15].mxu0  ;;  %7829 = vmatmul.mubr.msk.f32.vlgmr.msra.gmra.mrb[14].mxu1 %vm857_vm2, %v1734_v17 }
 0xc8e   :  { %7837 = vmatpush3.msra.mxu1 %v9636_v57  ;;  %7838 = vmatprep.mubr.msk.f32.mxu1 %vm9212_vm1, %v9213_v20 }
 0xc8f   :  { %7846 = vmatprep.subr.mxu1 %v9213_v20 }
 0xc90   :  { %v1884_v19 = vpop.f32.mrb[16].mxu0 }
 0xc91   :  { %v1888_v22 = vmul.f32 0.35355338, %v1884_v19  ;;  %v7835_v23 = vpop.f32.mrb[17].mxu0 }
 0xc93   :  { %v1889_v21 = vsel %vm857_vm2, %v1888_v22, -inf }
 0xc94   :  { %1890 = vmax.xlane.f32.xlu0 %v1889_v21  ;;  %v2047_v24 = vpop.f32.mrb[18].mxu0 }
 0xc95   :  { %v2051_v25 = vmul.f32 0.35355338, %v2047_v24  ;;  %v7845_v27 = vpop.f32.mrb[19].mxu0 }
 0xc97   :  { %v2052_v28 = vsel %vm857_vm2, %v2051_v25, -inf }
 0xc98   :  { %2053 = vmax.xlane.f32.xlu1 %v2052_v28 }
 0xca9   :  { %2288 = vrot.lane.b32.xlu1 %v9619_v50, %s9215_s27 }
 0xcad   :  { %2286 = vrot.lane.b32.xlu1 %v9617_v49, %s9215_s27 }
 0xd21   :  { %v1891_v29 = vpop.xlane.xlu0 %1890 }
 0xd22   :  { %v1892_v30 = vsub.f32 %v1888_v22, %v1891_v29 }
 0xd24   :  { %v1893_v31 = vmul.f32 1.442695, %v1892_v30 }
 0xd25   :  { %v2054_v32 = vpop.xlane.xlu1 %2053 }
 0xd26   :  { %8472 = vpow2.f32 %v1893_v31  ;;  %v2055_v33 = vsub.f32 %v2051_v25, %v2054_v32 }
 0xd28   :  { %v2056_v34 = vmul.f32 1.442695, %v2055_v33 }
 0xd29   :  { %v2289_v56 = vpop.permute.xlu1 %2288 }
 0xd2a   :  { %8474 = vpow2.f32 %v2056_v34 }
 0xd30   :  { %v8473_v35 = vpop.eup %8472 }
 0xd31   :  { %v1895_v36 = vsel %vm857_vm2, %v8473_v35, 0.0 }
 0xd32   :  { %1896 = vadd.xlane.f32.xlu0 %v1895_v36 }
 0xd34   :  { %v8475_v37 = vpop.eup %8474 }
 0xd35   :  { %v2058_v38 = vsel %vm857_vm2, %v8475_v37, 0.0 }
 0xd36   :  { %2059 = vadd.xlane.f32.xlu0 %v2058_v38  ;;  %v2823_v38 = vld [vmem:[%s10359_s25] sm:$0xff] }
 0xd4c   :  { %2064 = vrot.lane.b32.xlu0 %v9636_v57, %s9214_s7 }
 0xd60   :  { %v1807_v39 = vpop.f32.mrb[14].mxu1 }
 0xd61   :  { %v9756_v40 = vadd.f32 %v1807_v39, %v1571_v9  ;;  %v7830_v42 = vpop.f32.mrb[15].mxu1  ;;  %v2824_v39 = vld [vmem:[%s10359_s25 + $0x8] sm:$0xff] }
 0xd62   :  { %v2825_v42 = vld [vmem:[%s10359_s25 + $0x10] sm:$0xff] }
 0xdbf   :  { %v1897_v44 = vpop.xlane.xlu0 %1896 }
 0xdc0   :  { %8476 = vrcp.f32 %v1897_v44  ;;  %v2826_v44 = vld [vmem:[%s10359_s25 + $0x18] sm:$0xff] }
 0xdc3   :  { %v2060_v45 = vpop.xlane.xlu0 %2059 }
 0xdc4   :  { %8478 = vrcp.f32 %v2060_v45 }
 0xdc7   :  { %v2065_v48 = vpop.permute.xlu0 %2064 }
 0xdca   :  { %v8477_v46 = vpop.eup %8476 }
 0xdcb   :  { %v1899_v47 = vmul.f32 %v8477_v46, %v8473_v35  ;;  %v8278_v46 = vpack.c.bf16 %v2826_v44, %v2825_v42  ;;  %v2834_v42 = vld [vmem:[%s10361_s29 + $0x20] sm:$0xff]  ;;  %v2835_v44 = vld [vmem:[%s10361_s29 + $0x28] sm:$0xff] }
 0xdcd   :  { %7839 = vmatmul.mubr.msk.f32.vlgmr.msra.gmra.mrb[16].mxu1 %vm857_vm2, %v1899_v47  ;;  %v2827_v47 = vld [vmem:[%s10359_s25 + $0x20] sm:$0xff] }
 0xdce   :  { %v8479_v51 = vpop.eup %8478  ;;  %7847 = vmatpush3.msra.mxu1 %v2065_v48  ;;  %7848 = vmatprep.mubr.msk.f32.mxu1 %vm9212_vm1, %v9213_v20  ;;  %v2828_v48 = vld [vmem:[%s10359_s25 + $0x28] sm:$0xff] }
 0xdcf   :  { %v2062_v52 = vmul.f32 %v8479_v51, %v8475_v37  ;;  %7856 = vmatprep.subr.mxu1 %v9213_v20  ;;  %v8281_v51 = vpack.c.bf16 %v2828_v48, %v2827_v47 }
 0xdd1   :  { %7849 = vmatmul.mubr.msk.f32.vlgmr.msra.gmra.mrb[18].mxu1 %vm857_vm2, %v2062_v52  ;;  %v7355_v52 = vld [vmem:[#allocation5] ss:$0 sm:$0xff] }
 0xdd2   :  { %7857 = vmatpush3.msra.mxu1 %v9667_v26  ;;  %7858 = vmatprep.mubr.msk.f32.mxu1 %vm9212_vm1, %v9213_v20  ;;  %v2287_v26 = vpop.permute.xlu1 %2286 }
 0xdd3   :  { %7866 = vmatprep.subr.mxu1 %v9213_v20 }
 0xea0   :  { %v1969_v55 = vpop.f32.mrb[16].mxu1 }
 0xea1   :  { %v7840_v54 = vpop.f32.mrb[17].mxu1  ;;  %7859 = vmatmul.mubr.msk.f32.vlgmr.msra.gmra.mrb[20].mxu1 %vm857_vm2, %v1969_v55  ;;  %v9822_v55 = vadd.f32 %v7355_v52, %v9615_v43 }
 0xea2   :  { %7868 = vmatprep.mubr.msk.f32.mxu1 %vm9212_vm1, %v9213_v20 }
 0xea4   :  { %v2136_v58 = vpop.f32.mrb[18].mxu1 }
 0xea5   :  { %v7850_v60 = vpop.f32.mrb[19].mxu1  ;;  %7854 = vmatmul.mubr.msk.f32.vlgmr.msra.gmra.mrb[20].mxu0 %vm857_vm2, %v2136_v58 }
 0xea6   :  { %7862 = vmatpush3.xpose.msk.msra.mxu0 %vm857_vm2, %v2289_v56  ;;  %7863 = vmatprep.mubr.msk.f32.mxu0 %vm9212_vm1, %v9213_v20 }
 0xea7   :  { %7871 = vmatprep.subr.mxu0 %v9213_v20 }
 0xea9   :  { %7864 = vmatmul.mubr.msk.f32.vlgmr.msra.gmra.mrb[22].mxu0 %vm857_vm2, %v2287_v26 }
 0xeaa   :  { %7872 = vmatpush3.msra.mxu0 %v9703_v53  ;;  %7873 = vmatprep.mubr.msk.f32.mxu0 %vm9212_vm1, %v9213_v20 }
 0xeab   :  { %7881 = vmatprep.subr.mxu0 %v9213_v20 }
 0xf74   :  { %v2282_v61 = vpop.f32.mrb[20].mxu1 }
 0xf75   :  { %v7860_v62 = vpop.f32.mrb[21].mxu1 }
 0xf78   :  { %v2209_v63 = vpop.f32.mrb[20].mxu0 }
 0xf79   :  { %v2283_v0 = vadd.f32 %v2282_v61, %v2209_v63  ;;  %v7855_v1 = vpop.f32.mrb[21].mxu0  ;;  %v3087_v63 = vlaneseq }
 0xf7b   :  { %v9831_v1 = vshrl.u32 %v3087_v63, 7 }
 0xf7c   :  { %v2360_v2 = vpop.f32.mrb[22].mxu0 }
 0xf7d   :  { %v2364_v3 = vmul.f32 0.35355338, %v2360_v2  ;;  %v7865_v4 = vpop.f32.mrb[23].mxu0 }
 0xf7e   :  { %v3747_v4 = vsub.s32 1, %v9831_v1 }
 0xf7f   :  { %v2365_v5 = vsel %vm857_vm2, %v2364_v3, -inf }
 0xf80   :  { %2366 = vmax.xlane.f32.xlu0 %v2365_v5 }
 0xf96   :  { %2376 = vrot.lane.b32.xlu0 %v9636_v57, %s9215_s27 }
 0xf9a   :  { %2526 = vrot.lane.b32.xlu0 %v9617_v49, %s9216_s13 }
0x100d   :  { %v2367_v53 = vpop.xlane.xlu0 %2366 }
0x100e   :  { %v2368_v6 = vsub.f32 %v2364_v3, %v2367_v53  ;;  %v7406_v3 = vld [vmem:[#allocation22] ss:$0 sm:$0xff] }
0x1010   :  { %v2369_v7 = vmul.f32 1.442695, %v2368_v6 }
0x1011   :  { %v2377_v59 = vpop.permute.xlu0 %2376 }
0x1012   :  { %8480 = vpow2.f32 %v2369_v7  ;;  %7867 = vmatpush3.msra.mxu1 %v2377_v59 }
0x1013   :  { %7876 = vmatprep.subr.mxu1 %v9213_v20 }
0x1015   :  { %v2527_v15 = vpop.permute.xlu0 %2526 }
0x101c   :  { %v8481_v9 = vpop.eup %8480 }
0x101d   :  { %v2371_v11 = vsel %vm857_vm2, %v8481_v9, 0.0 }
0x101e   :  { %2372 = vadd.xlane.f32.xlu1 %v2371_v11 }
0x102f   :  { %2528 = vrot.lane.b32.xlu1 %v9619_v50, %s9216_s13  ;;  %v7400_v50 = vld [vmem:[#allocation16] ss:$0 sm:$0xff] }
0x1030   :  { %v2772_v18 = vadd.f32 %v7400_v50, %v9756_v40  ;;  %v8275_v40 = vpack.c.bf16 %v2824_v39, %v2823_v38  ;;  %v2832_v38 = vld [vmem:[%s10361_s29 + $0x10] sm:$0xff]  ;;  %v2833_v39 = vld [vmem:[%s10361_s29 + $0x18] sm:$0xff] }
0x1032   :  { %v2774_v21 = vadd.f32 %v2772_v18, %v9596_v41  ;;  %v7402_v18 = vld [vmem:[#allocation19] ss:$0 sm:$0xff] }
0x1034   :  { %v2776_v24 = vsel %vm487_vm0, %v2774_v21, 0.0 }
0x10ab   :  { %v2373_v12 = vpop.xlane.xlu1 %2372 }
0x10ac   :  { %8482 = vrcp.f32 %v2373_v12 }
0x10af   :  { %v2529_v49 = vpop.permute.xlu1 %2528 }
0x10b6   :  { %v8483_v13 = vpop.eup %8482 }
0x10b7   :  { %v2375_v14 = vmul.f32 %v8483_v13, %v8481_v9 }
0x10b9   :  { %7869 = vmatmul.mubr.msk.f32.vlgmr.msra.gmra.mrb[22].mxu1 %vm857_vm2, %v2375_v14 }
0x10ba   :  { %7877 = vmatpush3.xpose.msk.msra.mxu1 %vm857_vm2, %v2529_v49  ;;  %7878 = vmatprep.mubr.msk.f32.mxu1 %vm9212_vm1, %v9213_v20 }
0x10bb   :  { %7886 = vmatprep.subr.mxu1 %v9213_v20 }
0x10bd   :  { %7879 = vmatmul.mubr.msk.f32.vlgmr.msra.gmra.mrb[24].mxu1 %vm857_vm2, %v2527_v15 }
0x10be   :  { %7887 = vmatpush3.msra.mxu1 %v9720_v8  ;;  %7888 = vmatprep.mubr.msk.f32.mxu1 %vm9212_vm1, %v9213_v20 }
0x10bf   :  { %8274 = vmatprep.subr.bf16.mxu1 %v9211_v10 }
0x118c   :  { %v2448_v16 = vpop.f32.mrb[22].mxu1 }
0x118d   :  { %v7870_v17 = vpop.f32.mrb[23].mxu1  ;;  %7874 = vmatmul.mubr.msk.f32.vlgmr.msra.gmra.mrb[24].mxu0 %vm857_vm2, %v2448_v16  ;;  %v7401_v16 = vld [vmem:[#allocation17] ss:$0 sm:$0xff] }
0x118e   :  { %7883 = vmatprep.mubr.msk.f32.mxu0 %vm9212_vm1, %v9213_v20 }
0x1190   :  { %v2600_v19 = vpop.f32.mrb[24].mxu1 }
0x1191   :  { %v2604_v22 = vmul.f32 0.35355338, %v2600_v19  ;;  %v7880_v23 = vpop.f32.mrb[25].mxu1 }
0x1192   :  { %v2818_v23 = vld [vmem:[%s10360_s10] sm:$0xff] }
0x1193   :  { %v2605_v8 = vsel %vm857_vm2, %v2604_v22, -inf }
0x1194   :  { %2606 = vmax.xlane.f32.xlu1 %v2605_v8  ;;  %v2819_v8 = vld [vmem:[%s10360_s10 + $0x8] sm:$0xff] }
0x1198   :  { %2777 = vadd.xlane.f32.xlu1 %v2776_v24  ;;  %v2820_v24 = vld [vmem:[%s10360_s10 + $0x10] sm:$0xff] }
0x1221   :  { %v2607_v25 = vpop.xlane.xlu1 %2606 }
0x1222   :  { %v2608_v27 = vsub.f32 %v2604_v22, %v2607_v25  ;;  %v2821_v25 = vld [vmem:[%s10360_s10 + $0x18] sm:$0xff] }
0x1224   :  { %v2609_v28 = vmul.f32 1.442695, %v2608_v27  ;;  %v8270_v27 = vpack.c.bf16 %v2821_v25, %v2820_v24 }
0x1225   :  { %v2778_v54 = vpop.xlane.xlu1 %2777 }
0x1226   :  { %8484 = vpow2.f32 %v2609_v28  ;;  %v2782_v56 = vmul.f32 0.03125, %v2778_v54 }
0x1228   :  { %v2784_v61 = vsub.f32 %v2774_v21, %v2782_v56  ;;  %v8266_v21 = vpack.c.bf16 %v2819_v8, %v2818_v23 }
0x122a   :  { %v2786_v2 = vmul.f32 %v2784_v61, %v2784_v61 }
0x122c   :  { %v2788_v5 = vsel %vm487_vm0, %v2786_v2, 0.0 }
0x1230   :  { %v8485_v29 = vpop.eup %8484 }
0x1231   :  { %v2611_v30 = vsel %vm857_vm2, %v8485_v29, 0.0 }
0x1232   :  { %2612 = vadd.xlane.f32.xlu0 %v2611_v30 }
0x1248   :  { %2616 = vrot.lane.b32.xlu0 %v9636_v57, %s9216_s13 }
0x1260   :  { %v2521_v31 = vpop.f32.mrb[24].mxu0 }
0x1261   :  { %v2525_v32 = vadd.f32 %v2521_v31, %v2283_v0  ;;  %v7875_v33 = vpop.f32.mrb[25].mxu0 }
0x1262   :  { %v2830_v33 = vld [vmem:[%s10361_s29] sm:$0xff] }
0x12bf   :  { %v2613_v34 = vpop.xlane.xlu0 %2612 }
0x12c0   :  { %8486 = vrcp.f32 %v2613_v34  ;;  %v2831_v34 = vld [vmem:[%s10361_s29 + $0x8] sm:$0xff] }
0x12c3   :  { %v2617_v35 = vpop.permute.xlu0 %2616 }
0x12c4   :  { %7882 = vmatpush3.msra.mxu0 %v2617_v35 }
0x12c5   :  { %8267 = vmatprep.subr.bf16.mxu0 %v8266_v21 }
0x12ca   :  { %v8487_v36 = vpop.eup %8486 }
0x12cb   :  { %v2615_v37 = vmul.f32 %v8487_v36, %v8485_v29  ;;  %v8284_v36 = vpack.c.bf16 %v2831_v34, %v2830_v33 }
0x12cd   :  { %7884 = vmatmul.mubr.msk.f32.vlgmr.msra.gmra.mrb[26].mxu0 %vm857_vm2, %v2615_v37 }
0x12ce   :  { %8269 = vmatpush3.bf16.msra.mxu0 %v8266_v21 }
0x12cf   :  { %8271 = vmatprep.subr.bf16.mxu0 %v8270_v27 }
0x12d2   :  { %8273 = vmatpush3.bf16.msra.mxu0 %v8270_v27 }
0x12d3   :  { %8283 = vmatprep.subr.bf16.mxu0 %v9211_v10 }
0x13a0   :  { %v2688_v45 = vpop.f32.mrb[26].mxu0 }
0x13a1   :  { %v7885_v57 = vpop.f32.mrb[27].mxu0  ;;  %7889 = vmatmul.mubr.msk.f32.vlgmr.msra.gmra.mrb[26].mxu1 %vm857_vm2, %v2688_v45  ;;  %v8290_v45 = vpack.c.bf16 %v2835_v44, %v2834_v42 }
0x13a2   :  { %8276 = vmatpush3.bf16.msra.mxu1 %v8275_v40  ;;  %7914 = vmatprep.mubr.msk.f32.mxu1 %vm9212_vm1, %v9213_v20  ;;  %v8287_v40 = vpack.c.bf16 %v2833_v39, %v2832_v38  ;;  %v3089_v57 = vsub.s32 0, %v9831_v1 }
0x13a3   :  { %8277 = vmatprep.subr.bf16.mxu1 %v9211_v10 }
0x13a6   :  { %8279 = vmatpush3.bf16.msra.mxu1 %v8278_v46  ;;  %v7403_v46 = vld [vmem:[#allocation20] ss:$0 sm:$0xff] }
0x13a7   :  { %8280 = vmatprep.subr.bf16.mxu1 %v9211_v10 }
0x13aa   :  { %8282 = vmatpush3.bf16.msra.mxu1 %v8281_v51 }
0x13ab   :  { %7932 = vmatprep.subr.mxu1 %v9213_v20 }
0x13ad   :  { %7915 = vmatmul.mubr.msk.f32.vlgmr.msra.gmra.mrb[28].mxu1 %vm2937_vm3, %v9822_v55 }
0x13ae   :  { %7934 = vmatprep.mubr.msk.f32.mxu1 %vm9212_vm1, %v9213_v20 }
0x1474   :  { %v2761_v58 = vpop.f32.mrb[26].mxu1 }
0x1475   :  { %v2765_v60 = vadd.f32 %v2761_v58, %v2525_v32  ;;  %v7890_v26 = vpop.f32.mrb[27].mxu1 }
0x1477   :  { %v2773_v62 = vadd.f32 %v7400_v50, %v2765_v60 }
0x1479   :  { %v2775_v0 = vadd.f32 %v2773_v62, %v9596_v41 }
0x147b   :  { %v2779_v43 = vsel %vm487_vm0, %v2775_v0, 0.0 }
0x147c   :  { %2780 = vadd.xlane.f32.xlu1 %v2779_v43 }
0x1480   :  { %v3007_v53 = vpop.f32.mrb[28].mxu1  ;;  %2789 = vadd.xlane.f32.xlu1 %v2788_v5 }
0x1481   :  { %v9835_v6 = vadd.f32 %v7406_v3, %v3007_v53  ;;  %v7916_v7 = vpop.f32.mrb[29].mxu1 }
0x1483   :  { %v9838_v59 = vrot.slane %v9835_v6, %v3747_v4  ;;  %v3090_v52 = vrot.slane %v9835_v6, %v3089_v57 }
0x1509   :  { %v2781_v41 = vpop.xlane.xlu1 %2780 }
0x150a   :  { %v2783_v9 = vmul.f32 0.03125, %v2781_v41 }
0x150c   :  { %v2785_v11 = vsub.f32 %v2775_v0, %v2783_v9 }
0x150d   :  { %v2790_v12 = vpop.xlane.xlu1 %2789 }
0x150e   :  { %v2794_v13 = vmul.f32 0.03125, %v2790_v12  ;;  %v2787_v14 = vmul.f32 %v2785_v11, %v2785_v11 }
0x1510   :  { %v2796_v49 = vadd.f32 1e-12, %v2794_v13  ;;  %v2791_v15 = vsel %vm487_vm0, %v2787_v14, 0.0 }
0x1511   :  { %2792 = vadd.xlane.f32.xlu1 %v2791_v15 }
0x1512   :  { %8488 = vrsqrt.f32 %v2796_v49 }
0x151c   :  { %v8489_v50 = vpop.eup %8488 }
0x151d   :  { %v2800_v17 = vmul.f32 %v8489_v50, %v2784_v61 }
0x151f   :  { %v2808_v19 = vmul.f32 %v7401_v16, %v2800_v17  ;;  %v9899_v17 = vld [vmem:[%s10362_s11] sm:$0xff] }
0x1521   :  { %v9841_v22 = vadd.f32 %v7402_v18, %v2808_v19 }
0x1523   :  { %7899 = vmatprep.mubr.msk.f32.mxu0 %vm487_vm0, %v9841_v22 }
0x159e   :  { %v2793_v28 = vpop.xlane.xlu1 %2792 }
0x159f   :  { %v2795_v29 = vmul.f32 0.03125, %v2793_v28 }
0x15a1   :  { %v2797_v30 = vadd.f32 1e-12, %v2795_v29 }
0x15a3   :  { %8490 = vrsqrt.f32 %v2797_v30 }
0x15ad   :  { %v8491_v31 = vpop.eup %8490 }
0x15ae   :  { %v2801_v32 = vmul.f32 %v8491_v31, %v2785_v11 }
0x15b0   :  { %v2809_v35 = vmul.f32 %v7401_v16, %v2801_v32 }
0x15b2   :  { %v9852_v37 = vadd.f32 %v7402_v18, %v2809_v35  ;;  %v2838_v18 = vld [vmem:[%s10362_s11 + $0x8] sm:$0xff] }
0x15b4   :  { %7900 = vmatmul.mubr.msk.f32.vlgmr.msra.gmra.mrb[28].mxu0 %vm487_vm0, %v9852_v37 }
0x15b5   :  { %8285 = vmatpush3.bf16.msra.mxu0 %v8284_v36  ;;  %7929 = vmatprep.mubr.msk.f32.mxu0 %vm9212_vm1, %v9213_v20 }
0x15b6   :  { %8286 = vmatprep.subr.bf16.mxu0 %v9211_v10 }
0x15b9   :  { %8288 = vmatpush3.bf16.msra.mxu0 %v8287_v40 }
0x15ba   :  { %8289 = vmatprep.subr.bf16.mxu0 %v9211_v10 }
0x15bd   :  { %8291 = vmatpush3.bf16.msra.mxu0 %v8290_v45 }
0x15be   :  { %7942 = vmatprep.subr.mxu0 %v9213_v20 }
0x15c0   :  { %7930 = vmatmul.mubr.msk.f32.vlgmr.msra.gmra.mrb[30].mxu0 %vm2937_vm3, %v9822_v55  ;;  %v7408_v55 = vld [vmem:[#allocation23] ss:$0 sm:$0xff] }
0x15c1   :  { %7944 = vmatprep.mubr.msk.f32.mxu0 %vm9212_vm1, %v9213_v20  ;;  %7943 = vmatpush3.msra.mxu0 %v2838_v18 }
0x15c2   :  { %7952 = vmatprep.subr.mxu0 %v9213_v20 }
0x1687   :  { %v7901_v47 = vpop.f32.mrb[28].mxu0 }
0x1688   :  { %v2928_v48 = vadd.f32 %v7901_v47, %v7403_v46  ;;  %v2922_v51 = vpop.f32.mrb[29].mxu0 }
0x1689   :  { %v2923_v54 = vadd.f32 %v7403_v46, %v2922_v51 }
0x168a   :  { %v3749_v10 = vmul.f32 %v9838_v59, %v2928_v48 }
0x168b   :  { %v3091_v56 = vmul.f32 %v3090_v52, %v2923_v54 }
0x168c   :  { %v3750_v41 = vsel %vm857_vm2, %v3749_v10, 0.0 }
0x168d   :  { %3181 = vrot.lane.b32.xlu1 %v3091_v56, %s9214_s7  ;;  %v3092_v58 = vsel %vm857_vm2, %v3091_v56, 0.0 }
0x168e   :  { %3093 = vadd.xlane.f32.xlu0 %v3092_v58 }
0x1693   :  { %v3083_v60 = vpop.f32.mrb[30].mxu0 }
0x1694   :  { %v3084_v26 = vadd.f32 %v7408_v55, %v3083_v60  ;;  %v7931_v61 = vpop.f32.mrb[31].mxu0 }
0x1696   :  { %7933 = vmatpush3.msk.msra.mxu1 %vm3106_vm4, %v3084_v26  ;;  %v9887_v59 = vrot.slane %v3084_v26, 1 }
0x1697   :  { %7937 = vmatprep.subr.mxu1 %v9213_v20 }
0x16a4   :  { %3194 = vrot.lane.b32.xlu0 %v3084_v26, %s9214_s7 }
0x16a8   :  { %3581 = vrot.lane.b32.xlu0 %v3091_v56, %s9216_s13 }
0x16ff   :  { %v3182_v62 = vpop.permute.xlu1 %3181 }
0x1700   :  { %v3184_v63 = vsel %vm857_vm2, %v3182_v62, 0.0 }
0x1701   :  { %3185 = vadd.xlane.f32.xlu1 %v3184_v63 }
0x1712   :  { %3417 = vrot.lane.b32.xlu1 %v3091_v56, %s9215_s27 }
0x171b   :  { %v3094_v0 = vpop.xlane.xlu0 %3093 }
0x171c   :  { %v3095_v43 = vmul.f32 0.35355338, %v3094_v0 }
0x171e   :  { %v3096_v1 = vsub.f32 %v3095_v43, %v3095_v43 }
0x171f   :  { %v3195_v4 = vpop.permute.xlu0 %3194 }
0x1720   :  { %v3097_v2 = vmul.f32 1.442695, %v3096_v1 }
0x1722   :  { %8492 = vpow2.f32 %v3097_v2 }
0x1723   :  { %v3582_v5 = vpop.permute.xlu0 %3581 }
0x1724   :  { %v3584_v53 = vsel %vm857_vm2, %v3582_v5, 0.0 }
0x172c   :  { %v8493_v3 = vpop.eup %8492 }
0x172d   :  { %8494 = vrcp.f32 %v8493_v3 }
0x1736   :  { %3585 = vadd.xlane.f32.xlu1 %v3584_v53  ;;  %v9942_v53 = vld [vmem:[%s10362_s11 + $0x18] sm:$0xff] }
0x1737   :  { %v8495_v6 = vpop.eup %8494 }
0x1738   :  { %v3101_v7 = vmul.f32 %v8495_v6, %v8493_v3 }
0x173a   :  { %7935 = vmatmul.mubr.msk.f32.vlgmr.msra.gmra.mrb[30].mxu1 %vm3102_vm5, %v3101_v7 }
0x173b   :  { %7938 = vmatpush3.msk.msra.mxu1 %vm3106_vm4, %v3195_v4  ;;  %7939 = vmatprep.mubr.msk.f32.mxu1 %vm9212_vm1, %v9213_v20 }
0x173c   :  { %7947 = vmatprep.subr.mxu1 %v9213_v20 }
0x1747   :  { %3594 = vrot.lane.b32.xlu1 %v3084_v26, %s9216_s13 }
0x174b   :  { %3850 = vrot.lane.b32.xlu1 %v9887_v59, %s9214_s7 }
0x174f   :  { %4073 = vrot.lane.b32.xlu1 %v3749_v10, %s9215_s27 }
0x1753   :  { %4237 = vrot.lane.b32.xlu1 %v3749_v10, %s9216_s13 }
0x1777   :  { %3751 = vadd.xlane.f32.xlu1 %v3750_v41 }
0x1788   :  { %4250 = vrot.lane.b32.xlu1 %v9887_v59, %s9216_s13 }
0x178e   :  { %v3186_v9 = vpop.xlane.xlu1 %3185 }
0x178f   :  { %v3187_v11 = vmul.f32 0.35355338, %v3186_v9 }
0x1791   :  { %v3188_v12 = vsub.f32 %v3187_v11, %v3187_v11 }
0x1792   :  { %v3418_v13 = vpop.permute.xlu1 %3417 }
0x1793   :  { %v3189_v14 = vmul.f32 1.442695, %v3188_v12  ;;  %v3420_v49 = vsel %vm857_vm2, %v3418_v13, 0.0 }
0x1794   :  { %3421 = vadd.xlane.f32.xlu0 %v3420_v49 }
0x1795   :  { %8496 = vpow2.f32 %v3189_v14 }
0x179f   :  { %v8497_v15 = vpop.eup %8496 }
0x17a0   :  { %8498 = vrcp.f32 %v8497_v15 }
0x17aa   :  { %v8499_v50 = vpop.eup %8498  ;;  %3430 = vrot.lane.b32.xlu0 %v3084_v26, %s9215_s27  ;;  %v2839_v26 = vld [vmem:[%s10362_s11 + $0x10] sm:$0xff] }
0x17ab   :  { %v3193_v16 = vmul.f32 %v8499_v50, %v8497_v15 }
0x17ad   :  { %7940 = vmatmul.mubr.msk.f32.vlgmr.msra.gmra.mrb[32].mxu1 %vm3102_vm5, %v3193_v16 }
0x17ae   :  { %3837 = vrot.lane.b32.xlu0 %v3749_v10, %s9214_s7  ;;  %7948 = vmatpush3.msra.mxu1 %v9899_v17 }
0x17af   :  { %7949 = vmatprep.mubr.msk.f32.mxu1 %vm9212_vm1, %v9213_v20  ;;  %7957 = vmatprep.subr.mxu1 %v9213_v20 }
0x17c3   :  { %v3586_v8 = vpop.xlane.xlu1 %3585 }
0x17c4   :  { %v3587_v35 = vmul.f32 0.35355338, %v3586_v8 }
0x17c6   :  { %v3588_v39 = vsub.f32 %v3587_v35, %v3587_v35 }
0x17c7   :  { %v3595_v21 = vpop.permute.xlu1 %3594 }
0x17c8   :  { %v3589_v44 = vmul.f32 1.442695, %v3588_v39 }
0x17cb   :  { %v9912_v25 = vpop.permute.xlu1 %3850 }
0x17cf   :  { %v4074_v28 = vpop.permute.xlu1 %4073 }
0x17d0   :  { %v4076_v31 = vsel %vm857_vm2, %v4074_v28, 0.0 }
0x17d3   :  { %v4238_v32 = vpop.permute.xlu1 %4237 }
0x17d4   :  { %v4240_v33 = vsel %vm857_vm2, %v4238_v32, 0.0 }
0x1804   :  { %v3752_v38 = vpop.xlane.xlu1 %3751 }
0x1805   :  { %v3753_v40 = vmul.f32 0.35355338, %v3752_v38 }
0x1807   :  { %v3754_v45 = vsub.f32 %v3753_v40, %v3753_v40 }
0x1809   :  { %v3755_v57 = vmul.f32 1.442695, %v3754_v45 }
0x180d   :  { %v3176_v19 = vpop.f32.mrb[30].mxu1 }
0x180e   :  { %v7936_v23 = vpop.f32.mrb[31].mxu1  ;;  %7950 = vmatmul.mubr.msk.f32.vlgmr.msra.gmra.mrb[34].mxu1 %vm857_vm2, %v3176_v19 }
0x180f   :  { %7959 = vmatprep.mubr.msk.f32.mxu1 %vm9212_vm1, %v9213_v20  ;;  %7958 = vmatpush3.msra.mxu1 %v2839_v26 }
0x1810   :  { %7967 = vmatprep.subr.mxu1 %v9213_v20 }
0x1821   :  { %v3422_v24 = vpop.xlane.xlu0 %3421 }
0x1822   :  { %v3423_v34 = vmul.f32 0.35355338, %v3422_v24 }
0x1824   :  { %v3424_v36 = vsub.f32 %v3423_v34, %v3423_v34 }
0x1825   :  { %v3431_v27 = vpop.permute.xlu0 %3430 }
0x1826   :  { %v3425_v42 = vmul.f32 1.442695, %v3424_v36 }
0x1828   :  { %8500 = vpow2.f32 %v3425_v42 }
0x1829   :  { %v3838_v29 = vpop.permute.xlu0 %3837  ;;  %8502 = vpow2.f32 %v3589_v44  ;;  %v4251_v44 = vpop.permute.xlu1 %4250 }
0x182a   :  { %v3840_v30 = vsel %vm857_vm2, %v3838_v29, 0.0  ;;  %8504 = vpow2.f32 %v3755_v57 }
0x182b   :  { %3841 = vadd.xlane.f32.xlu0 %v3840_v30 }
0x182f   :  { %4077 = vadd.xlane.f32.xlu0 %v4076_v31 }
0x1832   :  { %v8501_v46 = vpop.eup %8500 }
0x1833   :  { %4241 = vadd.xlane.f32.xlu0 %v4240_v33  ;;  %8506 = vrcp.f32 %v8501_v46  ;;  %v8503_v47 = vpop.eup %8502 }
0x1834   :  { %8508 = vrcp.f32 %v8503_v47  ;;  %v8505_v48 = vpop.eup %8504 }
0x1835   :  { %8510 = vrcp.f32 %v8505_v48 }
0x183d   :  { %v8507_v51 = vpop.eup %8506 }
0x183e   :  { %v3429_v10 = vmul.f32 %v8507_v51, %v8501_v46  ;;  %v8509_v56 = vpop.eup %8508 }
0x183f   :  { %v3593_v58 = vmul.f32 %v8509_v56, %v8503_v47  ;;  %v8511_v55 = vpop.eup %8510 }
0x1840   :  { %v3759_v60 = vmul.f32 %v8511_v55, %v8505_v48 }
0x1849   :  { %4086 = vrot.lane.b32.xlu0 %v9887_v59, %s9215_s27 }
0x1880   :  { %v3267_v52 = vpop.f32.mrb[32].mxu1 }
0x1881   :  { %v7941_v54 = vpop.f32.mrb[33].mxu1  ;;  %7945 = vmatmul.mubr.msk.f32.vlgmr.msra.gmra.mrb[32].mxu0 %vm857_vm2, %v3267_v52 }
0x1882   :  { %7953 = vmatpush3.msk.msra.mxu0 %vm3106_vm4, %v3431_v27  ;;  %7954 = vmatprep.mubr.msk.f32.mxu0 %vm9212_vm1, %v9213_v20  ;;  %v7434_v27 = vld [vmem:[#allocation25] ss:$0 sm:$0xff] }
0x1883   :  { %7962 = vmatprep.subr.mxu0 %v9213_v20 }
0x1885   :  { %7955 = vmatmul.mubr.msk.f32.vlgmr.msra.gmra.mrb[34].mxu0 %vm3102_vm5, %v3429_v10 }
0x1886   :  { %7963 = vmatpush3.msk.msra.mxu0 %vm3106_vm4, %v3595_v21  ;;  %7964 = vmatprep.mubr.msk.f32.mxu0 %vm9212_vm1, %v9213_v20 }
0x1887   :  { %7972 = vmatprep.subr.mxu0 %v9213_v20 }
0x1889   :  { %7965 = vmatmul.mubr.msk.f32.vlgmr.msra.gmra.mrb[36].mxu0 %vm3102_vm5, %v3593_v58 }
0x188a   :  { %7973 = vmatpush3.msk.msra.mxu0 %vm3106_vm4, %v9887_v59  ;;  %7974 = vmatprep.mubr.msk.f32.mxu0 %vm9212_vm1, %v9213_v20 }
0x188b   :  { %7982 = vmatprep.subr.mxu0 %v9213_v20 }
0x188d   :  { %7975 = vmatmul.mubr.msk.f32.vlgmr.msra.gmra.mrb[38].mxu0 %vm3102_vm5, %v3759_v60 }
0x188e   :  { %7983 = vmatpush3.msra.mxu0 %v2838_v18  ;;  %7984 = vmatprep.mubr.msk.f32.mxu0 %vm9212_vm1, %v9213_v20 }
0x188f   :  { %7992 = vmatprep.subr.mxu0 %v9213_v20 }
0x18b8   :  { %v3842_v63 = vpop.xlane.xlu0 %3841 }
0x18b9   :  { %v3843_v0 = vmul.f32 0.35355338, %v3842_v63 }
0x18bb   :  { %v3844_v43 = vsub.f32 %v3843_v0, %v3843_v0  ;;  %v7435_v0 = vld [vmem:[#allocation26] ss:$0 sm:$0xff] }
0x18bc   :  { %v4078_v14 = vpop.xlane.xlu0 %4077 }
0x18bd   :  { %v3845_v1 = vmul.f32 1.442695, %v3844_v43  ;;  %v4079_v49 = vmul.f32 0.35355338, %v4078_v14 }
0x18bf   :  { %8512 = vpow2.f32 %v3845_v1  ;;  %v4080_v50 = vsub.f32 %v4079_v49, %v4079_v49  ;;  %v7436_v1 = vld [vmem:[#allocation28] ss:$0 sm:$0xff] }
0x18c0   :  { %v4242_v15 = vpop.xlane.xlu0 %4241 }
0x18c1   :  { %v4243_v16 = vmul.f32 0.35355338, %v4242_v15  ;;  %v4081_v18 = vmul.f32 1.442695, %v4080_v50  ;;  %v4453_v50 = vld [vmem:[%s10363_s12] sm:$0xff] }
0x18c4   :  { %v4087_v34 = vpop.permute.xlu0 %4086 }
0x18c9   :  { %v8513_v2 = vpop.eup %8512 }
0x18ca   :  { %8514 = vrcp.f32 %v8513_v2 }
0x18cb   :  { %8516 = vpow2.f32 %v4081_v18 }
0x18d4   :  { %v8515_v59 = vpop.eup %8514 }
0x18d5   :  { %v3849_v11 = vmul.f32 %v8515_v59, %v8513_v2  ;;  %v8517_v23 = vpop.eup %8516 }
0x18e1   :  { %v3413_v61 = vpop.f32.mrb[34].mxu1 }
0x18e2   :  { %v7951_v62 = vpop.f32.mrb[35].mxu1 }
0x1954   :  { %v3340_v3 = vpop.f32.mrb[32].mxu0 }
0x1955   :  { %v3414_v4 = vadd.f32 %v3413_v61, %v3340_v3  ;;  %v7946_v5 = vpop.f32.mrb[33].mxu0 }
0x1958   :  { %v3503_v6 = vpop.f32.mrb[34].mxu0 }
0x1959   :  { %v7956_v7 = vpop.f32.mrb[35].mxu0  ;;  %7960 = vmatmul.mubr.msk.f32.vlgmr.msra.gmra.mrb[36].mxu1 %vm857_vm2, %v3503_v6 }
0x195a   :  { %7968 = vmatpush3.msra.mxu1 %v9942_v53  ;;  %7969 = vmatprep.mubr.msk.f32.mxu1 %vm9212_vm1, %v9213_v20 }
0x195b   :  { %7977 = vmatprep.subr.mxu1 %v9213_v20 }
0x195c   :  { %v3667_v41 = vpop.f32.mrb[36].mxu0 }
0x195d   :  { %v7966_v9 = vpop.f32.mrb[37].mxu0  ;;  %7970 = vmatmul.mubr.msk.f32.vlgmr.msra.gmra.mrb[38].mxu1 %vm857_vm2, %v3667_v41 }
0x195e   :  { %7978 = vmatpush3.msk.msra.mxu1 %vm3106_vm4, %v9912_v25  ;;  %7979 = vmatprep.mubr.msk.f32.mxu1 %vm9212_vm1, %v9213_v20 }
0x195f   :  { %7987 = vmatprep.subr.mxu1 %v9213_v20 }
0x1960   :  { %v3832_v12 = vpop.f32.mrb[38].mxu0 }
0x1961   :  { %v7976_v13 = vpop.f32.mrb[39].mxu0  ;;  %7980 = vmatmul.mubr.msk.f32.vlgmr.msra.gmra.mrb[40].mxu1 %vm3102_vm5, %v3849_v11 }
0x1962   :  { %7988 = vmatpush3.msra.mxu1 %v9899_v17  ;;  %7989 = vmatprep.mubr.msk.f32.mxu1 %vm9212_vm1, %v9213_v20  ;;  %v4244_v17 = vsub.f32 %v4243_v16, %v4243_v16  ;;  %v4454_v16 = vld [vmem:[%s10363_s12 + $0x8] sm:$0xff] }
0x1963   :  { %7997 = vmatprep.subr.mxu1 %v9213_v20  ;;  %v8292_v18 = vpack.c.bf16 %v4454_v16, %v4453_v50  ;;  %v4709_v50 = vld [vmem:[%s10366_s0 + $0x8] sm:$0xff] }
0x1964   :  { %v4245_v19 = vmul.f32 1.442695, %v4244_v17  ;;  %v4455_v17 = vld [vmem:[%s10363_s12 + $0x10] sm:$0xff] }
0x1965   :  { %7990 = vmatmul.mubr.msk.f32.vlgmr.msra.gmra.mrb[42].mxu1 %vm857_vm2, %v3832_v12 }
0x1966   :  { %7998 = vmatpush3.msra.mxu1 %v2839_v26  ;;  %7999 = vmatprep.mubr.msk.f32.mxu1 %vm9212_vm1, %v9213_v20  ;;  %8518 = vpow2.f32 %v4245_v19  ;;  %v4456_v19 = vld [vmem:[%s10363_s12 + $0x18] sm:$0xff] }
0x1967   :  { %8007 = vmatprep.subr.mxu1 %v9213_v20  ;;  %8520 = vrcp.f32 %v8517_v23 }
0x1970   :  { %v8519_v8 = vpop.eup %8518 }
0x1971   :  { %8522 = vrcp.f32 %v8519_v8  ;;  %v8521_v32 = vpop.eup %8520 }
0x1972   :  { %v4085_v39 = vmul.f32 %v8521_v32, %v8517_v23  ;;  %v4460_v32 = vld [vmem:[%s10364_s15 + $0x10] sm:$0xff] }
0x197b   :  { %v8523_v40 = vpop.eup %8522 }
0x1a2c   :  { %v3576_v21 = vpop.f32.mrb[36].mxu1 }
0x1a2d   :  { %v3580_v24 = vadd.f32 %v3576_v21, %v3414_v4  ;;  %v7961_v25 = vpop.f32.mrb[37].mxu1 }
0x1a30   :  { %v3740_v28 = vpop.f32.mrb[38].mxu1 }
0x1a31   :  { %v3744_v29 = vadd.f32 %v3740_v28, %v3580_v24  ;;  %v7971_v30 = vpop.f32.mrb[39].mxu1 }
0x1a32   :  { %v4459_v30 = vld [vmem:[%s10364_s15 + $0x8] sm:$0xff] }
0x1a33   :  { %v4407_v31 = vadd.f32 %v7434_v27, %v3744_v29  ;;  %v4458_v29 = vld [vmem:[%s10364_s15] sm:$0xff] }
0x1a34   :  { %v3923_v33 = vpop.f32.mrb[40].mxu1 }
0x1a35   :  { %v7981_v35 = vpop.f32.mrb[41].mxu1  ;;  %7985 = vmatmul.mubr.msk.f32.vlgmr.msra.gmra.mrb[40].mxu0 %vm857_vm2, %v3923_v33  ;;  %v4409_v36 = vadd.f32 %v4407_v31, %v9841_v22  ;;  %v4249_v22 = vmul.f32 %v8523_v40, %v8519_v8  ;;  %v8300_v31 = vpack.c.bf16 %v4459_v30, %v4458_v29  ;;  %v4461_v33 = vld [vmem:[%s10364_s15 + $0x18] sm:$0xff] }
0x1a36   :  { %7993 = vmatpush3.msk.msra.mxu0 %vm3106_vm4, %v4087_v34  ;;  %7994 = vmatprep.mubr.msk.f32.mxu0 %vm9212_vm1, %v9213_v20  ;;  %v8304_v34 = vpack.c.bf16 %v4461_v33, %v4460_v32  ;;  %v4462_v35 = vld [vmem:[%s10364_s15 + $0x20] sm:$0xff]  ;;  %v4465_v40 = vld [vmem:[%s10364_s15 + $0x38] sm:$0xff] }
0x1a37   :  { %v4411_v38 = vsel %vm487_vm0, %v4409_v36, 0.0  ;;  %8002 = vmatprep.subr.mxu0 %v9213_v20 }
0x1a38   :  { %4412 = vadd.xlane.f32.xlu0 %v4411_v38  ;;  %v4069_v42 = vpop.f32.mrb[42].mxu1 }
0x1a39   :  { %v7991_v45 = vpop.f32.mrb[43].mxu1  ;;  %7995 = vmatmul.mubr.msk.f32.vlgmr.msra.gmra.mrb[42].mxu0 %vm3102_vm5, %v4085_v39  ;;  %v4464_v39 = vld [vmem:[%s10364_s15 + $0x30] sm:$0xff] }
0x1a3a   :  { %8003 = vmatpush3.msk.msra.mxu0 %vm3106_vm4, %v4251_v44  ;;  %8004 = vmatprep.mubr.msk.f32.mxu0 %vm9212_vm1, %v9213_v20  ;;  %v7437_v44 = vld [vmem:[#allocation29] ss:$0 sm:$0xff] }
0x1a3b   :  { %8293 = vmatprep.subr.bf16.mxu0 %v8292_v18 }
0x1a3d   :  { %8005 = vmatmul.mubr.msk.f32.vlgmr.msra.gmra.mrb[44].mxu0 %vm3102_vm5, %v4249_v22 }
0x1a3e   :  { %8295 = vmatpush3.bf16.msra.mxu0 %v8292_v18  ;;  %v4700_v18 = vld [vmem:[%s10365_s16 + $0x10] sm:$0xff] }
0x1ac5   :  { %v4413_v57 = vpop.xlane.xlu0 %4412 }
0x1ac6   :  { %v4417_v46 = vmul.f32 0.03125, %v4413_v57 }
0x1ac8   :  { %v4419_v47 = vsub.f32 %v4409_v36, %v4417_v46  ;;  %v4463_v36 = vld [vmem:[%s10364_s15 + $0x28] sm:$0xff] }
0x1ac9   :  { %v8308_v38 = vpack.c.bf16 %v4463_v36, %v4462_v35  ;;  %v7444_v36 = vld [vmem:[#allocation34] ss:$0 sm:$0xff] }
0x1aca   :  { %v4421_v48 = vmul.f32 %v4419_v47, %v4419_v47 }
0x1acc   :  { %v4423_v51 = vsel %vm487_vm0, %v4421_v48, 0.0 }
0x1acd   :  { %4424 = vadd.xlane.f32.xlu0 %v4423_v51 }
0x1b08   :  { %v3996_v52 = vpop.f32.mrb[40].mxu0 }
0x1b09   :  { %v4070_v54 = vadd.f32 %v4069_v42, %v3996_v52  ;;  %v7986_v10 = vpop.f32.mrb[41].mxu0  ;;  %v8312_v42 = vpack.c.bf16 %v4465_v40, %v4464_v39 }
0x1b0c   :  { %v4159_v56 = vpop.f32.mrb[42].mxu0 }
0x1b0d   :  { %v7996_v58 = vpop.f32.mrb[43].mxu0  ;;  %8000 = vmatmul.mubr.msk.f32.vlgmr.msra.gmra.mrb[44].mxu1 %vm857_vm2, %v4159_v56 }
0x1b0e   :  { %8008 = vmatpush3.msra.mxu1 %v9942_v53  ;;  %8009 = vmatprep.mubr.msk.f32.mxu1 %vm9212_vm1, %v9213_v20 }
0x1b0f   :  { %8301 = vmatprep.subr.bf16.mxu1 %v8300_v31 }
0x1b10   :  { %v4323_v55 = vpop.f32.mrb[44].mxu0 }
0x1b11   :  { %v8006_v60 = vpop.f32.mrb[45].mxu0  ;;  %8010 = vmatmul.mubr.msk.f32.vlgmr.msra.gmra.mrb[46].mxu1 %vm857_vm2, %v4323_v55 }
0x1b12   :  { %8303 = vmatpush3.bf16.msra.mxu1 %v8300_v31 }
0x1b13   :  { %8305 = vmatprep.subr.bf16.mxu1 %v8304_v34 }
0x1b16   :  { %8307 = vmatpush3.bf16.msra.mxu1 %v8304_v34  ;;  %v7443_v34 = vld [vmem:[#allocation32] ss:$0 sm:$0xff] }
0x1b17   :  { %8309 = vmatprep.subr.bf16.mxu1 %v8308_v38 }
0x1b1a   :  { %8311 = vmatpush3.bf16.msra.mxu1 %v8308_v38 }
0x1b1b   :  { %8313 = vmatprep.subr.bf16.mxu1 %v8312_v42 }
0x1b1e   :  { %8315 = vmatpush3.bf16.msra.mxu1 %v8312_v42 }
0x1b5a   :  { %v4425_v26 = vpop.xlane.xlu0 %4424 }
0x1b5b   :  { %v4429_v61 = vmul.f32 0.03125, %v4425_v26  ;;  %v7440_v26 = vld [vmem:[#allocation31] ss:$0 sm:$0xff] }
0x1b5d   :  { %v4431_v62 = vadd.f32 1e-12, %v4429_v61 }
0x1b5f   :  { %8524 = vrsqrt.f32 %v4431_v62 }
0x1b69   :  { %v8525_v63 = vpop.eup %8524 }
0x1b6a   :  { %v4435_v43 = vmul.f32 %v8525_v63, %v4419_v47 }
0x1b6c   :  { %v4443_v2 = vmul.f32 %v7435_v0, %v4435_v43 }
0x1b6e   :  { %v9982_v3 = vadd.f32 %v7436_v1, %v4443_v2 }
0x1b70   :  { %8020 = vmatprep.mubr.msk.f32.mxu0 %vm487_vm0, %v9982_v3 }
0x1be0   :  { %v4232_v4 = vpop.f32.mrb[44].mxu1 }
0x1be1   :  { %v4236_v5 = vadd.f32 %v4232_v4, %v4070_v54  ;;  %v8001_v53 = vpop.f32.mrb[45].mxu1 }
0x1be4   :  { %v4396_v6 = vpop.f32.mrb[46].mxu1 }
0x1be5   :  { %v4400_v7 = vadd.f32 %v4396_v6, %v4236_v5  ;;  %v8011_v59 = vpop.f32.mrb[47].mxu1 }
0x1be7   :  { %v4408_v41 = vadd.f32 %v7434_v27, %v4400_v7 }
0x1be9   :  { %v4410_v9 = vadd.f32 %v4408_v41, %v9852_v37  ;;  %v8296_v37 = vpack.c.bf16 %v4456_v19, %v4455_v17  ;;  %v4701_v17 = vld [vmem:[%s10365_s16 + $0x18] sm:$0xff] }
0x1bea   :  { %v8320_v19 = vpack.c.bf16 %v4701_v17, %v4700_v18 }
0x1beb   :  { %v4414_v11 = vsel %vm487_vm0, %v4410_v9, 0.0  ;;  %8297 = vmatprep.subr.bf16.mxu0 %v8296_v37 }
0x1bec   :  { %4415 = vadd.xlane.f32.xlu1 %v4414_v11  ;;  %8299 = vmatpush3.bf16.msra.mxu0 %v8296_v37  ;;  %v4710_v37 = vld [vmem:[%s10366_s0 + $0x10] sm:$0xff] }
0x1c79   :  { %v4416_v12 = vpop.xlane.xlu1 %4415 }
0x1c7a   :  { %v4418_v13 = vmul.f32 0.03125, %v4416_v12 }
0x1c7c   :  { %v4420_v14 = vsub.f32 %v4410_v9, %v4418_v13  ;;  %v4698_v13 = vld [vmem:[%s10365_s16] sm:$0xff] }
0x1c7e   :  { %v4422_v49 = vmul.f32 %v4420_v14, %v4420_v14 }
0x1c80   :  { %v4426_v15 = vsel %vm487_vm0, %v4422_v49, 0.0 }
0x1c81   :  { %4427 = vadd.xlane.f32.xlu0 %v4426_v15  ;;  %v4708_v15 = vld [vmem:[%s10366_s0] sm:$0xff] }
0x1c82   :  { %v8332_v16 = vpack.c.bf16 %v4709_v50, %v4708_v15 }
0x1c84   :  { %8333 = vmatprep.subr.bf16.mxu1 %v8332_v16 }
0x1d0e   :  { %v4428_v23 = vpop.xlane.xlu0 %4427 }
0x1d0f   :  { %v4430_v8 = vmul.f32 0.03125, %v4428_v23  ;;  %v4711_v23 = vld [vmem:[%s10366_s0 + $0x18] sm:$0xff] }
0x1d11   :  { %v4432_v21 = vadd.f32 1e-12, %v4430_v8  ;;  %v8336_v8 = vpack.c.bf16 %v4711_v23, %v4710_v37  ;;  %v10089_v23 = vld [vmem:[%s10369_s18 + $0x8] sm:$0xff] }
0x1d13   :  { %8526 = vrsqrt.f32 %v4432_v21  ;;  %v4703_v21 = vld [vmem:[%s10367_s30] sm:$0xff] }
0x1d1d   :  { %v8527_v24 = vpop.eup %8526 }
0x1d1e   :  { %v4436_v25 = vmul.f32 %v8527_v24, %v4420_v14  ;;  %v4699_v14 = vld [vmem:[%s10365_s16 + $0x8] sm:$0xff] }
0x1d1f   :  { %v8316_v49 = vpack.c.bf16 %v4699_v14, %v4698_v13  ;;  %v4704_v24 = vld [vmem:[%s10367_s30 + $0x8] sm:$0xff] }
0x1d20   :  { %v4444_v27 = vmul.f32 %v7435_v0, %v4436_v25  ;;  %v8324_v25 = vpack.c.bf16 %v4704_v24, %v4703_v21 }
0x1d21   :  { %8317 = vmatprep.subr.bf16.mxu0 %v8316_v49 }
0x1d22   :  { %v4452_v28 = vadd.f32 %v7436_v1, %v4444_v27 }
0x1d24   :  { %8021 = vmatmul.mubr.msk.f32.vlgmr.msra.gmra.mrb[46].mxu0 %vm487_vm0, %v4452_v28 }
0x1d25   :  { %8319 = vmatpush3.bf16.msra.mxu0 %v8316_v49 }
0x1d26   :  { %8321 = vmatprep.subr.bf16.mxu0 %v8320_v19 }
0x1d29   :  { %8323 = vmatpush3.bf16.msra.mxu0 %v8320_v19 }
0x1d2a   :  { %8325 = vmatprep.subr.bf16.mxu0 %v8324_v25 }
0x1df7   :  { %v8022_v45 = vpop.f32.mrb[46].mxu0 }
0x1df8   :  { %v4553_v22 = vadd.f32 %v8022_v45, %v7437_v44  ;;  %v4547_v57 = vpop.f32.mrb[47].mxu0  ;;  %v4706_v45 = vld [vmem:[%s10367_s30 + $0x18] sm:$0xff] }
0x1df9   :  { %v4548_v46 = vadd.f32 %v7437_v44, %v4547_v57  ;;  %v4705_v44 = vld [vmem:[%s10367_s30 + $0x10] sm:$0xff] }
0x1dfa   :  { %v4559_v47 = vmul.f32 0.70710677, %v4553_v22  ;;  %v4557_v58 = vmul.f32 0.5, %v4553_v22 }
0x1dfb   :  { %v4558_v48 = vmul.f32 0.70710677, %v4548_v46  ;;  %v4556_v10 = vmul.f32 0.5, %v4548_v46  ;;  %v8328_v46 = vpack.c.bf16 %v4706_v45, %v4705_v44 }
0x1dfc   :  { %8528 = verf.f32 %v4559_v47  ;;  %v7445_v47 = vld [vmem:[#allocation35] ss:$0 sm:$0xff] }
0x1dfd   :  { %8530 = verf.f32 %v4558_v48  ;;  %v7451_v48 = vld [vmem:[%s10368_s21] ss:$0 sm:$0xff] }
0x1e06   :  { %v8529_v51 = vpop.eup %8528 }
0x1e07   :  { %v8531_v52 = vpop.eup %8530  ;;  %v4563_v54 = vadd.f32 1.0, %v8529_v51 }
0x1e08   :  { %v4562_v56 = vadd.f32 1.0, %v8531_v52 }
0x1e09   :  { %v4565_v60 = vmul.f32 %v4563_v54, %v4557_v58 }
0x1e0a   :  { %v4564_v55 = vmul.f32 %v4562_v56, %v4556_v10 }
0x1e0c   :  { %8039 = vmatprep.mubr.msk.f32.mxu1 %vm4572_vm6, %v4564_v55 }
0x1e0d   :  { %8040 = vmatmul.mubr.msk.f32.vlgmr.msra.gmra.mrb[48].mxu1 %vm4572_vm6, %v4565_v60 }
0x1e0e   :  { %8335 = vmatpush3.bf16.msra.mxu1 %v8332_v16 }
0x1e0f   :  { %8337 = vmatprep.subr.bf16.mxu1 %v8336_v8 }
0x1e12   :  { %8339 = vmatpush3.bf16.msra.mxu1 %v8336_v8 }
0x1e13   :  { %8080 = vmatprep.subr.mxu1 %v9213_v20 }
0x1ee0   :  { %v8041_v61 = vpop.f32.mrb[48].mxu1 }
0x1ee1   :  { %v4645_v62 = vpop.f32.mrb[49].mxu1  ;;  %v4651_v63 = vadd.f32 %v8041_v61, %v7440_v26 }
0x1ee2   :  { %v4646_v0 = vadd.f32 %v7440_v26, %v4645_v62  ;;  %v7448_v26 = vld [vmem:[#allocation37] ss:$0 sm:$0xff] }
0x1ee3   :  { %v4655_v2 = vadd.f32 %v4651_v63, %v4452_v28 }
0x1ee4   :  { %v4654_v43 = vadd.f32 %v4646_v0, %v9982_v3 }
0x1ee5   :  { %v4659_v4 = vsel %vm487_vm0, %v4655_v2, 0.0 }
0x1ee6   :  { %v4656_v1 = vsel %vm487_vm0, %v4654_v43, 0.0 }
0x1ee7   :  { %4657 = vadd.xlane.f32.xlu0 %v4656_v1 }
0x1eeb   :  { %4660 = vadd.xlane.f32.xlu0 %v4659_v4 }
0x1f74   :  { %v4658_v5 = vpop.xlane.xlu0 %4657 }
0x1f75   :  { %v4662_v53 = vmul.f32 0.03125, %v4658_v5 }
0x1f77   :  { %v4664_v6 = vsub.f32 %v4654_v43, %v4662_v53 }
0x1f78   :  { %v4661_v7 = vpop.xlane.xlu0 %4660 }
0x1f79   :  { %v4663_v59 = vmul.f32 0.03125, %v4661_v7  ;;  %v4666_v41 = vmul.f32 %v4664_v6, %v4664_v6 }
0x1f7b   :  { %v4665_v9 = vsub.f32 %v4655_v2, %v4663_v59  ;;  %v4668_v3 = vsel %vm487_vm0, %v4666_v41, 0.0 }
0x1f7c   :  { %4669 = vadd.xlane.f32.xlu0 %v4668_v3 }
0x1f7d   :  { %v4667_v11 = vmul.f32 %v4665_v9, %v4665_v9 }
0x1f7f   :  { %v4671_v12 = vsel %vm487_vm0, %v4667_v11, 0.0 }
0x1f80   :  { %4672 = vadd.xlane.f32.xlu1 %v4671_v12 }
0x2009   :  { %v4670_v27 = vpop.xlane.xlu0 %4669 }
0x200a   :  { %v4674_v28 = vmul.f32 0.03125, %v4670_v27 }
0x200c   :  { %v4676_v29 = vadd.f32 1e-12, %v4674_v28 }
0x200d   :  { %v4673_v30 = vpop.xlane.xlu1 %4672 }
0x200e   :  { %8532 = vrsqrt.f32 %v4676_v29  ;;  %v4675_v31 = vmul.f32 0.03125, %v4673_v30 }
0x2010   :  { %v4677_v32 = vadd.f32 1e-12, %v4675_v31 }
0x2012   :  { %8534 = vrsqrt.f32 %v4677_v32 }
0x2018   :  { %v8533_v33 = vpop.eup %8532 }
0x2019   :  { %v4680_v35 = vmul.f32 %v8533_v33, %v4664_v6 }
0x201b   :  { %v4688_v38 = vmul.f32 %v7443_v34, %v4680_v35 }
0x201c   :  { %v8535_v39 = vpop.eup %8534 }
0x201d   :  { %v4681_v40 = vmul.f32 %v8535_v39, %v4665_v9  ;;  %v10020_v42 = vadd.f32 %v7444_v36, %v4688_v38 }
0x201f   :  { %v4689_v22 = vmul.f32 %v7443_v34, %v4681_v40  ;;  %8050 = vmatprep.mubr.msk.f32.mxu0 %vm487_vm0, %v10020_v42  ;;  %8072 = vmatprep.mubr.msk.f32.mxu1 %vm487_vm0, %v10020_v42 }
0x2021   :  { %v10028_v57 = vadd.f32 %v7444_v36, %v4689_v22 }
0x2023   :  { %8051 = vmatmul.mubr.msk.f32.vlgmr.msra.gmra.mrb[48].mxu0 %vm487_vm0, %v10028_v57  ;;  %8073 = vmatmul.mubr.msk.f32.vlgmr.msra.gmra.mrb[50].mxu1 %vm487_vm0, %v10028_v57 }
0x2024   :  { %8327 = vmatpush3.bf16.msra.mxu0 %v8324_v25  ;;  %8061 = vmatprep.mubr.msk.f32.mxu0 %vm487_vm0, %v10020_v42  ;;  %v10094_v25 = vld [vmem:[%s10369_s18] sm:$0xff] }
0x2025   :  { %8329 = vmatprep.subr.bf16.mxu0 %v8328_v46  ;;  %8082 = vmatprep.mubr.msk.f32.mxu1 %vm9212_vm1, %v9213_v20 }
0x2028   :  { %8331 = vmatpush3.bf16.msra.mxu0 %v8328_v46 }
0x2029   :  { %8075 = vmatprep.subr.mxu0 %v9213_v20 }
0x202b   :  { %8062 = vmatmul.mubr.msk.f32.vlgmr.msra.gmra.mrb[50].mxu0 %vm487_vm0, %v10028_v57 }
0x202c   :  { %8077 = vmatprep.mubr.msk.f32.mxu0 %vm9212_vm1, %v9213_v20 }
0x20f6   :  { %v8052_v51 = vpop.f32.mrb[48].mxu0  ;;  %v8074_v52 = vpop.f32.mrb[50].mxu1 }
0x20f7   :  { %v10044_v54 = vadd.f32 %v8052_v51, %v7445_v47  ;;  %v10046_v10 = vadd.f32 %v8074_v52, %v7451_v48  ;;  %v4798_v56 = vpop.f32.mrb[49].mxu0  ;;  %v4960_v58 = vpop.f32.mrb[51].mxu1 }
0x20f8   :  { %v10048_v55 = vadd.f32 %v7445_v47, %v4798_v56  ;;  %v10050_v60 = vadd.f32 %v7451_v48, %v4960_v58 }
0x20fa   :  { %8081 = vmatpush3.msra.mxu1 %v10050_v60  ;;  %5130 = vrot.lane.b32.xlu1 %v10048_v55, %s9214_s7 }
0x20fb   :  { %8090 = vmatprep.subr.mxu1 %v9213_v20 }
0x20fe   :  { %v8063_v61 = vpop.f32.mrb[50].mxu0 }
0x20ff   :  { %v10056_v62 = vadd.f32 %v8063_v61, %v7448_v26  ;;  %v4879_v63 = vpop.f32.mrb[51].mxu0 }
0x2100   :  { %v10058_v0 = vadd.f32 %v7448_v26, %v4879_v63  ;;  %v10130_v63 = vld [vmem:[%s10369_s18 + $0x10] sm:$0xff] }
0x2102   :  { %5132 = vrot.lane.b32.xlu0 %v10058_v0, %s9214_s7  ;;  %8076 = vmatpush3.xpose.msk.msra.mxu0 %vm857_vm2, %v10058_v0 }
0x2103   :  { %8085 = vmatprep.subr.mxu0 %v9213_v20 }
0x2105   :  { %8078 = vmatmul.mubr.msk.f32.vlgmr.msra.gmra.mrb[52].mxu0 %vm857_vm2, %v10048_v55 }
0x2106   :  { %8087 = vmatprep.mubr.msk.f32.mxu0 %vm9212_vm1, %v9213_v20 }
0x216c   :  { %v5131_v1 = vpop.permute.xlu1 %5130 }
0x2174   :  { %v5133_v43 = vpop.permute.xlu0 %5132 }
0x2175   :  { %8086 = vmatpush3.xpose.msk.msra.mxu0 %vm857_vm2, %v5133_v43 }
0x2176   :  { %8095 = vmatprep.subr.mxu0 %v9213_v20 }
0x2178   :  { %8088 = vmatmul.mubr.msk.f32.vlgmr.msra.gmra.mrb[54].mxu0 %vm857_vm2, %v5131_v1 }
0x2179   :  { %8097 = vmatprep.mubr.msk.f32.mxu0 %vm9212_vm1, %v9213_v20  ;;  %8096 = vmatpush3.msra.mxu0 %v10089_v23 }
0x217a   :  { %8105 = vmatprep.subr.mxu0 %v9213_v20 }
0x21d8   :  { %v5041_v2 = vpop.f32.mrb[52].mxu0 }
0x21d9   :  { %v5045_v4 = vmul.f32 0.35355338, %v5041_v2  ;;  %v8079_v5 = vpop.f32.mrb[53].mxu0 }
0x21db   :  { %v5046_v53 = vsel %vm857_vm2, %v5045_v4, -inf }
0x21dc   :  { %5047 = vmax.xlane.f32.xlu1 %v5046_v53 }
0x224b   :  { %v5204_v6 = vpop.f32.mrb[54].mxu0 }
0x224c   :  { %v5208_v7 = vmul.f32 0.35355338, %v5204_v6  ;;  %v8089_v59 = vpop.f32.mrb[55].mxu0 }
0x224e   :  { %v5209_v41 = vsel %vm857_vm2, %v5208_v7, -inf }
0x224f   :  { %5210 = vmax.xlane.f32.xlu0 %v5209_v41 }
0x2269   :  { %v5048_v9 = vpop.xlane.xlu1 %5047 }
0x226a   :  { %v5049_v3 = vsub.f32 %v5045_v4, %v5048_v9 }
0x226c   :  { %v5050_v11 = vmul.f32 1.442695, %v5049_v3  ;;  %v10147_v3 = vld [vmem:[%s10369_s18 + $0x18] sm:$0xff] }
0x226e   :  { %8536 = vpow2.f32 %v5050_v11 }
0x2278   :  { %v8537_v12 = vpop.eup %8536 }
0x2279   :  { %v5052_v13 = vsel %vm857_vm2, %v8537_v12, 0.0 }
0x227a   :  { %5053 = vadd.xlane.f32.xlu0 %v5052_v13 }
0x2290   :  { %5221 = vrot.lane.b32.xlu0 %v10050_v60, %s9214_s7 }
0x22dc   :  { %v5211_v14 = vpop.xlane.xlu0 %5210 }
0x22dd   :  { %v5212_v49 = vsub.f32 %v5208_v7, %v5211_v14 }
0x22df   :  { %v5213_v15 = vmul.f32 1.442695, %v5212_v49 }
0x22e1   :  { %8538 = vpow2.f32 %v5213_v15 }
0x22eb   :  { %v8539_v50 = vpop.eup %8538 }
0x22ec   :  { %v5215_v16 = vsel %vm857_vm2, %v8539_v50, 0.0 }
0x22ed   :  { %5216 = vadd.xlane.f32.xlu1 %v5215_v16 }
0x22fe   :  { %5445 = vrot.lane.b32.xlu1 %v10058_v0, %s9215_s27 }
0x2302   :  { %5443 = vrot.lane.b32.xlu1 %v10048_v55, %s9215_s27 }
0x2307   :  { %v5054_v18 = vpop.xlane.xlu0 %5053 }
0x2308   :  { %8540 = vrcp.f32 %v5054_v18 }
0x230b   :  { %v5222_v37 = vpop.permute.xlu0 %5221 }
0x2312   :  { %v8541_v17 = vpop.eup %8540 }
0x2313   :  { %v5056_v19 = vmul.f32 %v8541_v17, %v8537_v12 }
0x2315   :  { %8083 = vmatmul.mubr.msk.f32.vlgmr.msra.gmra.mrb[52].mxu1 %vm857_vm2, %v5056_v19 }
0x2316   :  { %8091 = vmatpush3.msra.mxu1 %v5222_v37  ;;  %8092 = vmatprep.mubr.msk.f32.mxu1 %vm9212_vm1, %v9213_v20 }
0x2317   :  { %8100 = vmatprep.subr.mxu1 %v9213_v20 }
0x237a   :  { %v5217_v8 = vpop.xlane.xlu1 %5216 }
0x237b   :  { %8542 = vrcp.f32 %v5217_v8 }
0x237e   :  { %v5446_v29 = vpop.permute.xlu1 %5445 }
0x2382   :  { %v5444_v32 = vpop.permute.xlu1 %5443 }
0x2385   :  { %v8543_v21 = vpop.eup %8542 }
0x2386   :  { %v5219_v24 = vmul.f32 %v8543_v21, %v8539_v50 }
0x2388   :  { %8093 = vmatmul.mubr.msk.f32.vlgmr.msra.gmra.mrb[54].mxu1 %vm857_vm2, %v5219_v24 }
0x2389   :  { %8101 = vmatpush3.msra.mxu1 %v10094_v25  ;;  %8102 = vmatprep.mubr.msk.f32.mxu1 %vm9212_vm1, %v9213_v20 }
0x238a   :  { %8110 = vmatprep.subr.mxu1 %v9213_v20 }
0x23e8   :  { %v5126_v27 = vpop.f32.mrb[52].mxu1 }
0x23e9   :  { %v8084_v28 = vpop.f32.mrb[53].mxu1  ;;  %8103 = vmatmul.mubr.msk.f32.vlgmr.msra.gmra.mrb[56].mxu1 %vm857_vm2, %v5126_v27 }
0x23ea   :  { %8112 = vmatprep.mubr.msk.f32.mxu1 %vm9212_vm1, %v9213_v20 }
0x245b   :  { %v5293_v30 = vpop.f32.mrb[54].mxu1 }
0x245c   :  { %v8094_v31 = vpop.f32.mrb[55].mxu1  ;;  %8098 = vmatmul.mubr.msk.f32.vlgmr.msra.gmra.mrb[56].mxu0 %vm857_vm2, %v5293_v30 }
0x245d   :  { %8106 = vmatpush3.xpose.msk.msra.mxu0 %vm857_vm2, %v5446_v29  ;;  %8107 = vmatprep.mubr.msk.f32.mxu0 %vm9212_vm1, %v9213_v20 }
0x245e   :  { %8115 = vmatprep.subr.mxu0 %v9213_v20 }
0x2460   :  { %8108 = vmatmul.mubr.msk.f32.vlgmr.msra.gmra.mrb[58].mxu0 %vm857_vm2, %v5444_v32 }
0x2461   :  { %8117 = vmatprep.mubr.msk.f32.mxu0 %vm9212_vm1, %v9213_v20  ;;  %8116 = vmatpush3.msra.mxu0 %v10130_v63 }
0x2462   :  { %8125 = vmatprep.subr.mxu0 %v9213_v20 }
0x24bc   :  { %v5439_v33 = vpop.f32.mrb[56].mxu1 }
0x24bd   :  { %v8104_v34 = vpop.f32.mrb[57].mxu1 }
0x252f   :  { %v5366_v35 = vpop.f32.mrb[56].mxu0 }
0x2530   :  { %v5440_v36 = vadd.f32 %v5439_v33, %v5366_v35  ;;  %v8099_v38 = vpop.f32.mrb[57].mxu0 }
0x2533   :  { %v5517_v39 = vpop.f32.mrb[58].mxu0 }
0x2534   :  { %v5521_v40 = vmul.f32 0.35355338, %v5517_v39  ;;  %v8109_v44 = vpop.f32.mrb[59].mxu0 }
0x2536   :  { %v5522_v45 = vsel %vm857_vm2, %v5521_v40, -inf }
0x2537   :  { %5523 = vmax.xlane.f32.xlu1 %v5522_v45 }
0x2548   :  { %5685 = vrot.lane.b32.xlu1 %v10058_v0, %s9216_s13 }
0x254c   :  { %5683 = vrot.lane.b32.xlu1 %v10048_v55, %s9216_s13 }
0x25c4   :  { %v5524_v22 = vpop.xlane.xlu1 %5523 }
0x25c5   :  { %v5525_v46 = vsub.f32 %v5521_v40, %v5524_v22 }
0x25c7   :  { %v5526_v47 = vmul.f32 1.442695, %v5525_v46 }
0x25c8   :  { %v5686_v55 = vpop.permute.xlu1 %5685 }
0x25c9   :  { %8544 = vpow2.f32 %v5526_v47 }
0x25cc   :  { %v5684_v61 = vpop.permute.xlu1 %5683 }
0x25d3   :  { %v8545_v48 = vpop.eup %8544 }
0x25d4   :  { %v5528_v51 = vsel %vm857_vm2, %v8545_v48, 0.0 }
0x25d5   :  { %5529 = vadd.xlane.f32.xlu0 %v5528_v51 }
0x25eb   :  { %5533 = vrot.lane.b32.xlu0 %v10050_v60, %s9215_s27 }
0x2662   :  { %v5530_v52 = vpop.xlane.xlu0 %5529 }
0x2663   :  { %8546 = vrcp.f32 %v5530_v52 }
0x2666   :  { %v5534_v56 = vpop.permute.xlu0 %5533 }
0x2667   :  { %8111 = vmatpush3.msra.mxu1 %v5534_v56 }
0x2668   :  { %8120 = vmatprep.subr.mxu1 %v9213_v20 }
0x266d   :  { %v8547_v58 = vpop.eup %8546 }
0x266e   :  { %v5532_v26 = vmul.f32 %v8547_v58, %v8545_v48 }
0x2670   :  { %8113 = vmatmul.mubr.msk.f32.vlgmr.msra.gmra.mrb[58].mxu1 %vm857_vm2, %v5532_v26 }
0x2671   :  { %8121 = vmatpush3.xpose.msk.msra.mxu1 %vm857_vm2, %v5686_v55  ;;  %8122 = vmatprep.mubr.msk.f32.mxu1 %vm9212_vm1, %v9213_v20 }
0x2672   :  { %8130 = vmatprep.subr.mxu1 %v9213_v20 }
0x2674   :  { %8123 = vmatmul.mubr.msk.f32.vlgmr.msra.gmra.mrb[60].mxu1 %vm857_vm2, %v5684_v61 }
0x2675   :  { %8132 = vmatprep.mubr.msk.f32.mxu1 %vm9212_vm1, %v9213_v20  ;;  %8131 = vmatpush3.msra.mxu1 %v10147_v3 }
0x2676   :  { %8140 = vmatprep.subr.mxu1 %v9213_v20 }
0x2743   :  { %v5605_v0 = vpop.f32.mrb[58].mxu1 }
0x2744   :  { %v8114_v43 = vpop.f32.mrb[59].mxu1  ;;  %8118 = vmatmul.mubr.msk.f32.vlgmr.msra.gmra.mrb[60].mxu0 %vm857_vm2, %v5605_v0 }
0x2745   :  { %8127 = vmatprep.mubr.msk.f32.mxu0 %vm9212_vm1, %v9213_v20 }
0x2747   :  { %v5757_v1 = vpop.f32.mrb[60].mxu1 }
0x2748   :  { %v5761_v2 = vmul.f32 0.35355338, %v5757_v1  ;;  %v8124_v4 = vpop.f32.mrb[61].mxu1 }
0x274a   :  { %v5762_v5 = vsel %vm857_vm2, %v5761_v2, -inf }
0x274b   :  { %5763 = vmax.xlane.f32.xlu0 %v5762_v5 }
0x2761   :  { %5773 = vrot.lane.b32.xlu0 %v10050_v60, %s9216_s13 }
0x2765   :  { %6084 = vrot.lane.b32.xlu0 %v10044_v54, %s9214_s7 }
0x27d8   :  { %v5764_v53 = vpop.xlane.xlu0 %5763 }
0x27d9   :  { %v5765_v6 = vsub.f32 %v5761_v2, %v5764_v53 }
0x27db   :  { %v5766_v7 = vmul.f32 1.442695, %v5765_v6 }
0x27dc   :  { %v5774_v59 = vpop.permute.xlu0 %5773 }
0x27dd   :  { %8548 = vpow2.f32 %v5766_v7  ;;  %8126 = vmatpush3.msra.mxu0 %v5774_v59 }
0x27de   :  { %8135 = vmatprep.subr.mxu0 %v9213_v20 }
0x27e0   :  { %v6085_v50 = vpop.permute.xlu0 %6084 }
0x27e7   :  { %v8549_v41 = vpop.eup %8548 }
0x27e8   :  { %v5768_v9 = vsel %vm857_vm2, %v8549_v41, 0.0 }
0x27e9   :  { %5769 = vadd.xlane.f32.xlu1 %v5768_v9 }
0x27fa   :  { %6086 = vrot.lane.b32.xlu1 %v10056_v62, %s9214_s7 }
0x2817   :  { %v5678_v60 = vpop.f32.mrb[60].mxu0 }
0x2818   :  { %v5682_v11 = vadd.f32 %v5678_v60, %v5440_v36  ;;  %v8119_v12 = vpop.f32.mrb[61].mxu0 }
0x2876   :  { %v5770_v13 = vpop.xlane.xlu1 %5769 }
0x2877   :  { %8550 = vrcp.f32 %v5770_v13 }
0x287a   :  { %v6087_v15 = vpop.permute.xlu1 %6086 }
0x2881   :  { %v8551_v14 = vpop.eup %8550 }
0x2882   :  { %v5772_v49 = vmul.f32 %v8551_v14, %v8549_v41 }
0x2884   :  { %8128 = vmatmul.mubr.msk.f32.vlgmr.msra.gmra.mrb[62].mxu0 %vm857_vm2, %v5772_v49  ;;  %v7486_v49 = vld [vmem:[%s10370_s4] ss:$0 sm:$0xff] }
0x2885   :  { %8136 = vmatpush3.xpose.msk.msra.mxu0 %vm857_vm2, %v10056_v62  ;;  %8137 = vmatprep.mubr.msk.f32.mxu0 %vm9212_vm1, %v9213_v20 }
0x2886   :  { %8145 = vmatprep.subr.mxu0 %v9213_v20 }
0x2888   :  { %8138 = vmatmul.mubr.msk.f32.vlgmr.msra.gmra.mrb[64].mxu0 %vm857_vm2, %v10044_v54 }
0x2889   :  { %8146 = vmatpush3.xpose.msk.msra.mxu0 %vm857_vm2, %v6087_v15  ;;  %8147 = vmatprep.mubr.msk.f32.mxu0 %vm9212_vm1, %v9213_v20 }
0x288a   :  { %8155 = vmatprep.subr.mxu0 %v9213_v20 }
0x288c   :  { %8148 = vmatmul.mubr.msk.f32.vlgmr.msra.gmra.mrb[66].mxu0 %vm857_vm2, %v6085_v50 }
0x288d   :  { %8156 = vmatpush3.msra.mxu0 %v10089_v23  ;;  %8157 = vmatprep.mubr.msk.f32.mxu0 %vm9212_vm1, %v9213_v20 }
0x288e   :  { %8165 = vmatprep.subr.mxu0 %v9213_v20 }
0x2957   :  { %v5845_v16 = vpop.f32.mrb[62].mxu0 }
0x2958   :  { %v8129_v18 = vpop.f32.mrb[63].mxu0  ;;  %8133 = vmatmul.mubr.msk.f32.vlgmr.msra.gmra.mrb[62].mxu1 %vm857_vm2, %v5845_v16 }
0x2959   :  { %8141 = vmatpush3.msra.mxu1 %v10046_v10  ;;  %8142 = vmatprep.mubr.msk.f32.mxu1 %vm9212_vm1, %v9213_v20 }
0x295a   :  { %8150 = vmatprep.subr.mxu1 %v9213_v20 }
0x295b   :  { %v5995_v17 = vpop.f32.mrb[64].mxu0 }
0x295c   :  { %v5999_v19 = vmul.f32 0.35355338, %v5995_v17  ;;  %v8139_v37 = vpop.f32.mrb[65].mxu0 }
0x295e   :  { %v6000_v23 = vsel %vm857_vm2, %v5999_v19, -inf }
0x295f   :  { %6001 = vmax.xlane.f32.xlu1 %v6000_v23  ;;  %v6158_v8 = vpop.f32.mrb[66].mxu0 }
0x2960   :  { %v6162_v21 = vmul.f32 0.35355338, %v6158_v8  ;;  %v8149_v24 = vpop.f32.mrb[67].mxu0 }
0x2962   :  { %v6163_v27 = vsel %vm857_vm2, %v6162_v21, -inf }
0x2963   :  { %6164 = vmax.xlane.f32.xlu0 %v6163_v27 }
0x2970   :  { %6175 = vrot.lane.b32.xlu1 %v10046_v10, %s9214_s7 }
0x2974   :  { %6397 = vrot.lane.b32.xlu1 %v10044_v54, %s9215_s27 }
0x29ec   :  { %v6002_v28 = vpop.xlane.xlu1 %6001 }
0x29ed   :  { %v6003_v29 = vsub.f32 %v5999_v19, %v6002_v28 }
0x29ef   :  { %v6004_v30 = vmul.f32 1.442695, %v6003_v29 }
0x29f0   :  { %v6165_v31 = vpop.xlane.xlu0 %6164  ;;  %v6176_v48 = vpop.permute.xlu1 %6175 }
0x29f1   :  { %8552 = vpow2.f32 %v6004_v30  ;;  %v6166_v32 = vsub.f32 %v6162_v21, %v6165_v31 }
0x29f3   :  { %v6167_v33 = vmul.f32 1.442695, %v6166_v32 }
0x29f5   :  { %8554 = vpow2.f32 %v6167_v33 }
0x29fb   :  { %v8553_v34 = vpop.eup %8552 }
0x29fc   :  { %v6006_v35 = vsel %vm857_vm2, %v8553_v34, 0.0 }
0x29fd   :  { %6007 = vadd.xlane.f32.xlu0 %v6006_v35 }
0x29ff   :  { %v8555_v36 = vpop.eup %8554 }
0x2a00   :  { %v6169_v38 = vsel %vm857_vm2, %v8555_v36, 0.0 }
0x2a01   :  { %6170 = vadd.xlane.f32.xlu0 %v6169_v38 }
0x2a17   :  { %6399 = vrot.lane.b32.xlu0 %v10056_v62, %s9215_s27 }
0x2a2b   :  { %v5918_v39 = vpop.f32.mrb[62].mxu1 }
0x2a2c   :  { %v10183_v40 = vadd.f32 %v5918_v39, %v5682_v11  ;;  %v8134_v44 = vpop.f32.mrb[63].mxu1 }
0x2a2e   :  { %v6883_v16 = vadd.f32 %v7486_v49, %v10183_v40 }
0x2a8a   :  { %v6008_v45 = vpop.xlane.xlu0 %6007 }
0x2a8b   :  { %8556 = vrcp.f32 %v6008_v45 }
0x2a8e   :  { %v6171_v22 = vpop.xlane.xlu0 %6170 }
0x2a8f   :  { %8558 = vrcp.f32 %v6171_v22 }
0x2a92   :  { %v6400_v26 = vpop.permute.xlu0 %6399 }
0x2a95   :  { %v8557_v46 = vpop.eup %8556 }
0x2a96   :  { %v6010_v47 = vmul.f32 %v8557_v46, %v8553_v34 }
0x2a98   :  { %8143 = vmatmul.mubr.msk.f32.vlgmr.msra.gmra.mrb[64].mxu1 %vm857_vm2, %v6010_v47 }
0x2a99   :  { %v8559_v51 = vpop.eup %8558  ;;  %8151 = vmatpush3.msra.mxu1 %v6176_v48  ;;  %8152 = vmatprep.mubr.msk.f32.mxu1 %vm9212_vm1, %v9213_v20 }
0x2a9a   :  { %v6173_v52 = vmul.f32 %v8559_v51, %v8555_v36  ;;  %8160 = vmatprep.subr.mxu1 %v9213_v20 }
0x2a9c   :  { %8153 = vmatmul.mubr.msk.f32.vlgmr.msra.gmra.mrb[66].mxu1 %vm857_vm2, %v6173_v52 }
0x2a9d   :  { %8161 = vmatpush3.msra.mxu1 %v10094_v25  ;;  %8162 = vmatprep.mubr.msk.f32.mxu1 %vm9212_vm1, %v9213_v20  ;;  %v6398_v25 = vpop.permute.xlu1 %6397 }
0x2a9e   :  { %8170 = vmatprep.subr.mxu1 %v9213_v20 }
0x2b6b   :  { %v6080_v56 = vpop.f32.mrb[64].mxu1 }
0x2b6c   :  { %v8144_v58 = vpop.f32.mrb[65].mxu1  ;;  %8163 = vmatmul.mubr.msk.f32.vlgmr.msra.gmra.mrb[68].mxu1 %vm857_vm2, %v6080_v56 }
0x2b6d   :  { %8172 = vmatprep.mubr.msk.f32.mxu1 %vm9212_vm1, %v9213_v20 }
0x2b6f   :  { %v6247_v55 = vpop.f32.mrb[66].mxu1 }
0x2b70   :  { %v8154_v61 = vpop.f32.mrb[67].mxu1  ;;  %8158 = vmatmul.mubr.msk.f32.vlgmr.msra.gmra.mrb[68].mxu0 %vm857_vm2, %v6247_v55 }
0x2b71   :  { %8166 = vmatpush3.xpose.msk.msra.mxu0 %vm857_vm2, %v6400_v26  ;;  %8167 = vmatprep.mubr.msk.f32.mxu0 %vm9212_vm1, %v9213_v20 }
0x2b72   :  { %8175 = vmatprep.subr.mxu0 %v9213_v20 }
0x2b74   :  { %8168 = vmatmul.mubr.msk.f32.vlgmr.msra.gmra.mrb[70].mxu0 %vm857_vm2, %v6398_v25 }
0x2b75   :  { %8176 = vmatpush3.msra.mxu0 %v10130_v63  ;;  %8177 = vmatprep.mubr.msk.f32.mxu0 %vm9212_vm1, %v9213_v20 }
0x2b76   :  { %8185 = vmatprep.subr.mxu0 %v9213_v20 }
0x2c3f   :  { %v6393_v0 = vpop.f32.mrb[68].mxu1 }
0x2c40   :  { %v8164_v43 = vpop.f32.mrb[69].mxu1 }
0x2c43   :  { %v6320_v1 = vpop.f32.mrb[68].mxu0 }
0x2c44   :  { %v6394_v2 = vadd.f32 %v6393_v0, %v6320_v1  ;;  %v8159_v4 = vpop.f32.mrb[69].mxu0  ;;  %v7487_v0 = vld [vmem:[%s10371_s9] ss:$0 sm:$0xff] }
0x2c45   :  { %v7488_v1 = vld [vmem:[%s10372_s22] ss:$0 sm:$0xff] }
0x2c47   :  { %v6471_v5 = vpop.f32.mrb[70].mxu0 }
0x2c48   :  { %v6475_v53 = vmul.f32 0.35355338, %v6471_v5  ;;  %v8169_v6 = vpop.f32.mrb[71].mxu0  ;;  %v6929_v5 = vld [vmem:[%s10373_s23] sm:$0xff] }
0x2c4a   :  { %v6476_v7 = vsel %vm857_vm2, %v6475_v53, -inf }
0x2c4b   :  { %6477 = vmax.xlane.f32.xlu1 %v6476_v7  ;;  %v6931_v7 = vld [vmem:[%s10373_s23 + $0x10] sm:$0xff] }
0x2c5c   :  { %6639 = vrot.lane.b32.xlu1 %v10056_v62, %s9216_s13 }
0x2c60   :  { %6637 = vrot.lane.b32.xlu1 %v10044_v54, %s9216_s13 }
0x2cd8   :  { %v6478_v63 = vpop.xlane.xlu1 %6477 }
0x2cd9   :  { %v6479_v59 = vsub.f32 %v6475_v53, %v6478_v63  ;;  %v6930_v53 = vld [vmem:[%s10373_s23 + $0x8] sm:$0xff]  ;;  %v6932_v63 = vld [vmem:[%s10373_s23 + $0x18] sm:$0xff] }
0x2cda   :  { %v8340_v6 = vpack.c.bf16 %v6930_v53, %v6929_v5 }
0x2cdb   :  { %v6480_v41 = vmul.f32 1.442695, %v6479_v59  ;;  %v8344_v59 = vpack.c.bf16 %v6932_v63, %v6931_v7 }
0x2cdc   :  { %v6640_v54 = vpop.permute.xlu1 %6639 }
0x2cdd   :  { %8560 = vpow2.f32 %v6480_v41 }
0x2ce0   :  { %v6638_v14 = vpop.permute.xlu1 %6637 }
0x2ce7   :  { %v8561_v9 = vpop.eup %8560 }
0x2ce8   :  { %v6482_v60 = vsel %vm857_vm2, %v8561_v9, 0.0 }
0x2ce9   :  { %6483 = vadd.xlane.f32.xlu0 %v6482_v60 }
0x2cff   :  { %6487 = vrot.lane.b32.xlu0 %v10046_v10, %s9215_s27 }
0x2d76   :  { %v6484_v11 = vpop.xlane.xlu0 %6483 }
0x2d77   :  { %8562 = vrcp.f32 %v6484_v11 }
0x2d7a   :  { %v6488_v12 = vpop.permute.xlu0 %6487 }
0x2d7b   :  { %8171 = vmatpush3.msra.mxu1 %v6488_v12 }
0x2d7c   :  { %8180 = vmatprep.subr.mxu1 %v9213_v20 }
0x2d81   :  { %v8563_v62 = vpop.eup %8562 }
0x2d82   :  { %v6486_v13 = vmul.f32 %v8563_v62, %v8561_v9 }
0x2d84   :  { %8173 = vmatmul.mubr.msk.f32.vlgmr.msra.gmra.mrb[70].mxu1 %vm857_vm2, %v6486_v13  ;;  %v6934_v13 = vld [vmem:[%s10374_s3] sm:$0xff] }
0x2d85   :  { %8181 = vmatpush3.xpose.msk.msra.mxu1 %vm857_vm2, %v6640_v54  ;;  %8182 = vmatprep.mubr.msk.f32.mxu1 %vm9212_vm1, %v9213_v20 }
0x2d86   :  { %8190 = vmatprep.subr.mxu1 %v9213_v20 }
0x2d88   :  { %8183 = vmatmul.mubr.msk.f32.vlgmr.msra.gmra.mrb[72].mxu1 %vm857_vm2, %v6638_v14  ;;  %v6935_v14 = vld [vmem:[%s10374_s3 + $0x8] sm:$0xff] }
0x2d89   :  { %8191 = vmatpush3.msra.mxu1 %v10147_v3  ;;  %8192 = vmatprep.mubr.msk.f32.mxu1 %vm9212_vm1, %v9213_v20  ;;  %v6885_v3 = vadd.f32 %v6883_v16, %v10020_v42 }
0x2d8b   :  { %v6887_v23 = vsel %vm487_vm0, %v6885_v3, 0.0 }
0x2e57   :  { %v6559_v15 = vpop.f32.mrb[70].mxu1 }
0x2e58   :  { %v8174_v50 = vpop.f32.mrb[71].mxu1  ;;  %8178 = vmatmul.mubr.msk.f32.vlgmr.msra.gmra.mrb[72].mxu0 %vm857_vm2, %v6559_v15  ;;  %v6936_v15 = vld [vmem:[%s10374_s3 + $0x10] sm:$0xff] }
0x2e59   :  { %8187 = vmatprep.mubr.msk.f32.mxu0 %vm9212_vm1, %v9213_v20  ;;  %v6937_v50 = vld [vmem:[%s10374_s3 + $0x18] sm:$0xff] }
0x2e5a   :  { %v8352_v16 = vpack.c.bf16 %v6937_v50, %v6936_v15  ;;  %v7497_v50 = vld [vmem:[%s9473_s14] ss:$0 sm:$0xff] }
0x2e5b   :  { %v6711_v18 = vpop.f32.mrb[72].mxu1 }
0x2e5c   :  { %v6715_v17 = vmul.f32 0.35355338, %v6711_v18  ;;  %v8184_v19 = vpop.f32.mrb[73].mxu1  ;;  %v6938_v18 = vld [vmem:[%s10374_s3 + $0x20] sm:$0xff] }
0x2e5e   :  { %v6716_v37 = vsel %vm857_vm2, %v6715_v17, -inf }
0x2e5f   :  { %6717 = vmax.xlane.f32.xlu1 %v6716_v37  ;;  %v6940_v37 = vld [vmem:[%s10374_s3 + $0x30] sm:$0xff] }
0x2e63   :  { %6888 = vadd.xlane.f32.xlu1 %v6887_v23 }
0x2eec   :  { %v6718_v8 = vpop.xlane.xlu1 %6717 }
0x2eed   :  { %v6719_v21 = vsub.f32 %v6715_v17, %v6718_v8  ;;  %v6939_v17 = vld [vmem:[%s10374_s3 + $0x28] sm:$0xff]  ;;  %v7489_v8 = vld [vmem:[%s10375_s5] ss:$0 sm:$0xff] }
0x2eee   :  { %v8356_v19 = vpack.c.bf16 %v6939_v17, %v6938_v18 }
0x2eef   :  { %v6720_v24 = vmul.f32 1.442695, %v6719_v21 }
0x2ef0   :  { %v6889_v36 = vpop.xlane.xlu1 %6888 }
0x2ef1   :  { %8564 = vpow2.f32 %v6720_v24  ;;  %v6893_v38 = vmul.f32 0.03125, %v6889_v36 }
0x2ef3   :  { %v6895_v44 = vsub.f32 %v6885_v3, %v6893_v38  ;;  %v6941_v3 = vld [vmem:[%s10374_s3 + $0x38] sm:$0xff]  ;;  %v7492_v38 = vld [vmem:[%s10376_s8] ss:$0 sm:$0xff] }
0x2ef4   :  { %v8360_v23 = vpack.c.bf16 %v6941_v3, %v6940_v37 }
0x2ef5   :  { %v6897_v47 = vmul.f32 %v6895_v44, %v6895_v44 }
0x2ef7   :  { %v6899_v48 = vsel %vm487_vm0, %v6897_v47, 0.0 }
0x2efb   :  { %v8565_v27 = vpop.eup %8564 }
0x2efc   :  { %v6722_v20 = vsel %vm857_vm2, %v8565_v27, 0.0 }
0x2efd   :  { %6723 = vadd.xlane.f32.xlu0 %v6722_v20 }
0x2f13   :  { %6727 = vrot.lane.b32.xlu0 %v10046_v10, %s9216_s13 }
0x2f2b   :  { %v6632_v28 = vpop.f32.mrb[72].mxu0 }
0x2f2c   :  { %v6636_v29 = vadd.f32 %v6632_v28, %v6394_v2  ;;  %v8179_v30 = vpop.f32.mrb[73].mxu0 }
0x2f8a   :  { %v6724_v31 = vpop.xlane.xlu0 %6723 }
0x2f8b   :  { %8566 = vrcp.f32 %v6724_v31 }
0x2f8e   :  { %v6728_v42 = vpop.permute.xlu0 %6727 }
0x2f8f   :  { %8186 = vmatpush3.msra.mxu0 %v6728_v42 }
0x2f90   :  { %8341 = vmatprep.subr.bf16.mxu0 %v8340_v6 }
0x2f95   :  { %v8567_v32 = vpop.eup %8566 }
0x2f96   :  { %v6726_v33 = vmul.f32 %v8567_v32, %v8565_v27 }
0x2f98   :  { %8188 = vmatmul.mubr.msk.f32.vlgmr.msra.gmra.mrb[74].mxu0 %vm857_vm2, %v6726_v33 }
0x2f99   :  { %8343 = vmatpush3.bf16.msra.mxu0 %v8340_v6 }
0x2f9a   :  { %8345 = vmatprep.subr.bf16.mxu0 %v8344_v59 }
0x2f9d   :  { %8347 = vmatpush3.bf16.msra.mxu0 %v8344_v59 }
0x306b   :  { %v6799_v34 = vpop.f32.mrb[74].mxu0 }
0x306c   :  { %v8189_v35 = vpop.f32.mrb[75].mxu0  ;;  %8193 = vmatmul.mubr.msk.f32.vlgmr.msra.gmra.mrb[74].mxu1 %vm857_vm2, %v6799_v34 }
0x313f   :  { %v6872_v39 = vpop.f32.mrb[74].mxu1 }
0x3140   :  { %v6876_v40 = vadd.f32 %v6872_v39, %v6636_v29  ;;  %v8194_v10 = vpop.f32.mrb[75].mxu1 }
0x3142   :  { %v6884_v45 = vadd.f32 %v7486_v49, %v6876_v40  ;;  %v8348_v49 = vpack.c.bf16 %v6935_v14, %v6934_v13 }
0x3144   :  { %v6886_v22 = vadd.f32 %v6884_v45, %v10028_v57  ;;  %8349 = vmatprep.subr.bf16.mxu1 %v8348_v49 }
0x3145   :  { %8351 = vmatpush3.bf16.msra.mxu1 %v8348_v49 }
0x3146   :  { %v6890_v46 = vsel %vm487_vm0, %v6886_v22, 0.0  ;;  %8353 = vmatprep.subr.bf16.mxu1 %v8352_v16 }
0x3147   :  { %6891 = vadd.xlane.f32.xlu1 %v6890_v46 }
0x3149   :  { %8355 = vmatpush3.bf16.msra.mxu1 %v8352_v16 }
0x314a   :  { %8357 = vmatprep.subr.bf16.mxu1 %v8356_v19 }
0x314b   :  { %6900 = vadd.xlane.f32.xlu1 %v6899_v48 }
0x314d   :  { %8359 = vmatpush3.bf16.msra.mxu1 %v8356_v19 }
0x314e   :  { %8361 = vmatprep.subr.bf16.mxu1 %v8360_v23 }
0x3151   :  { %8363 = vmatpush3.bf16.msra.mxu1 %v8360_v23 }
0x31d4   :  { %v6892_v51 = vpop.xlane.xlu1 %6891 }
0x31d5   :  { %v6894_v52 = vmul.f32 0.03125, %v6892_v51 }
0x31d7   :  { %v6896_v56 = vsub.f32 %v6886_v22, %v6894_v52 }
0x31d8   :  { %v6901_v58 = vpop.xlane.xlu1 %6900 }
0x31d9   :  { %v6905_v55 = vmul.f32 0.03125, %v6901_v58  ;;  %v6898_v26 = vmul.f32 %v6896_v56, %v6896_v56 }
0x31db   :  { %v6907_v61 = vadd.f32 1e-12, %v6905_v55  ;;  %v6902_v57 = vsel %vm487_vm0, %v6898_v26, 0.0 }
0x31dc   :  { %6903 = vadd.xlane.f32.xlu1 %v6902_v57 }
0x31dd   :  { %8568 = vrsqrt.f32 %v6907_v61 }
0x31e7   :  { %v8569_v25 = vpop.eup %8568 }
0x31e8   :  { %v6911_v43 = vmul.f32 %v8569_v25, %v6895_v44 }
0x31ea   :  { %v6919_v2 = vmul.f32 %v7487_v0, %v6911_v43  ;;  %v7174_v43 = vld [vmem:[%s9468_s19 + $0x8] sm:$0xff] }
0x31ec   :  { %v10244_v4 = vadd.f32 %v7488_v1, %v6919_v2  ;;  %v7175_v2 = vld [vmem:[%s9468_s19 + $0x10] sm:$0xff] }
0x31ee   :  { %8203 = vmatprep.mubr.msk.f32.mxu0 %vm487_vm0, %v10244_v4 }
0x3269   :  { %v6904_v41 = vpop.xlane.xlu1 %6903 }
0x326a   :  { %v6906_v9 = vmul.f32 0.03125, %v6904_v41 }
0x326c   :  { %v6908_v60 = vadd.f32 1e-12, %v6906_v9 }
0x326e   :  { %8570 = vrsqrt.f32 %v6908_v60  ;;  %v7495_v60 = vld [vmem:[%s10377_s26] ss:$0 sm:$0xff] }
0x3278   :  { %v8571_v11 = vpop.eup %8570 }
0x3279   :  { %v6912_v12 = vmul.f32 %v8571_v11, %v6896_v56 }
0x327b   :  { %v6920_v62 = vmul.f32 %v7487_v0, %v6912_v12  ;;  %v7173_v0 = vld [vmem:[%s9468_s19] sm:$0xff] }
0x327c   :  { %v7496_v12 = vld [vmem:[%s9463_s20] ss:$0 sm:$0xff] }
0x327d   :  { %v6928_v54 = vadd.f32 %v7488_v1, %v6920_v62  ;;  %v8364_v1 = vpack.c.bf16 %v7174_v43, %v7173_v0 }
0x327f   :  { %8204 = vmatmul.mubr.msk.f32.vlgmr.msra.gmra.mrb[76].mxu0 %vm487_vm0, %v6928_v54  ;;  %8365 = vmatprep.subr.bf16.mxu0 %v8364_v1 }
0x3280   :  { %8367 = vmatpush3.bf16.msra.mxu0 %v8364_v1 }
0x3352   :  { %v8205_v21 = vpop.f32.mrb[76].mxu0 }
0x3353   :  { %v7029_v24 = vadd.f32 %v8205_v21, %v7489_v8  ;;  %v7023_v27 = vpop.f32.mrb[77].mxu0 }
0x3354   :  { %v7024_v20 = vadd.f32 %v7489_v8, %v7023_v27 }
0x3355   :  { %v7035_v28 = vmul.f32 0.70710677, %v7029_v24  ;;  %v7033_v34 = vmul.f32 0.5, %v7029_v24 }
0x3356   :  { %v7034_v29 = vmul.f32 0.70710677, %v7024_v20  ;;  %v7032_v32 = vmul.f32 0.5, %v7024_v20 }
0x3357   :  { %8572 = verf.f32 %v7035_v28 }
0x3358   :  { %8574 = verf.f32 %v7034_v29 }
0x3361   :  { %v8573_v30 = vpop.eup %8572 }
0x3362   :  { %v8575_v31 = vpop.eup %8574  ;;  %v7039_v42 = vadd.f32 1.0, %v8573_v30 }
0x3363   :  { %v7038_v33 = vadd.f32 1.0, %v8575_v31 }
0x3364   :  { %v7041_v36 = vmul.f32 %v7039_v42, %v7033_v34 }
0x3365   :  { %v7040_v35 = vmul.f32 %v7038_v33, %v7032_v32 }
0x3367   :  { %8222 = vmatprep.mubr.msk.f32.mxu1 %vm4572_vm6, %v7040_v35 }
0x3368   :  { %8223 = vmatmul.mubr.msk.f32.vlgmr.msra.gmra.mrb[76].mxu1 %vm4572_vm6, %v7041_v36 }
0x343b   :  { %v8224_v39 = vpop.f32.mrb[76].mxu1 }
0x343c   :  { %v7126_v40 = vadd.f32 %v8224_v39, %v7492_v38  ;;  %v7120_v10 = vpop.f32.mrb[77].mxu1 }
0x343d   :  { %v7121_v44 = vadd.f32 %v7492_v38, %v7120_v10 }
0x343e   :  { %v7130_v45 = vadd.f32 %v7126_v40, %v6928_v54 }
0x343f   :  { %v7129_v22 = vadd.f32 %v7121_v44, %v10244_v4  ;;  %v7176_v4 = vld [vmem:[%s9468_s19 + $0x18] sm:$0xff]  ;;  %s9217_s19 = smov [#allocation38]  }
0x3440   :  { %v7134_v46 = vsel %vm487_vm0, %v7130_v45, 0.0  ;;  %v8368_v5 = vpack.c.bf16 %v7176_v4, %v7175_v2  ;;  %s7282_s20 = sshll.u32 %s9217_s19, 4  ;;  %s7283_s20 = int_to_ptr.vmem [resolvable:$true] %s7282_s20 }
0x3441   :  { %7135 = vadd.xlane.f32.xlu0 %v7134_v46  ;;  %v7131_v47 = vsel %vm487_vm0, %v7129_v22, 0.0  ;;  %s9090_s14 = scalar_lea.vmem %s7283_s20, 256  ;;  %p9095_p3 = scmp.lt.s32.totalorder %s7283_s20, %s7283_s20 }
0x3442   :  { %7132 = vadd.xlane.f32.xlu1 %v7131_v47  ;;  %8369 = vmatprep.subr.bf16.mxu0 %v8368_v5  ;;  %p9091_p2 = scmp.ne.s32.totalorder %s7283_s20, %s9090_s14  ;;  %p9096_p4 = scmp.lt.s32.totalorder %s9090_s14, %s9090_s14 }
0x3443   :  { %8371 = vmatpush3.bf16.msra.mxu0 %v8368_v5 }
0x3444   :  { %p9097_p5 = por %p9096_p4, %p9095_p3 }
0x3446   :  { %p9098_p6 = pnand %p9097_p5, %p9091_p2 }
0x34ce   :  { %v7136_v48 = vpop.xlane.xlu0 %7135 }
0x34cf   :  { %v7138_v51 = vmul.f32 0.03125, %v7136_v48  ;;  %v7133_v52 = vpop.xlane.xlu1 %7132 }
0x34d0   :  { %v7137_v56 = vmul.f32 0.03125, %v7133_v52 }
0x34d1   :  { %v7140_v58 = vsub.f32 %v7130_v45, %v7138_v51 }
0x34d2   :  { %v7139_v55 = vsub.f32 %v7129_v22, %v7137_v56 }
0x34d3   :  { %v7142_v57 = vmul.f32 %v7140_v58, %v7140_v58 }
0x34d4   :  { %v7141_v26 = vmul.f32 %v7139_v55, %v7139_v55 }
0x34d5   :  { %v7146_v25 = vsel %vm487_vm0, %v7142_v57, 0.0 }
0x34d6   :  { %v7143_v61 = vsel %vm487_vm0, %v7141_v26, 0.0 }
0x34d7   :  { %7144 = vadd.xlane.f32.xlu1 %v7143_v61 }
0x34db   :  { %7147 = vadd.xlane.f32.xlu1 %v7146_v25 }
0x3564   :  { %v7145_v53 = vpop.xlane.xlu1 %7144 }
0x3565   :  { %v7149_v6 = vmul.f32 0.03125, %v7145_v53 }
0x3567   :  { %v7151_v7 = vadd.f32 1e-12, %v7149_v6 }
0x3568   :  { %v7148_v63 = vpop.xlane.xlu1 %7147 }
0x3569   :  { %8576 = vrsqrt.f32 %v7151_v7  ;;  %v7150_v59 = vmul.f32 0.03125, %v7148_v63 }
0x356b   :  { %v7152_v41 = vadd.f32 1e-12, %v7150_v59 }
0x356d   :  { %8578 = vrsqrt.f32 %v7152_v41 }
0x3573   :  { %v8577_v9 = vpop.eup %8576 }
0x3574   :  { %v7155_v11 = vmul.f32 %v8577_v9, %v7139_v55 }
0x3576   :  { %v7163_v62 = vmul.f32 %v7495_v60, %v7155_v11 }
0x3577   :  { %v8579_v54 = vpop.eup %8578 }
0x3578   :  { %v7156_v13 = vmul.f32 %v8579_v54, %v7140_v58  ;;  %v7171_v14 = vadd.f32 %v7496_v12, %v7163_v62 }
0x357a   :  { %v7164_v49 = vmul.f32 %v7495_v60, %v7156_v13  ;;  %8233 = vmatprep.mubr.msk.f32.mxu0 %vm487_vm0, %v7171_v14 }
0x357c   :  { %v7172_v15 = vadd.f32 %v7496_v12, %v7164_v49 }
0x357e   :  { %8234 = vmatmul.mubr.msk.f32.vlgmr.msra.gmra.mrb[78].mxu0 %vm487_vm0, %v7172_v15 }
0x3651   :  { %v8235_v16 = vpop.f32.mrb[78].mxu0 }
0x3652   :  { %v7262_v18 = vadd.f32 %v8235_v16, %v7497_v50  ;;  %v7256_v17 = vpop.f32.mrb[79].mxu0 }
0x3653   :  { %v7257_v19 = vadd.f32 %v7497_v50, %v7256_v17 }
0x3654   :  { %v7268_v37 = vmul.f32 0.70710677, %v7262_v18  ;;  %v7266_v21 = vmul.f32 0.5, %v7262_v18 }
0x3655   :  { %v7267_v3 = vmul.f32 0.70710677, %v7257_v19  ;;  %v7265_v27 = vmul.f32 0.5, %v7257_v19 }
0x3656   :  { %8580 = verf.f32 %v7268_v37 }
0x3657   :  { %8582 = verf.f32 %v7267_v3 }
0x3660   :  { %v8581_v23 = vpop.eup %8580 }
0x3661   :  { %v8583_v8 = vpop.eup %8582  ;;  %v7272_v24 = vadd.f32 1.0, %v8581_v23 }
0x3662   :  { %v7271_v20 = vadd.f32 1.0, %v8583_v8 }
0x3663   :  { %v7274_v28 = vmul.f32 %v7272_v24, %v7266_v21 }
0x3664   :  { %v7273_v29 = vmul.f32 %v7271_v20, %v7265_v27 }
0x3665   :  { %7276 = vst.msk [vmem:[#allocation38 + $0x8] sm:$0xff] %vm4572_vm6, %v7274_v28 }
0x3666   :  { %7275 = vst.msk [vmem:[#allocation38] sm:$0xff] %vm4572_vm6, %v7273_v29 }
0x3667   :  { %9101 = shalt.err (!%p9098_p6)
}
0x3668   :  { %s9102_s28 = scalar_lea.hbm %s9478_s6, 256 }
0x3669   :  { %p9103_p7 = scmp.ne.s32.totalorder %s9478_s6, %s9102_s28  ;;  %p9106_p8 = scmp.lt.u32.totalorder %s9102_s28, %s9478_s6 }
0x366b   :  { %p9108_p9 = pnand %p9106_p8, %p9103_p7 }
0x366d   :  { %9111 = shalt.err (!%p9108_p9)
}
0x366e   :  { %s9218_s1 = smov 128   ;;  %s9219_s17 = smov 8  }
0x366f   :  { %7288 = dma.vmem_to_hbm [thread:$0]  %s7283_s20, 256, %s9478_s6, [#allocation4], %s9218_s1, %s9218_s1, %s9219_s17  }
0x3670   :  { %9136 = dma.done.wait [#allocation4], 256  }
0x3671   :  { %9137 = vsyncadd [#allocation4], 4294967040 }
0x3672   :  { %7292 = vsyncpa [#allocation3], 1 }
0x3673   :  { %7293 = vsyncpa [#allocation6], 1 }
0x3674   :  { %7294 = vsyncpa [#allocation9], 1 }
0x3675   :  { %7295 = vsyncpa [#allocation12], 1 }
0x3676   :  { %7296 = vsyncpa [#allocation15], 1 }
0x3677   :  { %7297 = vsyncpa [#allocation18], 1 }
0x3678   :  { %7298 = vsyncpa [#allocation21], 1 }
0x3679   :  { %7299 = vsyncpa [#allocation24], 1 }
0x367a   :  { %7300 = vsyncpa [#allocation27], 1 }
0x367b   :  { %7301 = vsyncpa [#allocation30], 1 }
0x367c   :  { %7302 = vsyncpa [#allocation33], 1 }
0x367d   :  { %7303 = vsyncpa [#allocation36], 1 }
0x367e   :  { %7304 = vsyncpa [#allocation4], 1 }

</bundles_post_ra>
